<compile_context>
chip_gen: v5e
topology: v5e:2x2
jax: 0.10.0
libtpu: 0.0.40
codegen_flags: <defaults>
</compile_context>

<pallas_src>
import functools
import re

import jax
import jax.numpy as jnp
import numpy as np
from jax.experimental import pallas as pl
from jax.experimental.pallas import tpu as pltpu


# ---------------------------------------------------------------------------
# TPU generation detection (best effort; conservative fallback)
# ---------------------------------------------------------------------------
def _tpu_generation():
    """Returns the TPU generation number (4, 5, 6, 7, ...) or None."""
    try:
        dev = jax.devices()[0]
        if dev.platform != "tpu":
            return None
        m = re.search(r"(\d+)", dev.device_kind)
        return int(m.group(1)) if m else None
    except Exception:
        return None


# ---------------------------------------------------------------------------
# Kernel
# ---------------------------------------------------------------------------
def _edge_transition_kernel(
    bias_i_ref,   # (1, TI, H+Eout) f32 : n_i @ [w1i | wfi] + [b1 | bf]
    bias_j_ref,   # (1, TJ, H+Eout) f32 : n_j @ [w1j | wfj]
    edge_ref,     # (1, TI, TJ, Ein)    (f32 or bf16)
    w1f_ref,      # (Ein, H+Eout) bf16  : [w1e | wfe] fused along out dim
    w2_ref,       # (H, H)  bf16
    b2_ref,       # (1, H)  f32
    wf_ref,       # (H, Eout) bf16
    lng_ref, lnb_ref,   # (1, Eout) f32
    out_ref,      # (1, TI, TJ, Eout)
    *,
    ep_dtype,     # epilogue dtype: bf16 on v6e/v7x, f32 on v5e / unknown
):
    f32 = jnp.float32
    bf16 = jnp.bfloat16

    TI = bias_i_ref.shape[1]
    TJ = bias_j_ref.shape[1]
    Ein = edge_ref.shape[3]
    H = w2_ref.shape[0]
    Eout = wf_ref.shape[1]

    # Per-row bias terms (tiny: (TI|TJ, .), read once per tile).
    bias_i = bias_i_ref[0]                       # (TI, H+Eout)
    bias_j = bias_j_ref[0]                       # (TJ, H+Eout)
    bi1 = bias_i[:, :H].astype(ep_dtype)         # trunk layer-1, i rows (b1 folded)
    bj1 = bias_j[:, :H].astype(ep_dtype)         # trunk layer-1, j rows
    bif = bias_i[:, H:]                          # residual final, i rows (bf folded)
    bjf = bias_j[:, H:]                          # residual final, j rows

    # Edge tile flattened to 2-D for the MXU (layout-free: TJ % 8 == 0,
    # Ein % 128 == 0); the concat x = [edge, n_i, n_j] is never built.
    edge = edge_ref[0].reshape(TI * TJ, Ein).astype(bf16)

    # One fused K=Ein MXU pass covering trunk layer-1 (x @ w1, edge rows) and
    # the residual's final matmul (x @ wf, edge rows).
    fused = jnp.dot(edge, w1f_ref[...], preferred_element_type=f32)  # (TI*TJ, H+Eout)
    pre1 = fused[:, :H]
    y_edge = fused[:, H:]

    # Trunk layer 1: bias broadcast adds + ReLU in the epilogue dtype.
    h = (pre1.astype(ep_dtype).reshape(TI, TJ, H)
         + bi1[:, None, :] + bj1[None, :, :])
    h = jnp.maximum(h, 0).reshape(TI * TJ, H)

    # Trunk layer 2 (bias add + ReLU in the epilogue dtype; f32 accumulation).
    b2 = b2_ref[...].astype(ep_dtype)
    h = jnp.dot(h.astype(bf16), w2_ref[...], preferred_element_type=f32)
    h = jnp.maximum(h.astype(ep_dtype) + b2, 0)

    # final_layer(trunk(x) + x) == trunk(x) @ wf + x @ wf (decomposed).
    # Kept in f32 so the LayerNorm input stays full precision.
    y = jnp.dot(h.astype(bf16), wf_ref[...], preferred_element_type=f32) + y_edge
    y = y.reshape(TI, TJ, Eout) + bif[:, None, :] + bjf[None, :, :]

    # LayerNorm over channels (eps = 1e-5), single-pass f32 statistics.
    mean = jnp.mean(y, axis=-1, keepdims=True)
    meansq = jnp.mean(y * y, axis=-1, keepdims=True)
    var = jnp.maximum(meansq - mean * mean, 0.0)
    y = (y - mean) * jax.lax.rsqrt(var + 1e-5) * lng_ref[...] + lnb_ref[...]

    out_ref[...] = y.reshape(1, TI, TJ, Eout).astype(out_ref.dtype)


# ---------------------------------------------------------------------------
# Tile selection (VMEM-budget aware, prefers >= 8 grid steps; on 2-TC chips
# prefers an even total step count for megacore load balance)
# ---------------------------------------------------------------------------
def _tile_candidates(N):
    cands = {N}
    for t in (8, 16, 32, 64, 128, 256):
        if t <= N and N % t == 0:
            cands.add(t)
    return sorted(cands, reverse=True)


def _vmem_bytes_estimate(ti, tj, Ein, Eout, H, edge_bytes, out_bytes, ep_bytes):
    f32b, bf16b = 4, 2
    HE = H + Eout
    blk = ti * tj
    # Double-buffered pipelined blocks (edge in, out, per-row bias rows).
    io = 2 * (edge_bytes * blk * Ein + out_bytes * blk * Eout
              + f32b * (ti + tj) * HE)
    # Weights / small vectors (also double-buffered by the pipeline).
    # NOTE: these blocks are grid-constant; pipeline_mode=pl.Buffered(1)
    # single-buffering would free a few hundred KiB more VMEM.
    wts = 2 * (bf16b * (Ein * HE + H * H + H * Eout) + f32b * (H + 2 * Eout))
    # Live intermediates inside the body (rough upper bound).
    live = blk * (Ein * bf16b + HE * f32b + H * ep_bytes + 2 * Eout * f32b)
    return io + wts + live


def _auto_tiles(B, N, Ein, Eout, H, edge_bytes, out_bytes, ep_bytes,
                budget_bytes, min_grid_steps=8, prefer_even_steps=False):
    cands = _tile_candidates(N)
    fitting = [(ti, tj) for ti in cands for tj in cands
               if _vmem_bytes_estimate(ti, tj, Ein, Eout, H,
                                       edge_bytes, out_bytes, ep_bytes)
               <= budget_bytes]
    if not fitting:
        t = min(cands)
        return t, t

    def steps(p):
        return B * (N // p[0]) * (N // p[1])

    deep = [p for p in fitting if steps(p) >= min_grid_steps]
    pool = deep if deep else fitting

    def key(p):
        even = (steps(p) % 2 == 0) if prefer_even_steps else True
        return (even, p[0] * p[1], p[1])

    return max(pool, key=key)


# ---------------------------------------------------------------------------
# Wrapper
# ---------------------------------------------------------------------------
@functools.partial(jax.jit, static_argnames=("tile_i", "tile_j", "out_dtype"))
def edge_transition(node_embed, edge_embed, params, *, tile_i=None, tile_j=None,
                    out_dtype=jnp.float32):
    B, N, Cn = node_embed.shape
    Ein = edge_embed.shape[-1]
    Cb = params["w0"].shape[1]
    H = params["w1"].shape[1]
    Eout = params["wf"].shape[1]
    HE = H + Eout
    assert params["w1"].shape[0] == Ein + 2 * Cb == H

    bf16 = jnp.bfloat16
    f32 = jnp.float32

    # ---- generation-aware knobs -------------------------------------------
    gen = _tpu_generation()
    # bf16 VPU epilogue on v6e/v7x; v5e (no bf16 VPU) / unknown stay f32.
    ep_dtype = bf16 if (gen is not None and gen >= 6) else f32
    if gen is not None and gen <= 6:      # v4/v5/v6: 128 MiB physical VMEM
        vmem_budget = 72 * 1024 * 1024
        vmem_limit = 100 * 1024 * 1024
    else:                                 # v7x (64 MiB per TC) or unknown
        vmem_budget = 30 * 1024 * 1024
        vmem_limit = 48 * 1024 * 1024
    prefer_even = gen is None or gen >= 7  # 2 TensorCores per chip on v7x

    edge_bytes = np.dtype(edge_embed.dtype).itemsize
    out_bytes = np.dtype(out_dtype).itemsize
    ep_bytes = np.dtype(ep_dtype).itemsize

    if tile_i is None or tile_j is None:
        TI, TJ = _auto_tiles(B, N, Ein, Eout, H, edge_bytes, out_bytes, ep_bytes,
                             vmem_budget, prefer_even_steps=prefer_even)
    else:
        TI, TJ = tile_i, tile_j
    assert N % TI == 0 and N % TJ == 0
    assert TI == N or TI % 8 == 0
    assert TJ == N or TJ % 8 == 0
    est = _vmem_bytes_estimate(TI, TJ, Ein, Eout, H, edge_bytes, out_bytes, ep_bytes)
    if est > vmem_limit:
        raise ValueError(
            f"tile ({TI},{TJ}) needs ~{est >> 20} MiB VMEM > limit {vmem_limit >> 20} MiB")

    # ---- hoisted node-side work (plain XLA; O(B*N), tiny vs O(B*N^2)) ------
    w1 = params["w1"]
    wf = params["wf"]
    # Row-block split of w1/wf replaces the concat x = [edge, n_i, n_j]:
    #   rows [0:Ein] -> edge, [Ein:Ein+Cb] -> node_i, [Ein+Cb:] -> node_j.
    w1e, w1i, w1j = w1[:Ein], w1[Ein:Ein + Cb], w1[Ein + Cb:]
    wfe, wfi, wfj = wf[:Ein], wf[Ein:Ein + Cb], wf[Ein + Cb:]

    # initial_embed (Linear), once per node row.
    n = jnp.dot(node_embed.astype(bf16), params["w0"].astype(bf16),
                preferred_element_type=f32) + params["b0"]          # (B, N, Cb)
    n_bf = n.astype(bf16)

    # Per-row contributions to trunk layer-1 (x @ w1) and the residual final
    # matmul (x @ wf); tile-constant biases b1/bf folded into the i-side rows.
    wi = jnp.concatenate([w1i, wfi], axis=1).astype(bf16)           # (Cb, H+Eout)
    wj = jnp.concatenate([w1j, wfj], axis=1).astype(bf16)           # (Cb, H+Eout)
    b_fold = jnp.concatenate([params["b1"], params["bf"]], axis=1)  # (1, H+Eout)
    bias_i = jnp.dot(n_bf, wi, preferred_element_type=f32) + b_fold  # (B, N, HE)
    bias_j = jnp.dot(n_bf, wj, preferred_element_type=f32)           # (B, N, HE)

    # Fused weight for the two K=Ein matmuls that share the edge LHS.
    w1f = jnp.concatenate([w1e, wfe], axis=1).astype(bf16)          # (Ein, H+Eout)
    w2b = params["w2"].astype(bf16)
    wfb = wf.astype(bf16)

    grid = (B, N // TI, N // TJ)

    def wspec(shape):
        return pl.BlockSpec(shape, lambda b, i, j: (0, 0))

    in_specs = [
        pl.BlockSpec((1, TI, HE), lambda b, i, j: (b, i, 0)),        # bias_i rows
        pl.BlockSpec((1, TJ, HE), lambda b, i, j: (b, j, 0)),        # bias_j rows
        pl.BlockSpec((1, TI, TJ, Ein), lambda b, i, j: (b, i, j, 0)),
        wspec((Ein, HE)),
        wspec((H, H)), wspec((1, H)),
        wspec((H, Eout)),
        wspec((1, Eout)), wspec((1, Eout)),
    ]
    out_spec = pl.BlockSpec((1, TI, TJ, Eout), lambda b, i, j: (b, i, j, 0))

    # Advisory cost estimate so XLA can schedule around the custom call.
    flops = 2 * B * N * N * (Ein * HE + H * H + H * Eout)
    bytes_accessed = (edge_bytes * B * N * N * Ein + out_bytes * B * N * N * Eout
                      + 8 * B * N * HE + 2 * (Ein * HE + H * H + H * Eout))
    cost = pl.CostEstimate(flops=int(flops), transcendentals=int(B * N * N),
                           bytes_accessed=int(bytes_accessed))

    kernel = functools.partial(_edge_transition_kernel, ep_dtype=ep_dtype)

    return pl.pallas_call(
        kernel,
        out_shape=jax.ShapeDtypeStruct((B, N, N, Eout), out_dtype),
        grid_spec=pltpu.PrefetchScalarGridSpec(
            num_scalar_prefetch=0,
            grid=grid,
            in_specs=in_specs,
            out_specs=out_spec,
        ),
        compiler_params=pltpu.CompilerParams(
            dimension_semantics=("parallel", "parallel", "parallel"),
            vmem_limit_bytes=vmem_limit,
        ),
        cost_estimate=cost,
    )(bias_i, bias_j, edge_embed,
      w1f, w2b, params["b2"], wfb, params["ln_g"], params["ln_b"])


# ---------------------------------------------------------------------------
# Pure-JAX reference and parameters
# ---------------------------------------------------------------------------
def reference(node_embed, edge_embed, p):
    """Pure-JAX reference mirroring the PyTorch forward.

    Matmul inputs are rounded to bf16 (with f32 accumulation) to match the
    kernel's MXU precision; all other math stays f32.
    """
    def mm(x, w):
        return jnp.dot(x.astype(jnp.bfloat16), w.astype(jnp.bfloat16),
                       preferred_element_type=jnp.float32)

    n = mm(node_embed, p["w0"]) + p["b0"]
    B, N, Cb = n.shape
    bias = jnp.concatenate(
        [jnp.broadcast_to(n[:, :, None, :], (B, N, N, Cb)),
         jnp.broadcast_to(n[:, None, :, :], (B, N, N, Cb))], axis=-1)
    x = jnp.concatenate([edge_embed.astype(jnp.float32), bias], axis=-1)
    h = jax.nn.relu(mm(x, p["w1"]) + p["b1"])
    h = jax.nn.relu(mm(h, p["w2"]) + p["b2"])
    # (trunk(x) + x) @ wf == trunk(x) @ wf + x @ wf (matches the kernel's
    # decomposition; identical in exact arithmetic).
    y = mm(h, p["wf"]) + mm(x, p["wf"]) + p["bf"]
    mean = y.mean(-1, keepdims=True)
    var = ((y - mean) ** 2).mean(-1, keepdims=True)
    return (y - mean) * jax.lax.rsqrt(var + 1e-5) * p["ln_g"] + p["ln_b"]


def make_params(key, node_embed_size, edge_embed_in, edge_embed_out, node_dilation=2):
    """Deterministic synthetic parameters with the module's shapes.

    Weights are stored already transposed to (in, out) so the kernel computes
    x @ W + b.  NOTE: the torch module zero-inits final_layer ('final' init);
    small random weights are used here so the output is non-trivial to check.
    """
    Cb = node_embed_size // node_dilation
    H = 2 * Cb + edge_embed_in
    ks = jax.random.split(key, 4)

    def trunc(k, shape, fan_in):
        std = jnp.sqrt(2.0 / fan_in)
        return std * jax.random.truncated_normal(k, -2.0, 2.0, shape, jnp.float32)

    return {
        "w0": trunc(ks[0], (node_embed_size, Cb), node_embed_size),
        "b0": jnp.zeros((1, Cb), jnp.float32),
        "w1": trunc(ks[1], (H, H), H),
        "b1": jnp.zeros((1, H), jnp.float32),
        "w2": trunc(ks[2], (H, H), H),
        "b2": jnp.zeros((1, H), jnp.float32),
        "wf": trunc(ks[3], (H, edge_embed_out), H),
        "bf": jnp.zeros((1, edge_embed_out), jnp.float32),
        "ln_g": jnp.ones((1, edge_embed_out), jnp.float32),
        "ln_b": jnp.zeros((1, edge_embed_out), jnp.float32),
    }


if __name__ == "__main__":
    # Small but MXU/lane-aligned sizes: Cb=64 -> H=256, Eout=128.  N=32 gives
    # an 8-step fully parallel grid with MXU-full (256-row) edge tiles.
    B, N = 2, 32
    node_embed_size, edge_embed_in, edge_embed_out = 128, 128, 128

    key = jax.random.PRNGKey(0)
    k_node, k_edge, k_params = jax.random.split(key, 3)
    node_embed = jax.random.normal(k_node, (B, N, node_embed_size), jnp.float32)
    edge_embed = jax.random.normal(k_edge, (B, N, N, edge_embed_in), jnp.float32)
    params = make_params(k_params, node_embed_size, edge_embed_in, edge_embed_out)

    # The kernel consumes the edge tensor only as bf16 MXU input, so handing
    # it over in bf16 halves the dominant HBM read (perf-review v6e item).
    out = edge_transition(node_embed, edge_embed.astype(jnp.bfloat16), params)
    out = jax.block_until_ready(out)

    ref = reference(node_embed, edge_embed, params)
    assert out.shape == (B, N, N, edge_embed_out)
    # Tolerance covers the bf16 VPU epilogue used on v6e/v7x (f32 on v5e).
    np.testing.assert_allclose(np.asarray(out), np.asarray(ref), atol=4e-2, rtol=4e-2)

    print("KERNEL_OK")
</pallas_src>

<mosaic_0001>
module attributes {stable_mosaic.version = 11 : i64} {
  func.func @_edge_transition_kernel(%arg0: i32, %arg1: i32, %arg2: i32, %arg3: memref<1x8x384xf32, #tpu.memory_space<vmem>>, %arg4: memref<1x32x384xf32, #tpu.memory_space<vmem>>, %arg5: memref<1x8x32x128xbf16, #tpu.memory_space<vmem>>, %arg6: memref<128x384xbf16, #tpu.memory_space<vmem>>, %arg7: memref<256x256xbf16, #tpu.memory_space<vmem>>, %arg8: memref<1x256xf32, #tpu.memory_space<vmem>>, %arg9: memref<256x128xbf16, #tpu.memory_space<vmem>>, %arg10: memref<1x128xf32, #tpu.memory_space<vmem>>, %arg11: memref<1x128xf32, #tpu.memory_space<vmem>>, %arg12: memref<1x8x32x128xf32, #tpu.memory_space<vmem>>) attributes {dimension_semantics = [#tpu.dimension_semantics<parallel>, #tpu.dimension_semantics<parallel>, #tpu.dimension_semantics<parallel>], iteration_bounds = array<i64: 2, 4, 1>, scalar_prefetch = 0 : i64, scratch_operands = 0 : i64, tpu.core_type = #tpu.core_type<tc>, window_params = [{transform_indices = @transform_0, window_bounds = array<i64: 1, 8, 384>}, {transform_indices = @transform_1, window_bounds = array<i64: 1, 32, 384>}, {transform_indices = @transform_2, window_bounds = array<i64: 1, 8, 32, 128>}, {pipeline_mode = #tpu.pipeline_mode<synchronous>, transform_indices = @transform_3, window_bounds = array<i64: 128, 384>}, {pipeline_mode = #tpu.pipeline_mode<synchronous>, transform_indices = @transform_4, window_bounds = array<i64: 256, 256>}, {pipeline_mode = #tpu.pipeline_mode<synchronous>, transform_indices = @transform_5, window_bounds = array<i64: 1, 256>}, {pipeline_mode = #tpu.pipeline_mode<synchronous>, transform_indices = @transform_6, window_bounds = array<i64: 256, 128>}, {pipeline_mode = #tpu.pipeline_mode<synchronous>, transform_indices = @transform_7, window_bounds = array<i64: 1, 128>}, {pipeline_mode = #tpu.pipeline_mode<synchronous>, transform_indices = @transform_8, window_bounds = array<i64: 1, 128>}, {transform_indices = @transform_9, window_bounds = array<i64: 1, 8, 32, 128>}]} {
    %c0 = arith.constant 0 : index
    %c0_0 = arith.constant 0 : index
    %c0_1 = arith.constant 0 : index
    %0 = vector.load %arg3[%c0, %c0_0, %c0_1] : memref<1x8x384xf32, #tpu.memory_space<vmem>>, vector<1x8x384xf32>
    %1 = vector.shape_cast %0 : vector<1x8x384xf32> to vector<8x384xf32>
    %c0_2 = arith.constant 0 : index
    %c0_3 = arith.constant 0 : index
    %c0_4 = arith.constant 0 : index
    %2 = vector.load %arg4[%c0_2, %c0_3, %c0_4] : memref<1x32x384xf32, #tpu.memory_space<vmem>>, vector<1x32x384xf32>
    %3 = vector.shape_cast %2 : vector<1x32x384xf32> to vector<32x384xf32>
    %4 = vector.extract_strided_slice %1 {offsets = [0, 0], sizes = [8, 256], strides = [1, 1]} : vector<8x384xf32> to vector<8x256xf32>
    %5 = vector.extract_strided_slice %3 {offsets = [0, 0], sizes = [32, 256], strides = [1, 1]} : vector<32x384xf32> to vector<32x256xf32>
    %6 = vector.extract_strided_slice %1 {offsets = [0, 256], sizes = [8, 128], strides = [1, 1]} : vector<8x384xf32> to vector<8x128xf32>
    %7 = vector.extract_strided_slice %3 {offsets = [0, 256], sizes = [32, 128], strides = [1, 1]} : vector<32x384xf32> to vector<32x128xf32>
    %c0_5 = arith.constant 0 : index
    %c0_6 = arith.constant 0 : index
    %c0_7 = arith.constant 0 : index
    %c0_8 = arith.constant 0 : index
    %8 = vector.load %arg5[%c0_5, %c0_6, %c0_7, %c0_8] : memref<1x8x32x128xbf16, #tpu.memory_space<vmem>>, vector<1x8x32x128xbf16>
    %9 = vector.shape_cast %8 : vector<1x8x32x128xbf16> to vector<8x32x128xbf16>
    %10 = vector.shape_cast %9 : vector<8x32x128xbf16> to vector<256x128xbf16>
    %c0_9 = arith.constant 0 : index
    %c0_10 = arith.constant 0 : index
    %11 = vector.load %arg6[%c0_9, %c0_10] : memref<128x384xbf16, #tpu.memory_space<vmem>>, vector<128x384xbf16>
    %cst = arith.constant dense<0.000000e+00> : vector<256x384xf32>
    %12 = tpu.matmul %10, %11, %cst {dimension_numbers = #tpu.dot_dimension_numbers<[1], [0], [0], [1], [0, 0, 1, 1], [], []>} : vector<256x128xbf16>, vector<128x384xbf16>, vector<256x384xf32> -> vector<256x384xf32>
    %13 = vector.extract_strided_slice %12 {offsets = [0, 0], sizes = [256, 256], strides = [1, 1]} : vector<256x384xf32> to vector<256x256xf32>
    %14 = vector.extract_strided_slice %12 {offsets = [0, 256], sizes = [256, 128], strides = [1, 1]} : vector<256x384xf32> to vector<256x128xf32>
    %15 = vector.shape_cast %13 : vector<256x256xf32> to vector<8x32x256xf32>
    %16 = vector.shape_cast %4 : vector<8x256xf32> to vector<8x1x256xf32>
    %17 = vector.broadcast %16 : vector<8x1x256xf32> to vector<8x32x256xf32>
    %18 = arith.addf %15, %17 : vector<8x32x256xf32>
    %19 = vector.shape_cast %5 : vector<32x256xf32> to vector<1x32x256xf32>
    %20 = vector.broadcast %19 : vector<1x32x256xf32> to vector<8x32x256xf32>
    %21 = arith.addf %18, %20 : vector<8x32x256xf32>
    %cst_11 = arith.constant 0.000000e+00 : f32
    %22 = vector.broadcast %cst_11 : f32 to vector<8x32x256xf32>
    %23 = arith.maximumf %21, %22 : vector<8x32x256xf32>
    %24 = vector.shape_cast %23 : vector<8x32x256xf32> to vector<256x256xf32>
    %c0_12 = arith.constant 0 : index
    %c0_13 = arith.constant 0 : index
    %25 = vector.load %arg8[%c0_12, %c0_13] : memref<1x256xf32, #tpu.memory_space<vmem>>, vector<1x256xf32>
    %26 = arith.truncf %24 : vector<256x256xf32> to vector<256x256xbf16>
    %c0_14 = arith.constant 0 : index
    %c0_15 = arith.constant 0 : index
    %27 = vector.load %arg7[%c0_14, %c0_15] : memref<256x256xbf16, #tpu.memory_space<vmem>>, vector<256x256xbf16>
    %cst_16 = arith.constant dense<0.000000e+00> : vector<256x256xf32>
    %28 = tpu.matmul %26, %27, %cst_16 {dimension_numbers = #tpu.dot_dimension_numbers<[1], [0], [0], [1], [0, 0, 1, 1], [], []>} : vector<256x256xbf16>, vector<256x256xbf16>, vector<256x256xf32> -> vector<256x256xf32>
    %29 = vector.broadcast %25 : vector<1x256xf32> to vector<256x256xf32>
    %30 = arith.addf %28, %29 : vector<256x256xf32>
    %cst_17 = arith.constant 0.000000e+00 : f32
    %31 = vector.broadcast %cst_17 : f32 to vector<256x256xf32>
    %32 = arith.maximumf %30, %31 : vector<256x256xf32>
    %33 = arith.truncf %32 : vector<256x256xf32> to vector<256x256xbf16>
    %c0_18 = arith.constant 0 : index
    %c0_19 = arith.constant 0 : index
    %34 = vector.load %arg9[%c0_18, %c0_19] : memref<256x128xbf16, #tpu.memory_space<vmem>>, vector<256x128xbf16>
    %cst_20 = arith.constant dense<0.000000e+00> : vector<256x128xf32>
    %35 = tpu.matmul %33, %34, %cst_20 {dimension_numbers = #tpu.dot_dimension_numbers<[1], [0], [0], [1], [0, 0, 1, 1], [], []>} : vector<256x256xbf16>, vector<256x128xbf16>, vector<256x128xf32> -> vector<256x128xf32>
    %36 = arith.addf %35, %14 : vector<256x128xf32>
    %37 = vector.shape_cast %36 : vector<256x128xf32> to vector<8x32x128xf32>
    %38 = vector.shape_cast %6 : vector<8x128xf32> to vector<8x1x128xf32>
    %39 = vector.broadcast %38 : vector<8x1x128xf32> to vector<8x32x128xf32>
    %40 = arith.addf %37, %39 : vector<8x32x128xf32>
    %41 = vector.shape_cast %7 : vector<32x128xf32> to vector<1x32x128xf32>
    %42 = vector.broadcast %41 : vector<1x32x128xf32> to vector<8x32x128xf32>
    %43 = arith.addf %40, %42 : vector<8x32x128xf32>
    %cst_21 = arith.constant dense<0.000000e+00> : vector<8x32xf32>
    %44 = vector.multi_reduction <add>, %43, %cst_21 [2] : vector<8x32x128xf32> to vector<8x32xf32>
    %45 = vector.shape_cast %44 : vector<8x32xf32> to vector<8x32x1xf32>
    %cst_22 = arith.constant 1.280000e+02 : f32
    %46 = vector.broadcast %cst_22 : f32 to vector<8x32x1xf32>
    %47 = arith.divf %45, %46 : vector<8x32x1xf32>
    %48 = arith.mulf %43, %43 : vector<8x32x128xf32>
    %cst_23 = arith.constant dense<0.000000e+00> : vector<8x32xf32>
    %49 = vector.multi_reduction <add>, %48, %cst_23 [2] : vector<8x32x128xf32> to vector<8x32xf32>
    %50 = vector.shape_cast %49 : vector<8x32xf32> to vector<8x32x1xf32>
    %cst_24 = arith.constant 1.280000e+02 : f32
    %51 = vector.broadcast %cst_24 : f32 to vector<8x32x1xf32>
    %52 = arith.divf %50, %51 : vector<8x32x1xf32>
    %53 = arith.mulf %47, %47 : vector<8x32x1xf32>
    %54 = arith.subf %52, %53 : vector<8x32x1xf32>
    %cst_25 = arith.constant 0.000000e+00 : f32
    %55 = vector.broadcast %cst_25 : f32 to vector<8x32x1xf32>
    %56 = arith.maximumf %54, %55 : vector<8x32x1xf32>
    %57 = vector.broadcast %47 : vector<8x32x1xf32> to vector<8x32x128xf32>
    %58 = arith.subf %43, %57 : vector<8x32x128xf32>
    %cst_26 = arith.constant 9.99999974E-6 : f32
    %59 = vector.broadcast %cst_26 : f32 to vector<8x32x1xf32>
    %60 = arith.addf %56, %59 : vector<8x32x1xf32>
    %61 = math.rsqrt %60 : vector<8x32x1xf32>
    %62 = vector.broadcast %61 : vector<8x32x1xf32> to vector<8x32x128xf32>
    %63 = arith.mulf %58, %62 : vector<8x32x128xf32>
    %c0_27 = arith.constant 0 : index
    %c0_28 = arith.constant 0 : index
    %64 = vector.load %arg10[%c0_27, %c0_28] : memref<1x128xf32, #tpu.memory_space<vmem>>, vector<1x128xf32>
    %65 = vector.shape_cast %64 : vector<1x128xf32> to vector<1x1x128xf32>
    %66 = vector.broadcast %65 : vector<1x1x128xf32> to vector<8x32x128xf32>
    %67 = arith.mulf %63, %66 : vector<8x32x128xf32>
    %c0_29 = arith.constant 0 : index
    %c0_30 = arith.constant 0 : index
    %68 = vector.load %arg11[%c0_29, %c0_30] : memref<1x128xf32, #tpu.memory_space<vmem>>, vector<1x128xf32>
    %69 = vector.shape_cast %68 : vector<1x128xf32> to vector<1x1x128xf32>
    %70 = vector.broadcast %69 : vector<1x1x128xf32> to vector<8x32x128xf32>
    %71 = arith.addf %67, %70 : vector<8x32x128xf32>
    %72 = vector.shape_cast %71 : vector<8x32x128xf32> to vector<1x8x32x128xf32>
    %c0_31 = arith.constant 0 : index
    %c0_32 = arith.constant 0 : index
    %c0_33 = arith.constant 0 : index
    %c0_34 = arith.constant 0 : index
    %73 = vector.load %arg12[%c0_31, %c0_32, %c0_33, %c0_34] : memref<1x8x32x128xf32, #tpu.memory_space<vmem>>, vector<1x8x32x128xf32>
    tpu.vector_store %arg12[%c0_31, %c0_32, %c0_33, %c0_34], %72 {strides = array<i32>} : memref<1x8x32x128xf32, #tpu.memory_space<vmem>>, vector<1x8x32x128xf32>,
    return
  }
  func.func @transform_0(%arg0: i32, %arg1: i32, %arg2: i32) -> (i32, i32, i32) {
    %c0_i32 = arith.constant 0 : i32
    %c0_i32_0 = arith.constant 0 : i32
    return %arg0, %arg1, %c0_i32 : i32, i32, i32
  }
  func.func @transform_1(%arg0: i32, %arg1: i32, %arg2: i32) -> (i32, i32, i32) {
    %c0_i32 = arith.constant 0 : i32
    %c0_i32_0 = arith.constant 0 : i32
    return %arg0, %arg2, %c0_i32 : i32, i32, i32
  }
  func.func @transform_2(%arg0: i32, %arg1: i32, %arg2: i32) -> (i32, i32, i32, i32) {
    %c0_i32 = arith.constant 0 : i32
    %c0_i32_0 = arith.constant 0 : i32
    return %arg0, %arg1, %arg2, %c0_i32 : i32, i32, i32, i32
  }
  func.func @transform_3(%arg0: i32, %arg1: i32, %arg2: i32) -> (i32, i32) {
    %c0_i32 = arith.constant 0 : i32
    %c0_i32_0 = arith.constant 0 : i32
    %c0_i32_1 = arith.constant 0 : i32
    return %c0_i32, %c0_i32_0 : i32, i32
  }
  func.func @transform_4(%arg0: i32, %arg1: i32, %arg2: i32) -> (i32, i32) {
    %c0_i32 = arith.constant 0 : i32
    %c0_i32_0 = arith.constant 0 : i32
    %c0_i32_1 = arith.constant 0 : i32
    return %c0_i32, %c0_i32_0 : i32, i32
  }
  func.func @transform_5(%arg0: i32, %arg1: i32, %arg2: i32) -> (i32, i32) {
    %c0_i32 = arith.constant 0 : i32
    %c0_i32_0 = arith.constant 0 : i32
    %c0_i32_1 = arith.constant 0 : i32
    return %c0_i32, %c0_i32_0 : i32, i32
  }
  func.func @transform_6(%arg0: i32, %arg1: i32, %arg2: i32) -> (i32, i32) {
    %c0_i32 = arith.constant 0 : i32
    %c0_i32_0 = arith.constant 0 : i32
    %c0_i32_1 = arith.constant 0 : i32
    return %c0_i32, %c0_i32_0 : i32, i32
  }
  func.func @transform_7(%arg0: i32, %arg1: i32, %arg2: i32) -> (i32, i32) {
    %c0_i32 = arith.constant 0 : i32
    %c0_i32_0 = arith.constant 0 : i32
    %c0_i32_1 = arith.constant 0 : i32
    return %c0_i32, %c0_i32_0 : i32, i32
  }
  func.func @transform_8(%arg0: i32, %arg1: i32, %arg2: i32) -> (i32, i32) {
    %c0_i32 = arith.constant 0 : i32
    %c0_i32_0 = arith.constant 0 : i32
    %c0_i32_1 = arith.constant 0 : i32
    return %c0_i32, %c0_i32_0 : i32, i32
  }
  func.func @transform_9(%arg0: i32, %arg1: i32, %arg2: i32) -> (i32, i32, i32, i32) {
    %c0_i32 = arith.constant 0 : i32
    %c0_i32_0 = arith.constant 0 : i32
    return %arg0, %arg1, %arg2, %c0_i32 : i32, i32, i32, i32
  }
}

</mosaic_0001>

<bundles_post_ra>
// kernel: edge_transition.1
= control target key start
LH: loop header
LB: loop body
LE: loop exit
PB: predicated region body
PF: predicated region fallthrough
CT: control target
= control target key end

     0   :  { %14 = vsyncpa [#allocation3], 0  ;;  %s6260_s0 = inlined_call_operand.vmem [shape: f32[2,32,384], index: 0, kind: input, shape index: {}]   ;;  %s6261_s1 = inlined_call_operand.vmem [shape: f32[2,32,384], index: 1, kind: input, shape index: {}]   ;;  %s6262_s2 = inlined_call_operand.vmem [shape: bf16[2,32,32,128], index: 2, kind: input, shape index: {}]   ;;  %s6263_s3 = inlined_call_operand.vmem [shape: bf16[128,384], index: 3, kind: input, shape index: {}]   ;;  %s6264_s4 = inlined_call_operand.vmem [shape: bf16[256,256], index: 4, kind: input, shape index: {}]   ;;  %s6265_s5 = inlined_call_operand.vmem [shape: f32[1,256], index: 5, kind: input, shape index: {}]   ;;  %s6266_s6 = inlined_call_operand.vmem [shape: bf16[256,128], index: 6, kind: input, shape index: {}]   ;;  %s6267_s7 = inlined_call_operand.vmem [shape: f32[1,128], index: 7, kind: input, shape index: {}]   ;;  %s6268_s8 = inlined_call_operand.vmem [shape: f32[1,128], index: 8, kind: input, shape index: {}]   ;;  %s6269_s9 = inlined_call_operand.hbm [shape: f32[2,32,32,128], index: 9, kind: output, shape index: {}]  }
   0x1   :  { %16 = vsyncpa [#allocation3 + $0x1], 0  ;;  %s4148_s30 = smov 0   ;;  %s4150_s10 = smov 0  }
   0x2   :  { %s4152_s11 = smov 0   ;;  %s4154_s12 = smov 0  }
   0x3   :  { %s4156_s13 = smov 0   ;;  %s4158_s14 = smov 0  }
   0x4   :  { %s4160_s15 = smov 0   ;;  %s4162_s16 = smov 0  }
   0x5 LB: > { %6279 = sst [smem:[#allocation5_spill]] %s4085_s14  ;;  %s3363_s17 = sadd.s32 4294967295, %s4093_s16   ;;  %s4093_s16 = sphi %s4162_s16, %s22_s16   ;;  %s4089_s15 = sphi %s4160_s15, %s6351_s15   ;;  %s4085_s14 = sphi %s4158_s14, %s6346_s14   ;;  %s4081_s13 = sphi %s4156_s13, %s6345_s13   ;;  %s4077_s12 = sphi %s4154_s12, %s6344_s12   ;;  %s4073_s11 = sphi %s4152_s11, %s6350_s11   ;;  %s4069_s10 = sphi %s4150_s10, %s6349_s10   ;;  %s4065_s30 = sphi %s4148_s30, %s6348_s30  }
   0x6   : > { %6280 = sst [smem:[#allocation6_spill]] %s4089_s15  ;;  %s3364_s18 = sadd.s32 4294967294, %s4093_s16  }
   0x7   : > { %s37_s19 = sadd.s32 1, %s4085_s14  ;;  %s41_s20 = sadd.s32 1, %s4089_s15 }
   0x8   : > { %p39_p0 = scmp.ge.s32.totalorder %s37_s19, 4  ;;  %p274_p1 = scmp.ne.s32.totalorder %s4073_s11, %s4069_s10 }
   0x9   : > { %p275_p2 = scmp.eq.s32.totalorder %s3363_s17, 7  ;;  %p280_p5 = scmp.ne.s32.totalorder %s4069_s10, %s4065_s30 }
   0xa   : > { %s6353_s19 = smov (%p39_p0, %s37_s19), 0  ;;  %s6355_s20 = smov (!%p39_p0, %s41_s20), %s4089_s15 }
   0xb   : > { %6281 = sst [smem:[#allocation7_spill]] %s6353_s19  ;;  %s258_s21 = ssub.s32 %s4085_s14, %s6353_s19 }
   0xc   : > { %p4199_p3 = por %p275_p2, %p274_p1  ;;  %p43_p4 = scmp.ge.s32.totalorder %s6355_s20, 2 }
   0xd   : > { %p281_p6 = scmp.eq.s32.totalorder %s3364_s18, 7  ;;  %p3367_p7 = scmp.ge.s32.totalorder %s4093_s16, 1 }
   0xe   : > { %s6357_s20 = smov (%p43_p4, %s6355_s20), 0  ;;  %p362_p9 = scmp.lt.s32.totalorder %s4093_s16, 9 }
   0xf   : > { %6283 = sst [smem:[#allocation8_spill]] %s6357_s20  ;;  %p4208_p8 = por %p281_p6, %p280_p5 }
  0x10   : > { %s257_s24 = ssub.s32 %s4089_s15, %s6357_s20  ;;  %s264_s25 = sadd.s32 1, %s4073_s11 }
  0x11   : > { %s259_s26 = sor.u32 %s258_s21, %s257_s24  ;;  %p363_p10 = pnand %p3367_p7, %p362_p9 }
  0x12   : > { %p262_p11 = scmp.eq.s32.totalorder %s259_s26, 0 }
  0x13   : > { %366 = sbr.rel (%p363_p10) target bundleno = 1065 (0x429), region = 56 }
  0x14   : > { %s4217_s27 = scalar_select %p262_p11, %s4073_s11, %s264_s25  }
  0x16   : > { %6285 = sst [smem:[#allocation9_spill]] %s4217_s27 }
  0x18   : > { %v3525_v0 = vld [vmem:[%s6263_s3 + $0xa8] sm:$0xf]  ;;  %v3772_v1 = vld [vmem:[%s6263_s3 + $0xb0] sm:$0xf0]  ;;  %v3513_v2 = vld [vmem:[%s6263_s3 + $0x90] sm:$0xf] }
  0x19   : > { %v3526_v3 = vor.u32 %v3772_v1, %v3525_v0  ;;  %v3769_v4 = vld [vmem:[%s6263_s3 + $0x98] sm:$0xf0]  ;;  %v3501_v6 = vld [vmem:[%s6263_s3 + $0x78] sm:$0xf]  ;;  %v3766_v7 = vld [vmem:[%s6263_s3 + $0x80] sm:$0xf0] }
  0x1a   : > { %v3514_v5 = vor.u32 %v3769_v4, %v3513_v2  ;;  %v3502_v8 = vor.u32 %v3766_v7, %v3501_v6  ;;  %s3371_s14 = sshll.u32 %s4077_s12, 3  ;;  %v3489_v9 = vld [vmem:[%s6263_s3 + $0x60] sm:$0xf]  ;;  %v3763_v10 = vld [vmem:[%s6263_s3 + $0x68] sm:$0xf0]  ;;  %p426_p12 = scmp.lt.s32.totalorder %s4081_s13, 1 }
  0x1b   : > { %767 = vmatpush.bf16.msra.mxu0 %v3526_v3  ;;  %3823 = vmatpush.bf16.msra.mxu1 %v3526_v3  ;;  %p450_p13 = scmp.lt.s32.totalorder %s3371_s14, 31  ;;  %v3490_v11 = vor.u32 %v3763_v10, %v3489_v9  ;;  %v3477_v12 = vld [vmem:[%s6263_s3 + $0x48] sm:$0xf]  ;;  %v3760_v13 = vld [vmem:[%s6263_s3 + $0x50] sm:$0xf0]  ;;  %p428_p0 = scmp.lt.s32.totalorder %s4077_s12, 3 }
  0x1c   : > { %3824 = vmatpush.bf16.msra.mxu2 %v3526_v3  ;;  %3825 = vmatpush.bf16.msra.mxu3 %v3526_v3  ;;  %s4252_s29 = scalar_select %p426_p12, %s4081_s13, 1  ;;  %v3478_v14 = vor.u32 %v3760_v13, %v3477_v12  ;;  %v3465_v15 = vld [vmem:[%s6263_s3 + $0x30] sm:$0xf]  ;;  %v3757_v16 = vld [vmem:[%s6263_s3 + $0x38] sm:$0xf0]  ;;  %vm1042_vm0 = vcmask 1042434  }
  0x1d   : > { %s6359_s14 = smov (!%p450_p13, %s3371_s14), 31  ;;  %v3466_v17 = vor.u32 %v3757_v16, %v3465_v15  ;;  %v3453_v18 = vld [vmem:[%s6263_s3 + $0x18] sm:$0xf]  ;;  %v3754_v19 = vld [vmem:[%s6263_s3 + $0x20] sm:$0xf0]  ;;  %vm1037_vm1 = vcmask 1040384  }
  0x1e   : > { %s3372_s24 = sshll.u32 %s6359_s14, 2  ;;  %s3373_s25 = sshll.u32 %s4252_s29, 7  ;;  %v3454_v20 = vor.u32 %v3754_v19, %v3453_v18  ;;  %v3441_v21 = vld [vmem:[%s6263_s3] sm:$0xf]  ;;  %v3751_v22 = vld [vmem:[%s6263_s3 + $0x8] sm:$0xf0] }
  0x1f   : > { %768 = vmatpush.bf16.msra.mxu0 %v3514_v5  ;;  %3826 = vmatpush.bf16.msra.mxu1 %v3514_v5  ;;  %s457_s19 = sadd.s32 %s3373_s25, %s3372_s24  ;;  %v3771_v23 = vld [vmem:[%s6263_s3 + $0xac] sm:$0xf]  ;;  %v3527_v24 = vld [vmem:[%s6263_s3 + $0xb4] sm:$0xf0]  ;;  %v3533_v25 = vld [vmem:[%s6263_s3 + $0xb0] sm:$0xf]  ;;  %v3442_v27 = vor.u32 %v3751_v22, %v3441_v21 }
  0x20   : > { %3827 = vmatpush.bf16.msra.mxu2 %v3514_v5  ;;  %3828 = vmatpush.bf16.msra.mxu3 %v3514_v5  ;;  %s3374_s26 = sshll.u32 %s457_s19, 2  ;;  %v3773_v26 = vld [vmem:[%s6263_s3 + $0xb8] sm:$0xf0]  ;;  %v3530_v28 = vor.u32 %v3771_v23, %v3527_v24  ;;  %v3521_v30 = vld [vmem:[%s6263_s3 + $0x98] sm:$0xf]  ;;  %s3848_s25 = smul.u32 12, %s4252_s29 }
  0x21   : > { %s4288_s27 = scalar_lea.vmem %s6262_s2, %s3374_s26  ;;  %v3534_v29 = vor.u32 %v3773_v26, %v3533_v25  ;;  %v3768_v31 = vld [vmem:[%s6263_s3 + $0x94] sm:$0xf]  ;;  %v3515_v32 = vld [vmem:[%s6263_s3 + $0x9c] sm:$0xf0]  ;;  %v3770_v35 = vld [vmem:[%s6263_s3 + $0xa0] sm:$0xf0] }
  0x22   : > { %v4300_v33 = vld [vmem:[%s4288_s27] sm:$0xff]  ;;  %v3518_v37 = vor.u32 %v3768_v31, %v3515_v32  ;;  %v3522_v38 = vor.u32 %v3770_v35, %v3521_v30  ;;  %v3765_v39 = vld [vmem:[%s6263_s3 + $0x7c] sm:$0xf]  ;;  %v3503_v40 = vld [vmem:[%s6263_s3 + $0x84] sm:$0xf0]  ;;  %s429_s21 = scalar_select %p428_p0, %s4077_s12, 3 }
  0x23   : > { %769 = vmatpush.bf16.msra.mxu0 %v3502_v8  ;;  %3829 = vmatpush.bf16.msra.mxu1 %v3502_v8  ;;  %v4303_v34 = vld [vmem:[%s4288_s27 + $0x20] sm:$0xff]  ;;  %v3767_v42 = vld [vmem:[%s6263_s3 + $0x88] sm:$0xf0]  ;;  %v3506_v43 = vor.u32 %v3765_v39, %v3503_v40  ;;  %v3491_v46 = vld [vmem:[%s6263_s3 + $0x6c] sm:$0xf0]  ;;  %s3849_s14 = smul.u32 96, %s4252_s29 }
  0x24   : > { %3830 = vmatpush.bf16.msra.mxu2 %v3502_v8  ;;  %3831 = vmatpush.bf16.msra.mxu3 %v3502_v8  ;;  %v4309_v36 = vld [vmem:[%s4288_s27 + $0x40] sm:$0xff]  ;;  %v3497_v47 = vld [vmem:[%s6263_s3 + $0x68] sm:$0xf]  ;;  %v3764_v48 = vld [vmem:[%s6263_s3 + $0x70] sm:$0xf0]  ;;  %s3847_s26 = smul.u32 3, %s429_s21 }
  0x25   : > { %v3509_v41 = vld [vmem:[%s6263_s3 + $0x80] sm:$0xf]  ;;  %v3762_v45 = vld [vmem:[%s6263_s3 + $0x64] sm:$0xf]  ;;  %v3498_v50 = vor.u32 %v3764_v48, %v3497_v47  ;;  %v3759_v51 = vld [vmem:[%s6263_s3 + $0x4c] sm:$0xf]  ;;  %s4575_s18 = scalar_lea.vmem %s6261_s1, %s3849_s14 }
  0x26   : > { %v3510_v44 = vor.u32 %v3767_v42, %v3509_v41  ;;  %v3494_v49 = vor.u32 %v3762_v45, %v3491_v46  ;;  %v3479_v52 = vld [vmem:[%s6263_s3 + $0x54] sm:$0xf0]  ;;  %v3485_v53 = vld [vmem:[%s6263_s3 + $0x50] sm:$0xf]  ;;  %v3761_v54 = vld [vmem:[%s6263_s3 + $0x58] sm:$0xf0]  ;;  %s432_s21 = sadd.s32 %s3848_s25, %s3847_s26 }
  0x27   : > { %770 = vmatpush.bf16.msra.mxu0 %v3490_v11  ;;  %3832 = vmatpush.bf16.msra.mxu1 %v3490_v11  ;;  %v3482_v55 = vor.u32 %v3759_v51, %v3479_v52  ;;  %v4351_v56 = vld [vmem:[%s4288_s27 + $0x8] sm:$0xff]  ;;  %v3486_v57 = vor.u32 %v3761_v54, %v3485_v53  ;;  %v3756_v58 = vld [vmem:[%s6263_s3 + $0x34] sm:$0xf]  ;;  %v3467_v59 = vld [vmem:[%s6263_s3 + $0x3c] sm:$0xf0]  ;;  %s3369_s19 = sshll.u32 %s432_s21, 3 }
  0x28   : > { %3833 = vmatpush.bf16.msra.mxu2 %v3490_v11  ;;  %3834 = vmatpush.bf16.msra.mxu3 %v3490_v11  ;;  %v4360_v60 = vld [vmem:[%s4288_s27 + $0x28] sm:$0xff]  ;;  %v3473_v61 = vld [vmem:[%s6263_s3 + $0x38] sm:$0xf]  ;;  %v3758_v62 = vld [vmem:[%s6263_s3 + $0x40] sm:$0xf0]  ;;  %v3470_v0 = vor.u32 %v3756_v58, %v3467_v59  ;;  %vm1048_vm2 = vcmask 1044484  }
  0x29   : > { %v4369_v63 = vld [vmem:[%s4288_s27 + $0x48] sm:$0xff]  ;;  %v3474_v1 = vor.u32 %v3758_v62, %v3473_v61  ;;  %v3461_v2 = vld [vmem:[%s6263_s3 + $0x20] sm:$0xf]  ;;  %v3753_v4 = vld [vmem:[%s6263_s3 + $0x1c] sm:$0xf]  ;;  %vm1039_vm3 = vcmask 1041409  }
  0x2a   : > { %v3755_v3 = vld [vmem:[%s6263_s3 + $0x28] sm:$0xf0]  ;;  %v3455_v5 = vld [vmem:[%s6263_s3 + $0x24] sm:$0xf0]  ;;  %v3750_v8 = vld [vmem:[%s6263_s3 + $0x4] sm:$0xf] }
  0x2b   : > { %771 = vmatpush.bf16.msra.mxu0 %v3478_v14  ;;  %3835 = vmatpush.bf16.msra.mxu1 %v3478_v14  ;;  %v3462_v6 = vor.u32 %v3755_v3, %v3461_v2  ;;  %v3458_v7 = vor.u32 %v3753_v4, %v3455_v5  ;;  %v3443_v9 = vld [vmem:[%s6263_s3 + $0xc] sm:$0xf0]  ;;  %v3449_v10 = vld [vmem:[%s6263_s3 + $0x8] sm:$0xf]  ;;  %v3752_v11 = vld [vmem:[%s6263_s3 + $0x10] sm:$0xf0] }
  0x2c   : > { %3836 = vmatpush.bf16.msra.mxu2 %v3478_v14  ;;  %3837 = vmatpush.bf16.msra.mxu3 %v3478_v14  ;;  %v3446_v12 = vor.u32 %v3750_v8, %v3443_v9  ;;  %v3450_v13 = vor.u32 %v3752_v11, %v3449_v10  ;;  %v3736_v14 = vld [vmem:[%s4288_s27 + $0x10] sm:$0xff]  ;;  %v3659_v18 = vld [vmem:[%s6264_s4 + $0xf8] sm:$0xf0]  ;;  %v4420_v22 = vld [vmem:[%s4288_s27 + $0x60] sm:$0xff]  ;;  %vm1045_vm4 = vcmask 1043459   ;;  %vm1051_vm5 = vcmask 1045509  }
  0x2d   : > { %v4400_v15 = vld [vmem:[%s4288_s27 + $0x30] sm:$0xff]  ;;  %v3595_v21 = vld [vmem:[%s6264_s4 + $0x78] sm:$0xf0]  ;;  %v3786_v30 = vld [vmem:[%s6264_s4 + $0x64] sm:$0xf]  ;;  %vm1054_vm6 = vcmask 1046534  }
  0x2e   : > { %v4403_v16 = vld [vmem:[%s4288_s27 + $0x50] sm:$0xff]  ;;  %v4424_v24 = vld [vmem:[%s4288_s27 + $0x18] sm:$0xff]  ;;  %v3587_v32 = vld [vmem:[%s6264_s4 + $0x68] sm:$0xf0]  ;;  %vm1057_vm7 = vcmask 1046528   ;;  %s423_s17 = sand.u32 1, %s4069_s10  }
  0x2f   : > { %772 = vmatpush.bf16.msra.mxu0 %v3466_v17  ;;  %3838 = vmatpush.bf16.msra.mxu1 %v3466_v17  ;;  %v3788_v19 = vld [vmem:[%s6264_s4 + $0x74] sm:$0xf]  ;;  %v4427_v25 = vld [vmem:[%s4288_s27 + $0x38] sm:$0xff]  ;;  %v3585_v40 = vld [vmem:[%s6264_s4 + $0x60] sm:$0xf]  ;;  %s3822_s14 = sshll.u32 %s4077_s12, 5 }
  0x30   : > { %3839 = vmatpush.bf16.msra.mxu2 %v3466_v17  ;;  %3840 = vmatpush.bf16.msra.mxu3 %v3466_v17  ;;  %v3804_v17 = vld [vmem:[%s6264_s4 + $0xf4] sm:$0xf]  ;;  %v3598_v23 = vor.u32 %v3788_v19, %v3595_v21  ;;  %v4430_v26 = vld [vmem:[%s4288_s27 + $0x58] sm:$0xff]  ;;  %v3787_v41 = vld [vmem:[%s6264_s4 + $0x64] sm:$0xf0]  ;;  %s3730_s21 = sshll.u32 %s4081_s13, 7 }
  0x31   : > { %v4454_v35 = vld [vmem:[%s4288_s27 + $0x70] sm:$0xff]  ;;  %v3569_v46 = vld [vmem:[%s6264_s4 + $0x40] sm:$0xf]  ;;  %v3783_v47 = vld [vmem:[%s6264_s4 + $0x44] sm:$0xf0]  ;;  %s3222_s29 = sadd.s32 %s3822_s14, %s3730_s21  ;;  %s4019_s21 = scalar_lea.hbm %s6269_s9, 2048 }
  0x32   : > { %v3577_v42 = vld [vmem:[%s6264_s4 + $0x50] sm:$0xf]  ;;  %v3570_v48 = vor.u32 %v3783_v47, %v3569_v46  ;;  %v3781_v51 = vld [vmem:[%s6264_s4 + $0x34] sm:$0xf0]  ;;  %v3553_v53 = vld [vmem:[%s6264_s4 + $0x20] sm:$0xf] }
  0x33   : > { %773 = vmatpush.bf16.msra.mxu0 %v3454_v20  ;;  %3841 = vmatpush.bf16.msra.mxu1 %v3454_v20  ;;  %v3779_v54 = vld [vmem:[%s6264_s4 + $0x24] sm:$0xf0]  ;;  %v3545_v59 = vld [vmem:[%s6264_s4 + $0x10] sm:$0xf]  ;;  %v3777_v61 = vld [vmem:[%s6264_s4 + $0x14] sm:$0xf0] }
  0x34   : > { %3842 = vmatpush.bf16.msra.mxu2 %v3454_v20  ;;  %3843 = vmatpush.bf16.msra.mxu3 %v3454_v20  ;;  %v3662_v20 = vor.u32 %v3804_v17, %v3659_v18  ;;  %v3546_v62 = vor.u32 %v3777_v61, %v3545_v59  ;;  %v3537_v2 = vld [vmem:[%s6264_s4] sm:$0xf]  ;;  %v3775_v4 = vld [vmem:[%s6264_s4 + $0x4] sm:$0xf0]  ;;  %v3657_v8 = vld [vmem:[%s6264_s4 + $0xf0] sm:$0xf] }
  0x35   : > { %v3538_v5 = vor.u32 %v3775_v4, %v3537_v2  ;;  %v3805_v9 = vld [vmem:[%s6264_s4 + $0xf4] sm:$0xf0]  ;;  %v3649_v17 = vld [vmem:[%s6264_s4 + $0xe0] sm:$0xf]  ;;  %v3803_v18 = vld [vmem:[%s6264_s4 + $0xe4] sm:$0xf0] }
  0x36   : > { %v3658_v11 = vor.u32 %v3805_v9, %v3657_v8  ;;  %v3650_v19 = vor.u32 %v3803_v18, %v3649_v17  ;;  %v3633_v61 = vld [vmem:[%s6264_s4 + $0xc0] sm:$0xf]  ;;  %s3731_s12 = sshll.u32 %s3222_s29, 3 }
  0x37   : > { %774 = vmatpush.bf16.msra.mxu0 %v3442_v27  ;;  %3844 = vmatpush.bf16.msra.mxu1 %v3442_v27  ;;  %s3224_s15 = scalar_lea.hbm %s6269_s9, %s3731_s12 }
  0x38   : > { %3845 = vmatpush.bf16.msra.mxu2 %v3442_v27  ;;  %3846 = vmatpush.bf16.msra.mxu3 %v3442_v27  ;;  %v4436_v27 = vld [vmem:[%s4288_s27 + $0x68] sm:$0xff] }
  0x3a   : > { %775 = vmatmul.bf16.vlgmr.msra.gmra.mxu0 %v4300_v33  ;;  %795 = vmatmul.bf16.vlgmr.msra.gmra.mxu1 %v4303_v34 }
  0x3b   : > { %856 = vmatpush.bf16.msrb.mxu1 %v3530_v28  ;;  %815 = vmatmul.bf16.vlgmr.msra.gmra.mxu2 %v4309_v36  ;;  %v3802_v28 = vld [vmem:[%s6264_s4 + $0xe4] sm:$0xf] }
  0x3c   : > { %945 = vmatpush.bf16.msrb.mxu2 %v3534_v29  ;;  %835 = vmatmul.bf16.vlgmr.msra.gmra.mxu3 %v4420_v22  ;;  %v3651_v29 = vld [vmem:[%s6264_s4 + $0xe8] sm:$0xf0] }
  0x3d   : > { %v3654_v31 = vor.u32 %v3802_v28, %v3651_v29  ;;  %1603 = vmatpush.bf16.msrb.mxu0 %v3658_v11 }
  0x3f   : > { %857 = vmatpush.bf16.msrb.mxu1 %v3518_v37  ;;  %v3590_v37 = vor.u32 %v3786_v30, %v3587_v32  ;;  %v4583_v32 = vld [vmem:[%s4575_s18] sm:$0xff] }
  0x40   : > { %946 = vmatpush.bf16.msrb.mxu2 %v3522_v38  ;;  %v3789_v38 = vld [vmem:[%s6264_s4 + $0x74] sm:$0xf0] }
  0x41   : > { %1604 = vmatpush.bf16.msrb.mxu0 %v3650_v19 }
  0x43   : > { %858 = vmatpush.bf16.msrb.mxu1 %v3506_v43  ;;  %v3586_v43 = vor.u32 %v3787_v41, %v3585_v40 }
  0x44   : > { %947 = vmatpush.bf16.msrb.mxu2 %v3510_v44  ;;  %v3785_v44 = vld [vmem:[%s6264_s4 + $0x54] sm:$0xf0] }
  0x45   : > { %v3578_v45 = vor.u32 %v3785_v44, %v3577_v42 }
  0x47   : > { %859 = vmatpush.bf16.msrb.mxu1 %v3494_v49  ;;  %v4486_v49 = vld [vmem:[%s4288_s27 + $0x78] sm:$0xff]  ;;  %s4529_s27 = scalar_lea.vmem %s6260_s0, %s3369_s19  ;;  %s3368_s19 = sshll.u32 %s423_s17, 8 }
  0x48   : > { %948 = vmatpush.bf16.msrb.mxu2 %v3498_v50  ;;  %v3561_v50 = vld [vmem:[%s6264_s4 + $0x30] sm:$0xf]  ;;  %v4543_v10 = vld [vmem:[%s4529_s27] sm:$0xff]  ;;  %s5672_s25 = scalar_lea.vmem [#allocation2], %s3368_s19  ;;  %s3227_s19 = sshll.u32 %s3224_s15, 4  ;;  %s3228_s19 = int_to_ptr.hbm [resolvable:$true] %s3227_s19 }
  0x49   : > { %v3562_v52 = vor.u32 %v3781_v51, %v3561_v50  ;;  %s3225_s20 = sshll.u32 %s5672_s25, 4  ;;  %s3226_s20 = int_to_ptr.vmem [resolvable:$true] %s3225_s20 }
  0x4a   : > { %780 = vmatmul.bf16.gmra.mxu0 %v4351_v56  ;;  %800 = vmatmul.bf16.gmra.mxu1 %v4360_v60 }
  0x4b   : > { %860 = vmatpush.bf16.msrb.mxu1 %v3482_v55  ;;  %820 = vmatmul.bf16.gmra.mxu2 %v4369_v63  ;;  %v3800_v55 = vld [vmem:[%s6264_s4 + $0xd4] sm:$0xf] }
  0x4c   : > { %949 = vmatpush.bf16.msrb.mxu2 %v3486_v57  ;;  %840 = vmatmul.bf16.gmra.mxu3 %v4436_v27  ;;  %v3554_v57 = vor.u32 %v3779_v54, %v3553_v53 }
  0x4f   : > { %861 = vmatpush.bf16.msrb.mxu1 %v3470_v0  ;;  %v3784_v0 = vld [vmem:[%s6264_s4 + $0x54] sm:$0xf] }
  0x50   : > { %950 = vmatpush.bf16.msrb.mxu2 %v3474_v1  ;;  %v3579_v1 = vld [vmem:[%s6264_s4 + $0x58] sm:$0xf0] }
  0x51   : > { %v3582_v3 = vor.u32 %v3784_v0, %v3579_v1 }
  0x53   : > { %862 = vmatpush.bf16.msrb.mxu1 %v3458_v7 }
  0x54   : > { %951 = vmatpush.bf16.msrb.mxu2 %v3462_v6  ;;  %v465_v6 = vld [vmem:[%s4529_s27 + $0x8] sm:$0xff] }
  0x55   : > { %v4534_v7 = vrot.slane %v465_v6, 7 }
  0x57   : > { %863 = vmatpush.bf16.msrb.mxu1 %v3446_v12  ;;  %v4547_v12 = vsel %vm1042_vm0, %v4543_v10, %v4534_v7  ;;  %v4570_v28 = vsel %vm1048_vm2, %v4543_v10, %v4534_v7 }
  0x58   : > { %952 = vmatpush.bf16.msrb.mxu2 %v3450_v13  ;;  %v4551_v13 = vsel %vm1037_vm1, %v4543_v10, %v4534_v7 }
  0x5a   : > { %785 = vmatmul.bf16.gmra.mxu0 %v3736_v14  ;;  %805 = vmatmul.bf16.gmra.mxu1 %v4400_v15 }
  0x5b   : > { %825 = vmatmul.bf16.gmra.mxu2 %v4403_v16  ;;  %1692 = vmatpush.bf16.msra.mxu1 %v3598_v23 }
  0x5c   : > { %1781 = vmatpush.bf16.msra.mxu2 %v3662_v20  ;;  %845 = vmatmul.bf16.gmra.mxu3 %v4454_v35  ;;  %v4562_v20 = vperm.slane %v4551_v13, 0 }
  0x5f   : > { %1693 = vmatpush.bf16.msra.mxu1 %v3590_v37  ;;  %v3635_v37 = vld [vmem:[%s6264_s4 + $0xc8] sm:$0xf0] }
  0x60   : > { %1782 = vmatpush.bf16.msra.mxu2 %v3654_v31  ;;  %v6275_v31 = vrot.slane %v4570_v28, 4 }
  0x62   : > { %v4601_v44 = vperm.slane %v6275_v31, 0 }
  0x63   : > { %1694 = vmatpush.bf16.msra.mxu1 %v3582_v3 }
  0x6a   : > { %790 = vmatmul.bf16.gmra.mxu0 %v4424_v24  ;;  %810 = vmatmul.bf16.gmra.mxu1 %v4427_v25 }
  0x6b   : > { %830 = vmatmul.bf16.gmra.mxu2 %v4430_v26 }
  0x6c   : > { %850 = vmatmul.bf16.gmra.mxu3 %v4486_v49 }
  0x7a   : > { %864 = vmatmul.bf16.vlgmr.msrb.gmra.mxu1 %v4300_v33 }
  0x7b   : > { %953 = vmatmul.bf16.vlgmr.msrb.gmra.mxu2 %v4300_v33  ;;  %v3593_v33 = vld [vmem:[%s6264_s4 + $0x70] sm:$0xf] }
  0x7c   : > { %v3594_v39 = vor.u32 %v3789_v38, %v3593_v33  ;;  %v3798_v33 = vld [vmem:[%s6264_s4 + $0xc4] sm:$0xf] }
  0x7d   : > { %v3638_v38 = vor.u32 %v3798_v33, %v3635_v37 }
  0x7e   : > { %1514 = vmatpush.bf16.msrb.mxu3 %v3594_v39  ;;  %v3641_v39 = vld [vmem:[%s6264_s4 + $0xd0] sm:$0xf] }
  0x82   : > { %1515 = vmatpush.bf16.msrb.mxu3 %v3586_v43 }
  0x86   : > { %1516 = vmatpush.bf16.msrb.mxu3 %v3578_v45  ;;  %v4604_v45 = vld [vmem:[%s4575_s18 + $0x18] sm:$0xff] }
  0x8a   : > { %869 = vmatmul.bf16.gmra.mxu1 %v4351_v56  ;;  %1517 = vmatpush.bf16.msrb.mxu3 %v3570_v48 }
  0x8b   : > { %958 = vmatmul.bf16.gmra.mxu2 %v4351_v56  ;;  %v3643_v56 = vld [vmem:[%s6264_s4 + $0xd8] sm:$0xf0] }
  0x8c   : > { %v3646_v58 = vor.u32 %v3800_v55, %v3643_v56  ;;  %v3782_v56 = vld [vmem:[%s6264_s4 + $0x44] sm:$0xf] }
  0x8e   : > { %1518 = vmatpush.bf16.msrb.mxu3 %v3562_v52  ;;  %1783 = vmatpush.bf16.msra.mxu2 %v3646_v58 }
  0x92   : > { %1519 = vmatpush.bf16.msrb.mxu3 %v3554_v57  ;;  %1784 = vmatpush.bf16.msra.mxu2 %v3638_v38  ;;  %v3571_v57 = vld [vmem:[%s6264_s4 + $0x48] sm:$0xf0] }
  0x93   : > { %v3574_v59 = vor.u32 %v3782_v56, %v3571_v57 }
  0x95   : > { %1695 = vmatpush.bf16.msra.mxu1 %v3574_v59 }
  0x96   : > { %1520 = vmatpush.bf16.msrb.mxu3 %v3546_v62  ;;  %v3799_v62 = vld [vmem:[%s6264_s4 + $0xc4] sm:$0xf0] }
  0x97   : > { %v3634_v1 = vor.u32 %v3799_v62, %v3633_v61 }
  0x9a   : > { %874 = vmatmul.bf16.gmra.mxu1 %v3736_v14  ;;  %1521 = vmatpush.bf16.msrb.mxu3 %v3538_v5 }
  0x9b   : > { %963 = vmatmul.bf16.gmra.mxu2 %v3736_v14  ;;  %v1044_v14 = vrot.slane %v4547_v12, 2 }
  0xaa   : > { %879 = vmatmul.bf16.gmra.mxu1 %v4424_v24 }
  0xab   : > { %968 = vmatmul.bf16.gmra.mxu2 %v4424_v24  ;;  %v4566_v24 = vperm.slane %v1044_v14, 0 }
  0xb7   : > { %v776_v21 = vpop.f32.mrf.mxu0  ;;  %v796_v23 = vpop.f32.mrf.mxu1 }
  0xb8   : > { %v1092_v29 = vadd.f32 %v4562_v20, %v776_v21  ;;  %v1108_v30 = vadd.f32 %v4566_v24, %v796_v23  ;;  %v3625_v23 = vld [vmem:[%s6264_s4 + $0xb0] sm:$0xf] }
  0xba   : > { %884 = vmatmul.bf16.gmra.mxu1 %v4303_v34  ;;  %v1156_v40 = vadd.f32 %v1092_v29, %v4583_v32  ;;  %v1172_v43 = vadd.f32 %v1108_v30, %v4583_v32  ;;  %v3797_v29 = vld [vmem:[%s6264_s4 + $0xb4] sm:$0xf0]  ;;  %v4642_v30 = vld [vmem:[%s4575_s18 + $0x30] sm:$0xff] }
  0xbb   : > { %973 = vmatmul.bf16.gmra.mxu2 %v4303_v34  ;;  %v3801_v34 = vld [vmem:[%s6264_s4 + $0xd4] sm:$0xf0]  ;;  %v3626_v33 = vor.u32 %v3797_v29, %v3625_v23  ;;  %v3796_v23 = vld [vmem:[%s6264_s4 + $0xb4] sm:$0xf]  ;;  %v3627_v29 = vld [vmem:[%s6264_s4 + $0xb8] sm:$0xf0] }
  0xbc   : > { %v3642_v42 = vor.u32 %v3801_v34, %v3641_v39  ;;  %v1220_v51 = vmax.f32 %v1156_v40, 0.0  ;;  %v1236_v54 = vmax.f32 %v1172_v43, 0.0  ;;  %v4648_v39 = vld [vmem:[%s4575_s18 + $0x48] sm:$0xff] }
  0xbe   : > { %v816_v41 = vpop.f32.mrf.mxu2  ;;  %1605 = vmatpush.bf16.msrb.mxu0 %v3642_v42 }
  0xbf   : > { %v778_v46 = vpop.f32.mrf.mxu0  ;;  %v798_v47 = vpop.f32.mrf.mxu1  ;;  %v1124_v55 = vadd.f32 %v4601_v44, %v816_v41  ;;  %v4652_v41 = vsel %vm1039_vm3, %v4543_v10, %v4534_v7 }
  0xc0   : > { %v1094_v48 = vadd.f32 %v4562_v20, %v778_v46  ;;  %v1110_v50 = vadd.f32 %v4566_v24, %v798_v47  ;;  %v4659_v47 = vsel %vm1045_vm4, %v4543_v10, %v4534_v7 }
  0xc1   : > { %v1188_v5 = vadd.f32 %v1124_v55, %v4583_v32 }
  0xc2   : > { %v1158_v52 = vadd.f32 %v1094_v48, %v4604_v45  ;;  %v1174_v53 = vadd.f32 %v1110_v50, %v4604_v45  ;;  %1606 = vmatpush.bf16.msrb.mxu0 %v3634_v1 }
  0xc3   : > { %v1252_v18 = vmax.f32 %v1188_v5, 0.0 }
  0xc4   : > { %v1222_v58 = vmax.f32 %v1158_v52, 0.0  ;;  %v1238_v0 = vmax.f32 %v1174_v53, 0.0  ;;  %v1041_v52 = vrot.slane %v4652_v41, 1  ;;  %v3611_v41 = vld [vmem:[%s6264_s4 + $0x98] sm:$0xf0] }
  0xc6   : > { %v818_v2 = vpop.f32.mrf.mxu2  ;;  %v4623_v3 = vpack.c.bf16 %v1222_v58, %v1220_v51  ;;  %v4625_v4 = vpack.c.bf16 %v1238_v0, %v1236_v54  ;;  %1607 = vmatpush.bf16.msrb.mxu0 %v3626_v33  ;;  %v6276_v54 = vrot.slane %v4659_v47, 3  ;;  %v4674_v61 = vperm.slane %v1041_v52, 0 }
  0xc7   : > { %v1126_v6 = vadd.f32 %v4601_v44, %v818_v2  ;;  %v781_v8 = vpop.f32.mrf.mxu0  ;;  %v801_v9 = vpop.f32.mrf.mxu1  ;;  %v3630_v33 = vor.u32 %v3796_v23, %v3627_v29 }
  0xc8   : > { %1522 = vmatmul.bf16.vlgmr.msrb.gmra.mxu3 %v4623_v3  ;;  %v1096_v17 = vadd.f32 %v4562_v20, %v781_v8  ;;  %v1112_v21 = vadd.f32 %v4566_v24, %v801_v9  ;;  %v4684_v8 = vperm.slane %v6276_v54, 0  ;;  %v4689_v9 = vsel %vm1051_vm5, %v4543_v10, %v4534_v7 }
  0xc9   : > { %v1190_v11 = vadd.f32 %v1126_v6, %v4604_v45  ;;  %1785 = vmatpush.bf16.msra.mxu2 %v3630_v33 }
  0xca   : > { %889 = vmatmul.bf16.gmra.mxu1 %v4360_v60  ;;  %v1160_v38 = vadd.f32 %v1096_v17, %v4642_v30  ;;  %v1176_v42 = vadd.f32 %v1112_v21, %v4642_v30 }
  0xcb   : > { %v1254_v19 = vmax.f32 %v1190_v11, 0.0  ;;  %978 = vmatmul.bf16.gmra.mxu2 %v4360_v60 }
  0xcc   : > { %v1224_v48 = vmax.f32 %v1160_v38, 0.0  ;;  %v1240_v55 = vmax.f32 %v1176_v42, 0.0  ;;  %v3609_v38 = vld [vmem:[%s6264_s4 + $0x90] sm:$0xf] }
  0xcd   : > { %v4644_v37 = vpack.c.bf16 %v1254_v19, %v1252_v18  ;;  %v6274_v19 = vrot.slane %v4689_v9, 5 }
  0xce   : > { %v821_v60 = vpop.f32.mrf.mxu2 }
  0xcf   : > { %v783_v34 = vpop.f32.mrf.mxu0  ;;  %v803_v40 = vpop.f32.mrf.mxu1  ;;  %v1128_v53 = vadd.f32 %v4601_v44, %v821_v60 }
  0xd0   : > { %v1098_v43 = vadd.f32 %v4562_v20, %v783_v34  ;;  %v1114_v46 = vadd.f32 %v4566_v24, %v803_v40  ;;  %v3617_v20 = vld [vmem:[%s6264_s4 + $0xa0] sm:$0xf]  ;;  %v3795_v24 = vld [vmem:[%s6264_s4 + $0xa4] sm:$0xf0] }
  0xd1   : > { %v3618_v57 = vor.u32 %v3795_v24, %v3617_v20  ;;  %v1192_v1 = vadd.f32 %v1128_v53, %v4642_v30 }
  0xd2   : > { %v1162_v50 = vadd.f32 %v1098_v43, %v4648_v39  ;;  %v1178_v51 = vadd.f32 %v1114_v46, %v4648_v39  ;;  %v3780_v43 = vld [vmem:[%s6264_s4 + $0x34] sm:$0xf]  ;;  %v3563_v46 = vld [vmem:[%s6264_s4 + $0x38] sm:$0xf0] }
  0xd3   : > { %1608 = vmatpush.bf16.msrb.mxu0 %v3618_v57  ;;  %v1256_v18 = vmax.f32 %v1192_v1, 0.0  ;;  %v3566_v53 = vor.u32 %v3780_v43, %v3563_v46  ;;  %v3601_v1 = vld [vmem:[%s6264_s4 + $0x80] sm:$0xf] }
  0xd4   : > { %v1226_v56 = vmax.f32 %v1162_v50, 0.0  ;;  %v1242_v58 = vmax.f32 %v1178_v51, 0.0 }
  0xd5   : > { %1696 = vmatpush.bf16.msra.mxu1 %v3566_v53 }
  0xd6   : > { %v823_v59 = vpop.f32.mrf.mxu2  ;;  %v4676_v62 = vpack.c.bf16 %v1226_v56, %v1224_v48  ;;  %v4678_v0 = vpack.c.bf16 %v1242_v58, %v1240_v55  ;;  %v1070_v48 = vperm.slane %v6274_v19, 0  ;;  %v3810_v19 = vld [vmem:[%s6266_s6 + $0x20] sm:$0xff] }
  0xd7   : > { %v1130_v2 = vadd.f32 %v4601_v44, %v823_v59  ;;  %v786_v5 = vpop.f32.mrf.mxu0  ;;  %v806_v6 = vpop.f32.mrf.mxu1 }
  0xd8   : > { %1527 = vmatmul.bf16.gmra.mxu3 %v4676_v62  ;;  %v1100_v17 = vadd.f32 %v4674_v61, %v786_v5  ;;  %v1116_v21 = vadd.f32 %v4684_v8, %v806_v6 }
  0xd9   : > { %v1194_v11 = vadd.f32 %v1130_v2, %v4648_v39  ;;  %v3791_v2 = vld [vmem:[%s6264_s4 + $0x84] sm:$0xf0] }
  0xda   : > { %894 = vmatmul.bf16.gmra.mxu1 %v4400_v15  ;;  %v1164_v34 = vadd.f32 %v1100_v17, %v4583_v32  ;;  %v1180_v20 = vadd.f32 %v1116_v21, %v4583_v32  ;;  %v3813_v17 = vld [vmem:[%s6266_s6 + $0x38] sm:$0xff] }
  0xdb   : > { %v1258_v44 = vmax.f32 %v1194_v11, 0.0  ;;  %983 = vmatmul.bf16.gmra.mxu2 %v4400_v15  ;;  %v3793_v15 = vld [vmem:[%s6264_s4 + $0x94] sm:$0xf0]  ;;  %v3602_v11 = vor.u32 %v3791_v2, %v3601_v1  ;;  %2094 = vmatpush.bf16.msra.mxu3 %v3813_v17 }
  0xdc   : > { %v3610_v42 = vor.u32 %v3793_v15, %v3609_v38  ;;  %v1228_v56 = vmax.f32 %v1164_v34, 0.0  ;;  %v1244_v5 = vmax.f32 %v1180_v20, 0.0 }
  0xdd   : > { %v4709_v60 = vpack.c.bf16 %v1258_v44, %v1256_v18 }
  0xde   : > { %v826_v40 = vpop.f32.mrf.mxu2  ;;  %1609 = vmatpush.bf16.msrb.mxu0 %v3610_v42 }
  0xdf   : > { %v788_v50 = vpop.f32.mrf.mxu0  ;;  %v808_v51 = vpop.f32.mrf.mxu1  ;;  %v1132_v59 = vadd.f32 %v1070_v48, %v826_v40 }
  0xe0   : > { %v1102_v24 = vadd.f32 %v4674_v61, %v788_v50  ;;  %v1118_v55 = vadd.f32 %v4684_v8, %v808_v51  ;;  %v3821_v50 = vld [vmem:[%s6266_s6 + $0x78] sm:$0xff] }
  0xe1   : > { %v1196_v29 = vadd.f32 %v1132_v59, %v4583_v32 }
  0xe2   : > { %v1166_v57 = vadd.f32 %v1102_v24, %v4604_v45  ;;  %v1182_v58 = vadd.f32 %v1118_v55, %v4604_v45  ;;  %1610 = vmatpush.bf16.msrb.mxu0 %v3602_v11 }
  0xe3   : > { %v1260_v42 = vmax.f32 %v1196_v29, 0.0 }
  0xe4   : > { %v1230_v6 = vmax.f32 %v1166_v57, 0.0  ;;  %v1246_v18 = vmax.f32 %v1182_v58, 0.0 }
  0xe6   : > { %v828_v44 = vpop.f32.mrf.mxu2  ;;  %v4734_v21 = vpack.c.bf16 %v1230_v6, %v1228_v56  ;;  %v4736_v23 = vpack.c.bf16 %v1246_v18, %v1244_v5  ;;  %2183 = vmatpush.bf16.msra.mxu0 %v3821_v50 }
  0xe7   : > { %v1134_v33 = vadd.f32 %v1070_v48, %v828_v44  ;;  %v791_v38 = vpop.f32.mrf.mxu0  ;;  %v811_v15 = vpop.f32.mrf.mxu1 }
  0xe8   : > { %1532 = vmatmul.bf16.gmra.mxu3 %v4734_v21  ;;  %v1104_v40 = vadd.f32 %v4674_v61, %v791_v38  ;;  %v1120_v46 = vadd.f32 %v4684_v8, %v811_v15 }
  0xe9   : > { %v1198_v34 = vadd.f32 %v1134_v33, %v4604_v45 }
  0xea   : > { %899 = vmatmul.bf16.gmra.mxu1 %v4427_v25  ;;  %v1168_v53 = vadd.f32 %v1104_v40, %v4642_v30  ;;  %v1184_v56 = vadd.f32 %v1120_v46, %v4642_v30  ;;  %v4766_v40 = vpop.f32.mrf.mxu3 }
  0xeb   : > { %v1262_v43 = vmax.f32 %v1198_v34, 0.0  ;;  %988 = vmatmul.bf16.gmra.mxu2 %v4427_v25 }
  0xec   : > { %v1232_v58 = vmax.f32 %v1168_v53, 0.0  ;;  %v1248_v5 = vmax.f32 %v1184_v56, 0.0 }
  0xed   : > { %v4748_v51 = vpack.c.bf16 %v1262_v43, %v1260_v42  ;;  %v4775_v43 = vld [vmem:[%s4575_s18 + $0x8] sm:$0xff] }
  0xee   : > { %v831_v20 = vpop.f32.mrf.mxu2 }
  0xef   : > { %v793_v24 = vpop.f32.mrf.mxu0  ;;  %v813_v55 = vpop.f32.mrf.mxu1  ;;  %v1136_v2 = vadd.f32 %v1070_v48, %v831_v20  ;;  %v3555_v20 = vld [vmem:[%s6264_s4 + $0x28] sm:$0xf0] }
  0xf0   : > { %v1106_v57 = vadd.f32 %v4674_v61, %v793_v24  ;;  %v1122_v25 = vadd.f32 %v4684_v8, %v813_v55  ;;  %v1061_v8 = vperm.slane %v4551_v13, 1  ;;  %v3619_v13 = vld [vmem:[%s6264_s4 + $0xa8] sm:$0xf0]  ;;  %v4788_v24 = vld [vmem:[%s4575_s18 + $0x20] sm:$0xff] }
  0xf1   : > { %v1200_v29 = vadd.f32 %v1136_v2, %v4642_v30 }
  0xf2   : > { %v1170_v59 = vadd.f32 %v1106_v57, %v4648_v39  ;;  %v1186_v1 = vadd.f32 %v1122_v25, %v4648_v39 }
  0xf3   : > { %v1264_v15 = vmax.f32 %v1200_v29, 0.0 }
  0xf4   : > { %v1234_v6 = vmax.f32 %v1170_v59, 0.0  ;;  %v1250_v11 = vmax.f32 %v1186_v1, 0.0  ;;  %v3812_v59 = vld [vmem:[%s6266_s6 + $0x30] sm:$0xff] }
  0xf5   : > { %2095 = vmatpush.bf16.msra.mxu3 %v3812_v59 }
  0xf6   : > { %v833_v17 = vpop.f32.mrf.mxu2  ;;  %v4756_v18 = vpack.c.bf16 %v1234_v6, %v1232_v58  ;;  %v4758_v44 = vpack.c.bf16 %v1250_v11, %v1248_v5  ;;  %v4795_v5 = vpop.f32.mrf.mxu3 }
  0xf7   : > { %v1138_v61 = vadd.f32 %v1070_v48, %v833_v17  ;;  %v865_v33 = vpop.f32.mrf.mxu1  ;;  %v3794_v48 = vld [vmem:[%s6264_s4 + $0xa4] sm:$0xf] }
  0xf8   : > { %1537 = vmatmul.bf16.gmra.mxu3 %v4756_v18  ;;  %v1093_v42 = vadd.f32 %v1061_v8, %v865_v33  ;;  %v3622_v46 = vor.u32 %v3794_v48, %v3619_v13  ;;  %v4809_v33 = vld [vmem:[%s4575_s18 + $0x38] sm:$0xff] }
  0xf9   : > { %v1202_v38 = vadd.f32 %v1138_v61, %v4648_v39  ;;  %v3820_v61 = vld [vmem:[%s6266_s6 + $0x70] sm:$0xff] }
  0xfa   : > { %904 = vmatmul.bf16.gmra.mxu1 %v4309_v36  ;;  %1786 = vmatpush.bf16.msra.mxu2 %v3622_v46  ;;  %v1157_v57 = vadd.f32 %v1093_v42, %v4775_v43 }
  0xfb   : > { %v1266_v34 = vmax.f32 %v1202_v38, 0.0  ;;  %993 = vmatmul.bf16.gmra.mxu2 %v4309_v36  ;;  %v3778_v36 = vld [vmem:[%s6264_s4 + $0x24] sm:$0xf]  ;;  %2184 = vmatpush.bf16.msra.mxu0 %v3820_v61 }
  0xfc   : > { %v3558_v56 = vor.u32 %v3778_v36, %v3555_v20  ;;  %v1221_v1 = vmax.f32 %v1157_v57, 0.0  ;;  %v1063_v57 = vperm.slane %v1041_v52, 1 }
  0xfd   : > { %v4777_v50 = vpack.c.bf16 %v1266_v34, %v1264_v15  ;;  %v4814_v15 = vld [vmem:[%s4575_s18 + $0x50] sm:$0xff] }
  0xfe   : > { %v4779_v53 = vpop.f32.mrf.mxu2  ;;  %1697 = vmatpush.bf16.msra.mxu1 %v3558_v56  ;;  %v4816_v42 = vpop.f32.mrf.mxu3 }
  0xff   : > { %6286 = vst [vmem:[#allocation10_spill] sm:$0xff] %v4779_v53  ;;  %v867_v55 = vpop.f32.mrf.mxu1 }
 0x100   : > { %v1095_v25 = vadd.f32 %v1061_v8, %v867_v55 }
 0x102   : > { %v1159_v58 = vadd.f32 %v1095_v25, %v4788_v24 }
 0x104   : > { %v1223_v2 = vmax.f32 %v1159_v58, 0.0  ;;  %v3792_v58 = vld [vmem:[%s6264_s4 + $0x94] sm:$0xf] }
 0x105   : > { %v3614_v52 = vor.u32 %v3792_v58, %v3611_v41  ;;  %v3819_v41 = vld [vmem:[%s6266_s6 + $0x68] sm:$0xff] }
 0x106   : > { %v4797_v6 = vpop.f32.mrf.mxu2  ;;  %v4799_v11 = vpack.c.bf16 %v1223_v2, %v1221_v1  ;;  %v4828_v25 = vpop.f32.mrf.mxu3  ;;  %v3776_v1 = vld [vmem:[%s6264_s4 + $0x14] sm:$0xf]  ;;  %2185 = vmatpush.bf16.msra.mxu0 %v3819_v41  ;;  %v3603_v41 = vld [vmem:[%s6264_s4 + $0x88] sm:$0xf0] }
 0x107   : > { %6287 = vst [vmem:[#allocation11_spill] sm:$0xff] %v4797_v6  ;;  %v870_v17 = vpop.f32.mrf.mxu1  ;;  %1787 = vmatpush.bf16.msra.mxu2 %v3614_v52 }
 0x108   : > { %1542 = vmatmul.bf16.gmra.mxu3 %v4625_v4  ;;  %1611 = vmatmul.bf16.vlgmr.msrb.gmra.mxu0 %v4799_v11  ;;  %v1097_v29 = vadd.f32 %v1061_v8, %v870_v17 }
 0x10a   : > { %909 = vmatmul.bf16.gmra.mxu1 %v4369_v63  ;;  %v1161_v48 = vadd.f32 %v1097_v29, %v4809_v33 }
 0x10b   : > { %998 = vmatmul.bf16.gmra.mxu2 %v4369_v63 }
 0x10c   : > { %v1225_v46 = vmax.f32 %v1161_v48, 0.0  ;;  %v3811_v48 = vld [vmem:[%s6266_s6 + $0x28] sm:$0xff] }
 0x10d   : > { %2096 = vmatpush.bf16.msra.mxu3 %v3811_v48 }
 0x10e   : > { %v4811_v38 = vpop.f32.mrf.mxu2 }
 0x10f   : > { %6288 = vst [vmem:[#allocation12_spill] sm:$0xff] %v4811_v38  ;;  %v872_v34 = vpop.f32.mrf.mxu1 }
 0x110   : > { %v1099_v13 = vadd.f32 %v1061_v8, %v872_v34 }
 0x111   : > { %2097 = vmatpush.bf16.msra.mxu3 %v3810_v19 }
 0x112   : > { %v1163_v63 = vadd.f32 %v1099_v13, %v4814_v15  ;;  %v4851_v13 = vpop.f32.mrf.mxu3 }
 0x114   : > { %v1227_v36 = vmax.f32 %v1163_v63, 0.0 }
 0x116   : > { %v4820_v20 = vpop.f32.mrf.mxu2  ;;  %v4822_v55 = vpack.c.bf16 %v1227_v36, %v1225_v46 }
 0x117   : > { %6289 = vst [vmem:[#allocation13_spill] sm:$0xff] %v4820_v20  ;;  %v875_v56 = vpop.f32.mrf.mxu1 }
 0x118   : > { %1547 = vmatmul.bf16.gmra.mxu3 %v4678_v0  ;;  %1616 = vmatmul.bf16.gmra.mxu0 %v4822_v55  ;;  %v1101_v8 = vadd.f32 %v1063_v57, %v875_v56 }
 0x11a   : > { %914 = vmatmul.bf16.gmra.mxu1 %v4403_v16  ;;  %v1165_v29 = vadd.f32 %v1101_v8, %v4775_v43  ;;  %v4864_v52 = vpop.f32.mrf.mxu3 }
 0x11b   : > { %1003 = vmatmul.bf16.gmra.mxu2 %v4403_v16  ;;  %v3547_v16 = vld [vmem:[%s6264_s4 + $0x18] sm:$0xf0] }
 0x11c   : > { %v3550_v17 = vor.u32 %v3776_v1, %v3547_v16  ;;  %v1229_v63 = vmax.f32 %v1165_v29, 0.0 }
 0x11e   : > { %v4838_v59 = vpop.f32.mrf.mxu2  ;;  %1698 = vmatpush.bf16.msra.mxu1 %v3550_v17 }
 0x11f   : > { %6290 = vst [vmem:[#allocation14_spill] sm:$0xff] %v4838_v59  ;;  %v877_v2 = vpop.f32.mrf.mxu1  ;;  %v6303_v59 = vrot.slane %v4570_v28, 4 }
 0x120   : > { %v1103_v61 = vadd.f32 %v1063_v57, %v877_v2 }
 0x122   : > { %v1167_v34 = vadd.f32 %v1103_v61, %v4788_v24 }
 0x124   : > { %v1231_v46 = vmax.f32 %v1167_v34, 0.0 }
 0x126   : > { %v4853_v36 = vpop.f32.mrf.mxu2  ;;  %v4855_v56 = vpack.c.bf16 %v1231_v46, %v1229_v63  ;;  %v4874_v46 = vpop.f32.mrf.mxu3 }
 0x127   : > { %6291 = vst [vmem:[#allocation15_spill] sm:$0xff] %v4853_v36  ;;  %v880_v58 = vpop.f32.mrf.mxu1 }
 0x128   : > { %1552 = vmatmul.bf16.gmra.mxu3 %v4736_v23  ;;  %1621 = vmatmul.bf16.gmra.mxu0 %v4855_v56  ;;  %v1105_v8 = vadd.f32 %v1063_v57, %v880_v58  ;;  %v1065_v58 = vperm.slane %v1044_v14, 1  ;;  %v3774_v14 = vld [vmem:[%s6264_s4 + $0x4] sm:$0xf] }
 0x12a   : > { %919 = vmatmul.bf16.gmra.mxu1 %v4430_v26  ;;  %v1169_v2 = vadd.f32 %v1105_v8, %v4809_v33  ;;  %v3790_v8 = vld [vmem:[%s6264_s4 + $0x84] sm:$0xf] }
 0x12b   : > { %1008 = vmatmul.bf16.gmra.mxu2 %v4430_v26 }
 0x12c   : > { %v1233_v61 = vmax.f32 %v1169_v2, 0.0 }
 0x12e   : > { %v4866_v1 = vpop.f32.mrf.mxu2 }
 0x12f   : > { %6292 = vst [vmem:[#allocation16_spill] sm:$0xff] %v4866_v1  ;;  %v882_v16 = vpop.f32.mrf.mxu1 }
 0x130   : > { %v1107_v17 = vadd.f32 %v1063_v57, %v882_v16  ;;  %v3606_v16 = vor.u32 %v3790_v8, %v3603_v41 }
 0x132   : > { %v1171_v29 = vadd.f32 %v1107_v17, %v4814_v15  ;;  %1788 = vmatpush.bf16.msra.mxu2 %v3606_v16 }
 0x134   : > { %v1235_v34 = vmax.f32 %v1171_v29, 0.0 }
 0x136   : > { %v4870_v48 = vpop.f32.mrf.mxu2  ;;  %v4872_v26 = vpack.c.bf16 %v1235_v34, %v1233_v61  ;;  %v4897_v34 = vpop.f32.mrf.mxu3 }
 0x137   : > { %6293 = vst [vmem:[#allocation17_spill] sm:$0xff] %v4870_v48  ;;  %v885_v63 = vpop.f32.mrf.mxu1 }
 0x138   : > { %1557 = vmatmul.bf16.gmra.mxu3 %v4758_v44  ;;  %1626 = vmatmul.bf16.gmra.mxu0 %v4872_v26  ;;  %v1109_v57 = vadd.f32 %v1065_v58, %v885_v63 }
 0x13a   : > { %924 = vmatmul.bf16.gmra.mxu1 %v4420_v22  ;;  %v1173_v29 = vadd.f32 %v1109_v57, %v4775_v43 }
 0x13b   : > { %1013 = vmatmul.bf16.gmra.mxu2 %v4420_v22  ;;  %v3539_v22 = vld [vmem:[%s6264_s4 + $0x8] sm:$0xf0] }
 0x13c   : > { %v3542_v17 = vor.u32 %v3774_v14, %v3539_v22  ;;  %v1237_v8 = vmax.f32 %v1173_v29, 0.0  ;;  %v3818_v22 = vld [vmem:[%s6266_s6 + $0x60] sm:$0xff] }
 0x13d   : > { %2186 = vmatpush.bf16.msra.mxu0 %v3818_v22 }
 0x13e   : > { %v4888_v12 = vpop.f32.mrf.mxu2  ;;  %1699 = vmatpush.bf16.msra.mxu1 %v3542_v17 }
 0x13f   : > { %6294 = vst [vmem:[#allocation18_spill] sm:$0xff] %v4888_v12  ;;  %v887_v2 = vpop.f32.mrf.mxu1  ;;  %v6298_v12 = vrot.slane %v4659_v47, 3 }
 0x140   : > { %v1111_v61 = vadd.f32 %v1065_v58, %v887_v2 }
 0x141   : > { %v1067_v48 = vperm.slane %v6298_v12, 1 }
 0x142   : > { %v1175_v63 = vadd.f32 %v1111_v61, %v4788_v24 }
 0x144   : > { %v1239_v41 = vmax.f32 %v1175_v63, 0.0 }
 0x146   : > { %v4903_v31 = vpop.f32.mrf.mxu2  ;;  %v4905_v54 = vpack.c.bf16 %v1239_v41, %v1237_v8 }
 0x147   : > { %6295 = vst [vmem:[#allocation19_spill] sm:$0xff] %v4903_v31  ;;  %v890_v16 = vpop.f32.mrf.mxu1 }
 0x148   : > { %1562 = vmatmul.bf16.gmra.mxu3 %v4644_v37  ;;  %1631 = vmatmul.bf16.gmra.mxu0 %v4905_v54  ;;  %v1113_v14 = vadd.f32 %v1065_v58, %v890_v16 }
 0x14a   : > { %929 = vmatmul.bf16.gmra.mxu1 %v4436_v27  ;;  %v1177_v17 = vadd.f32 %v1113_v14, %v4809_v33 }
 0x14b   : > { %1018 = vmatmul.bf16.gmra.mxu2 %v4436_v27  ;;  %v4911_v57 = vpop.f32.mrf.mxu3 }
 0x14c   : > { %v1241_v8 = vmax.f32 %v1177_v17, 0.0 }
 0x14e   : > { %v4916_v2 = vpop.f32.mrf.mxu2 }
 0x14f   : > { %6296 = vst [vmem:[#allocation20_spill] sm:$0xff] %v4916_v2  ;;  %v892_v19 = vpop.f32.mrf.mxu1 }
 0x150   : > { %v1115_v29 = vadd.f32 %v1065_v58, %v892_v19 }
 0x152   : > { %v1179_v61 = vadd.f32 %v1115_v29, %v4814_v15 }
 0x153   : > { %v4920_v63 = vpop.f32.mrf.mxu3 }
 0x154   : > { %v1243_v27 = vmax.f32 %v1179_v61, 0.0 }
 0x156   : > { %v4922_v41 = vpop.f32.mrf.mxu2  ;;  %v4924_v16 = vpack.c.bf16 %v1243_v27, %v1241_v8  ;;  %v3809_v27 = vld [vmem:[%s6266_s6 + $0x18] sm:$0xff] }
 0x157   : > { %6297 = vst [vmem:[#allocation21_spill] sm:$0xff] %v4922_v41  ;;  %v895_v31 = vpop.f32.mrf.mxu1  ;;  %2098 = vmatpush.bf16.msra.mxu3 %v3809_v27 }
 0x158   : > { %1567 = vmatmul.bf16.gmra.mxu3 %v4709_v60  ;;  %1636 = vmatmul.bf16.gmra.mxu0 %v4924_v16  ;;  %v1117_v14 = vadd.f32 %v1067_v48, %v895_v31 }
 0x15a   : > { %934 = vmatmul.bf16.gmra.mxu1 %v4454_v35  ;;  %v1181_v17 = vadd.f32 %v1117_v14, %v4775_v43 }
 0x15b   : > { %1023 = vmatmul.bf16.gmra.mxu2 %v4454_v35  ;;  %v4932_v58 = vpop.f32.mrf.mxu3 }
 0x15c   : > { %v1245_v61 = vmax.f32 %v1181_v17, 0.0  ;;  %v3817_v17 = vld [vmem:[%s6266_s6 + $0x58] sm:$0xff] }
 0x15d   : > { %2187 = vmatpush.bf16.msra.mxu0 %v3817_v17 }
 0x15e   : > { %v4934_v22 = vpop.f32.mrf.mxu2 }
 0x15f   : > { %6299 = vst [vmem:[#allocation22_spill] sm:$0xff] %v4934_v22  ;;  %v897_v19 = vpop.f32.mrf.mxu1 }
 0x160   : > { %v1119_v29 = vadd.f32 %v1067_v48, %v897_v19 }
 0x162   : > { %v1183_v47 = vadd.f32 %v1119_v29, %v4788_v24 }
 0x163   : > { %v4938_v12 = vpop.f32.mrf.mxu3 }
 0x164   : > { %v1247_v8 = vmax.f32 %v1183_v47, 0.0  ;;  %v4960_v47 = vsel %vm1054_vm6, %v4543_v10, %v4534_v7 }
 0x166   : > { %v4943_v35 = vpop.f32.mrf.mxu2  ;;  %v4945_v41 = vpack.c.bf16 %v1247_v8, %v1245_v61 }
 0x167   : > { %6300 = vst [vmem:[#allocation23_spill] sm:$0xff] %v4943_v35  ;;  %v900_v31 = vpop.f32.mrf.mxu1 }
 0x168   : > { %1572 = vmatmul.bf16.gmra.mxu3 %v4748_v51  ;;  %1641 = vmatmul.bf16.gmra.mxu0 %v4945_v41  ;;  %v1121_v19 = vadd.f32 %v1067_v48, %v900_v31 }
 0x16a   : > { %939 = vmatmul.bf16.gmra.mxu1 %v4486_v49  ;;  %v1185_v8 = vadd.f32 %v1121_v19, %v4809_v33  ;;  %v1069_v19 = vperm.slane %v6303_v59, 1 }
 0x16b   : > { %1028 = vmatmul.bf16.gmra.mxu2 %v4486_v49  ;;  %v4951_v14 = vpop.f32.mrf.mxu3  ;;  %v6277_v49 = vrot.slane %v4960_v47, 6 }
 0x16c   : > { %v1249_v22 = vmax.f32 %v1185_v8, 0.0 }
 0x16e   : > { %v4956_v29 = vpop.f32.mrf.mxu2 }
 0x16f   : > { %6301 = vst [vmem:[#allocation24_spill] sm:$0xff] %v4956_v29  ;;  %v902_v61 = vpop.f32.mrf.mxu1  ;;  %v1072_v29 = vperm.slane %v6277_v49, 0 }
 0x170   : > { %v1123_v27 = vadd.f32 %v1067_v48, %v902_v61 }
 0x171   : > { %v1140_v48 = vadd.f32 %v1072_v29, %v4766_v40  ;;  %v1142_v61 = vadd.f32 %v1072_v29, %v4795_v5 }
 0x172   : > { %v1187_v35 = vadd.f32 %v1123_v27, %v4814_v15 }
 0x173   : > { %v4965_v31 = vpop.f32.mrf.mxu3  ;;  %v1206_v28 = vadd.f32 %v1142_v61, %v4604_v45 }
 0x174   : > { %v1251_v2 = vmax.f32 %v1187_v35, 0.0 }
 0x176   : > { %v4969_v17 = vpop.f32.mrf.mxu2  ;;  %v4971_v1 = vpack.c.bf16 %v1251_v2, %v1249_v22  ;;  %v1204_v22 = vadd.f32 %v1140_v48, %v4583_v32 }
 0x177   : > { %6302 = vst [vmem:[#allocation25_spill] sm:$0xff] %v4969_v17  ;;  %v905_v36 = vpop.f32.mrf.mxu1  ;;  %v1270_v17 = vmax.f32 %v1206_v28, 0.0  ;;  %v1146_v28 = vadd.f32 %v1072_v29, %v4828_v25 }
 0x178   : > { %1577 = vmatmul.bf16.gmra.mxu3 %v4777_v50  ;;  %1646 = vmatmul.bf16.gmra.mxu0 %v4971_v1  ;;  %v1125_v2 = vadd.f32 %v1069_v19, %v905_v36  ;;  %v1268_v40 = vmax.f32 %v1204_v22, 0.0  ;;  %v3808_v36 = vld [vmem:[%s6266_s6 + $0x10] sm:$0xff] }
 0x179   : > { %2099 = vmatpush.bf16.msra.mxu3 %v3808_v36 }
 0x17a   : > { %1700 = vmatmul.bf16.vlgmr.msra.gmra.mxu1 %v4623_v3  ;;  %v1189_v27 = vadd.f32 %v1125_v2, %v4775_v43 }
 0x17b   : > { %1789 = vmatmul.bf16.vlgmr.msra.gmra.mxu2 %v4799_v11  ;;  %v4981_v35 = vpop.f32.mrf.mxu3 }
 0x17c   : > { %v1253_v11 = vmax.f32 %v1189_v27, 0.0 }
 0x17e   : > { %v4985_v59 = vpop.f32.mrf.mxu2 }
 0x17f   : > { %6304 = vst [vmem:[#allocation26_spill] sm:$0xff] %v4985_v59  ;;  %v907_v8 = vpop.f32.mrf.mxu1  ;;  %v4998_v59 = vpack.c.bf16 %v1270_v17, %v1268_v40 }
 0x180   : > { %v1127_v49 = vadd.f32 %v1069_v19, %v907_v8 }
 0x182   : > { %v1191_v5 = vadd.f32 %v1127_v49, %v4788_v24  ;;  %v1144_v49 = vadd.f32 %v1072_v29, %v4816_v42  ;;  %v1210_v42 = vadd.f32 %v1146_v28, %v4648_v39 }
 0x183   : > { %v4989_v3 = vpop.f32.mrf.mxu3 }
 0x184   : > { %v1255_v20 = vmax.f32 %v1191_v5, 0.0  ;;  %v1208_v40 = vadd.f32 %v1144_v49, %v4642_v30  ;;  %v1274_v36 = vmax.f32 %v1210_v42, 0.0 }
 0x185   : > { %v4994_v48 = vpop.f32.mrf.mxu0 }
 0x186   : > { %v4996_v61 = vpop.f32.mrf.mxu2  ;;  %v5000_v2 = vpack.c.bf16 %v1255_v20, %v1253_v11  ;;  %v3816_v20 = vld [vmem:[%s6266_s6 + $0x50] sm:$0xff]  ;;  %v1272_v11 = vmax.f32 %v1208_v40, 0.0  ;;  %v6308_v40 = vrot.slane %v4689_v9, 5 }
 0x187   : > { %6305 = vst [vmem:[#allocation27_spill] sm:$0xff] %v4996_v61  ;;  %v910_v22 = vpop.f32.mrf.mxu1  ;;  %2188 = vmatpush.bf16.msra.mxu0 %v3816_v20 }
 0x188   : > { %1582 = vmatmul.bf16.gmra.mxu3 %v4998_v59  ;;  %1651 = vmatmul.bf16.gmra.mxu0 %v5000_v2  ;;  %v1129_v17 = vadd.f32 %v1069_v19, %v910_v22  ;;  %v5034_v20 = vpack.c.bf16 %v1274_v36, %v1272_v11  ;;  %v1071_v42 = vperm.slane %v6308_v40, 1 }
 0x18a   : > { %1705 = vmatmul.bf16.gmra.mxu1 %v4676_v62  ;;  %v5021_v62 = vsel %vm1057_vm7, %v4534_v7, %v4543_v10  ;;  %v1193_v25 = vadd.f32 %v1129_v17, %v4809_v33 }
 0x18b   : > { %1794 = vmatmul.bf16.gmra.mxu2 %v4822_v55  ;;  %v5008_v8 = vpop.f32.mrf.mxu3  ;;  %v6278_v22 = vrot.slane %v5021_v62, 7 }
 0x18c   : > { %v1257_v28 = vmax.f32 %v1193_v25, 0.0 }
 0x18d   : > { %v5013_v27 = vpop.f32.mrf.mxu0  ;;  %v1074_v7 = vperm.slane %v6278_v22, 0 }
 0x18e   : > { %v5017_v5 = vpop.f32.mrf.mxu2 }
 0x18f   : > { %6306 = vst [vmem:[#allocation28_spill] sm:$0xff] %v5017_v5  ;;  %v912_v55 = vpop.f32.mrf.mxu1 }
 0x190   : > { %v1131_v29 = vadd.f32 %v1069_v19, %v912_v55  ;;  %v1150_v55 = vadd.f32 %v1074_v7, %v4864_v52 }
 0x192   : > { %v1195_v61 = vadd.f32 %v1131_v29, %v4814_v15  ;;  %v1214_v11 = vadd.f32 %v1150_v55, %v4604_v45  ;;  %v3806_v45 = vld [vmem:[%s6266_s6] sm:$0xff] }
 0x193   : > { %v5026_v49 = vpop.f32.mrf.mxu3 }
 0x194   : > { %v1259_v38 = vmax.f32 %v1195_v61, 0.0  ;;  %v1148_v61 = vadd.f32 %v1074_v7, %v4851_v13  ;;  %v1278_v52 = vmax.f32 %v1214_v11, 0.0  ;;  %v1152_v11 = vadd.f32 %v1074_v7, %v4874_v46 }
 0x195   : > { %v5028_v5 = vpop.f32.mrf.mxu0 }
 0x196   : > { %v5032_v10 = vpop.f32.mrf.mxu2  ;;  %v5036_v19 = vpack.c.bf16 %v1259_v38, %v1257_v28  ;;  %v1212_v9 = vadd.f32 %v1148_v61, %v4583_v32 }
 0x197   : > { %6307 = vst [vmem:[#allocation29_spill] sm:$0xff] %v5032_v10  ;;  %v915_v17 = vpop.f32.mrf.mxu1 }
 0x198   : > { %1587 = vmatmul.bf16.gmra.mxu3 %v5034_v20  ;;  %1656 = vmatmul.bf16.gmra.mxu0 %v5036_v19  ;;  %v1133_v38 = vadd.f32 %v1071_v42, %v915_v17 }
 0x19a   : > { %1710 = vmatmul.bf16.gmra.mxu1 %v4734_v21  ;;  %v1197_v13 = vadd.f32 %v1133_v38, %v4775_v43  ;;  %v3807_v21 = vld [vmem:[%s6266_s6 + $0x8] sm:$0xff] }
 0x19b   : > { %1799 = vmatmul.bf16.gmra.mxu2 %v4855_v56  ;;  %v5046_v25 = vpop.f32.mrf.mxu3  ;;  %v1276_v56 = vmax.f32 %v1212_v9, 0.0  ;;  %2100 = vmatpush.bf16.msra.mxu3 %v3807_v21 }
 0x19c   : > { %v1261_v32 = vmax.f32 %v1197_v13, 0.0  ;;  %v1154_v13 = vadd.f32 %v1074_v7, %v4897_v34 }
 0x19d   : > { %v5048_v29 = vpop.f32.mrf.mxu0 }
 0x19e   : > { %v5052_v36 = vpop.f32.mrf.mxu2 }
 0x19f   : > { %6309 = vst [vmem:[#allocation30_spill] sm:$0xff] %v5052_v36  ;;  %v917_v28 = vpop.f32.mrf.mxu1  ;;  %2101 = vmatpush.bf16.msra.mxu3 %v3806_v45 }
 0x1a0   : > { %v1135_v40 = vadd.f32 %v1071_v42, %v917_v28  ;;  %v5068_v28 = vpack.c.bf16 %v1278_v52, %v1276_v56  ;;  %v3815_v56 = vld [vmem:[%s6266_s6 + $0x48] sm:$0xff] }
 0x1a1   : > { %2189 = vmatpush.bf16.msra.mxu0 %v3815_v56 }
 0x1a2   : > { %v1199_v17 = vadd.f32 %v1135_v40, %v4788_v24 }
 0x1a3   : > { %v5059_v22 = vpop.f32.mrf.mxu3 }
 0x1a4   : > { %v1263_v61 = vmax.f32 %v1199_v17, 0.0  ;;  %v1216_v17 = vadd.f32 %v1152_v11, %v4642_v30  ;;  %v5096_v30 = vld [vmem:[%s6265_s5] sm:$0x3] }
 0x1a5   : > { %v5064_v55 = vpop.f32.mrf.mxu0  ;;  %v5107_v56 = vperm.slane %v5096_v30, 0 }
 0x1a6   : > { %v5066_v38 = vpop.f32.mrf.mxu2  ;;  %v5070_v36 = vpack.c.bf16 %v1263_v61, %v1261_v32  ;;  %v1218_v32 = vadd.f32 %v1154_v13, %v4648_v39  ;;  %v1280_v7 = vmax.f32 %v1216_v17, 0.0  ;;  %v6313_v17 = vrot.slane %v4960_v47, 6 }
 0x1a7   : > { %6310 = vst [vmem:[#allocation31_spill] sm:$0xff] %v5066_v38  ;;  %v920_v9 = vpop.f32.mrf.mxu1  ;;  %v1524_v47 = vadd.f32 %v4911_v57, %v5107_v56 }
 0x1a8   : > { %1592 = vmatmul.bf16.gmra.mxu3 %v5068_v28  ;;  %1661 = vmatmul.bf16.gmra.mxu0 %v5070_v36  ;;  %v1137_v21 = vadd.f32 %v1071_v42, %v920_v9  ;;  %v1282_v61 = vmax.f32 %v1218_v32, 0.0  ;;  %v1073_v32 = vperm.slane %v6313_v17, 1 }
 0x1aa   : > { %1715 = vmatmul.bf16.gmra.mxu1 %v4756_v18  ;;  %v1201_v18 = vadd.f32 %v1137_v21, %v4809_v33  ;;  %v5102_v13 = vpack.c.bf16 %v1282_v61, %v1280_v7 }
 0x1ab   : > { %1804 = vmatmul.bf16.gmra.mxu2 %v4872_v26  ;;  %v5078_v40 = vpop.f32.mrf.mxu3 }
 0x1ac   : > { %v1265_v38 = vmax.f32 %v1201_v18, 0.0 }
 0x1ad   : > { %v5083_v52 = vpop.f32.mrf.mxu0 }
 0x1ae   : > { %v5087_v46 = vpop.f32.mrf.mxu2 }
 0x1af   : > { %6311 = vst [vmem:[#allocation32_spill] sm:$0xff] %v5087_v46  ;;  %v922_v34 = vpop.f32.mrf.mxu1 }
 0x1b0   : > { %v1139_v26 = vadd.f32 %v1071_v42, %v922_v34 }
 0x1b2   : > { %v1203_v45 = vadd.f32 %v1139_v26, %v4814_v15 }
 0x1b3   : > { %v5091_v9 = vpop.f32.mrf.mxu3 }
 0x1b4   : > { %v1267_v10 = vmax.f32 %v1203_v45, 0.0 }
 0x1b5   : > { %v5098_v39 = vpop.f32.mrf.mxu0 }
 0x1b6   : > { %v5100_v11 = vpop.f32.mrf.mxu2  ;;  %v5104_v42 = vpack.c.bf16 %v1267_v10, %v1265_v38  ;;  %v1526_v10 = vadd.f32 %v4920_v63, %v5107_v56 }
 0x1b7   : > { %6312 = vst [vmem:[#allocation33_spill] sm:$0xff] %v5100_v11  ;;  %v925_v21 = vpop.f32.mrf.mxu1 }
 0x1b8   : > { %1597 = vmatmul.bf16.gmra.mxu3 %v5102_v13  ;;  %1666 = vmatmul.bf16.gmra.mxu0 %v5104_v42  ;;  %v1141_v38 = vadd.f32 %v1073_v32, %v925_v21  ;;  %v1615_v26 = vadd.f32 %v5013_v27, %v1526_v10 }
 0x1ba   : > { %1720 = vmatmul.bf16.gmra.mxu1 %v4625_v4  ;;  %v1613_v4 = vadd.f32 %v4994_v48, %v1524_v47  ;;  %v1872_v17 = vmax.f32 %v1615_v26, 0.0  ;;  %v3814_v47 = vld [vmem:[%s6266_s6 + $0x40] sm:$0xff] }
 0x1bb   : > { %1809 = vmatmul.bf16.gmra.mxu2 %v4905_v54  ;;  %v5115_v34 = vpop.f32.mrf.mxu3  ;;  %v1205_v54 = vadd.f32 %v1141_v38, %v4775_v43  ;;  %2190 = vmatpush.bf16.msra.mxu0 %v3814_v47 }
 0x1bc   : > { %v1870_v21 = vmax.f32 %v1613_v4, 0.0 }
 0x1bd   : > { %v5119_v18 = vpop.f32.mrf.mxu0  ;;  %v1269_v46 = vmax.f32 %v1205_v54, 0.0 }
 0x1be   : > { %v5124_v7 = vpop.f32.mrf.mxu2  ;;  %v1934_v57 = vpack.c.bf16 %v1872_v17, %v1870_v21 }
 0x1bf   : > { %6314 = vst [vmem:[#allocation34_spill] sm:$0xff] %v5124_v7  ;;  %v927_v61 = vpop.f32.mrf.mxu1 }
 0x1c0   : > { %v1143_v45 = vadd.f32 %v1073_v32, %v927_v61 }
 0x1c2   : > { %v1207_v11 = vadd.f32 %v1143_v45, %v4788_v24 }
 0x1c3   : > { %v5129_v63 = vpop.f32.mrf.mxu3 }
 0x1c4   : > { %v1271_v6 = vmax.f32 %v1207_v11, 0.0  ;;  %v1531_v11 = vadd.f32 %v4938_v12, %v5107_v56 }
 0x1c5   : > { %v5131_v53 = vpop.f32.mrf.mxu0 }
 0x1c6   : > { %v5133_v27 = vpop.f32.mrf.mxu2  ;;  %v5135_v10 = vpack.c.bf16 %v1271_v6, %v1269_v46  ;;  %v1529_v46 = vadd.f32 %v4932_v58, %v5107_v56  ;;  %v1620_v26 = vadd.f32 %v5048_v29, %v1531_v11 }
 0x1c7   : > { %v930_v7 = vpop.f32.mrf.mxu1 }
 0x1c8   : > { %1671 = vmatmul.bf16.gmra.mxu0 %v5135_v10  ;;  %2102 = vmatmul.bf16.vlgmr.msra.gmra.mxu3 %v1934_v57  ;;  %v1145_v38 = vadd.f32 %v1073_v32, %v930_v7  ;;  %v1618_v61 = vadd.f32 %v5028_v5, %v1529_v46  ;;  %v1876_v4 = vmax.f32 %v1620_v26, 0.0  ;;  %v6316_v5 = vrot.slane %v5021_v62, 7 }
 0x1c9   : > { %v1536_v46 = vadd.f32 %v4965_v31, %v5107_v56 }
 0x1ca   : > { %1725 = vmatmul.bf16.gmra.mxu1 %v4678_v0  ;;  %v1209_v12 = vadd.f32 %v1145_v38, %v4809_v33  ;;  %v1874_v17 = vmax.f32 %v1618_v61, 0.0  ;;  %v1075_v38 = vperm.slane %v6316_v5, 1  ;;  %v1534_v61 = vadd.f32 %v4951_v14, %v5107_v56 }
 0x1cb   : > { %1814 = vmatmul.bf16.gmra.mxu2 %v4924_v16  ;;  %v5140_v48 = vpop.f32.mrf.mxu3  ;;  %v1625_v62 = vadd.f32 %v5083_v52, %v1536_v46 }
 0x1cc   : > { %v1273_v21 = vmax.f32 %v1209_v12, 0.0  ;;  %v1936_v47 = vpack.c.bf16 %v1876_v4, %v1874_v17 }
 0x1cd   : > { %v5147_v6 = vpop.f32.mrf.mxu0 }
 0x1ce   : > { %v5152_v0 = vpop.f32.mrf.mxu2 }
 0x1cf   : > { %6315 = vst [vmem:[#allocation35_spill] sm:$0xff] %v5152_v0  ;;  %v932_v16 = vpop.f32.mrf.mxu1 }
 0x1d0   : > { %v1147_v7 = vadd.f32 %v1073_v32, %v932_v16 }
 0x1d2   : > { %v1211_v54 = vadd.f32 %v1147_v7, %v4814_v15 }
 0x1d3   : > { %v5157_v45 = vpop.f32.mrf.mxu3 }
 0x1d4   : > { %v1275_v57 = vmax.f32 %v1211_v54, 0.0  ;;  %v1880_v54 = vmax.f32 %v1625_v62, 0.0 }
 0x1d5   : > { %v5159_v58 = vpop.f32.mrf.mxu0 }
 0x1d6   : > { %v5161_v29 = vpop.f32.mrf.mxu2  ;;  %v5163_v11 = vpack.c.bf16 %v1275_v57, %v1273_v21 }
 0x1d7   : > { %v935_v0 = vpop.f32.mrf.mxu1 }
 0x1d8   : > { %1676 = vmatmul.bf16.gmra.mxu0 %v5163_v11  ;;  %2107 = vmatmul.bf16.gmra.mxu3 %v1936_v47  ;;  %v1149_v26 = vadd.f32 %v1075_v38, %v935_v0 }
 0x1da   : > { %1730 = vmatmul.bf16.gmra.mxu1 %v4736_v23  ;;  %v1623_v23 = vadd.f32 %v5064_v55, %v1534_v61  ;;  %v1539_v61 = vadd.f32 %v4981_v35, %v5107_v56 }
 0x1db   : > { %1819 = vmatmul.bf16.gmra.mxu2 %v4945_v41  ;;  %v5170_v32 = vpop.f32.mrf.mxu3  ;;  %v1213_v41 = vadd.f32 %v1149_v26, %v4775_v43 }
 0x1dc   : > { %v1878_v0 = vmax.f32 %v1623_v23, 0.0 }
 0x1dd   : > { %v5174_v16 = vpop.f32.mrf.mxu0  ;;  %v1277_v21 = vmax.f32 %v1213_v41, 0.0 }
 0x1de   : > { %v5179_v12 = vpop.f32.mrf.mxu2  ;;  %v1938_v5 = vpack.c.bf16 %v1880_v54, %v1878_v0 }
 0x1df   : > { %v937_v7 = vpop.f32.mrf.mxu1 }
 0x1e0   : > { %v1151_v4 = vadd.f32 %v1075_v38, %v937_v7 }
 0x1e2   : > { %v1215_v17 = vadd.f32 %v1151_v4, %v4788_v24  ;;  %v1541_v24 = vadd.f32 %v4989_v3, %v5107_v56 }
 0x1e3   : > { %v5184_v31 = vpop.f32.mrf.mxu3 }
 0x1e4   : > { %v1279_v57 = vmax.f32 %v1215_v17, 0.0  ;;  %v1630_v62 = vadd.f32 %v5119_v18, %v1541_v24 }
 0x1e5   : > { %v5186_v47 = vpop.f32.mrf.mxu0 }
 0x1e6   : > { %v5188_v14 = vpop.f32.mrf.mxu2  ;;  %v5190_v52 = vpack.c.bf16 %v1279_v57, %v1277_v21  ;;  %v1884_v4 = vmax.f32 %v1630_v62, 0.0 }
 0x1e7   : > { %v940_v46 = vpop.f32.mrf.mxu1 }
 0x1e8   : > { %1681 = vmatmul.bf16.gmra.mxu0 %v5190_v52  ;;  %2112 = vmatmul.bf16.gmra.mxu3 %v1938_v5  ;;  %v1153_v55 = vadd.f32 %v1075_v38, %v940_v46 }
 0x1ea   : > { %1735 = vmatmul.bf16.gmra.mxu1 %v4758_v44  ;;  %v1628_v44 = vadd.f32 %v5098_v39, %v1539_v61  ;;  %v5230_v61 = vperm.slane %v5096_v30, 1 }
 0x1eb   : > { %1824 = vmatmul.bf16.gmra.mxu2 %v4971_v1  ;;  %v5195_v43 = vpop.f32.mrf.mxu3  ;;  %v1217_v1 = vadd.f32 %v1153_v55, %v4809_v33 }
 0x1ec   : > { %v1882_v17 = vmax.f32 %v1628_v44, 0.0 }
 0x1ed   : > { %v5199_v26 = vpop.f32.mrf.mxu0  ;;  %v1281_v0 = vmax.f32 %v1217_v1, 0.0 }
 0x1ee   : > { %v5204_v7 = vpop.f32.mrf.mxu2  ;;  %v1940_v5 = vpack.c.bf16 %v1884_v4, %v1882_v17 }
 0x1ef   : > { %v942_v23 = vpop.f32.mrf.mxu1 }
 0x1f0   : > { %v1155_v41 = vadd.f32 %v1075_v38, %v942_v23  ;;  %v1544_v38 = vadd.f32 %v5008_v8, %v5107_v56 }
 0x1f2   : > { %v1219_v54 = vadd.f32 %v1155_v41, %v4814_v15  ;;  %v1546_v15 = vadd.f32 %v5026_v49, %v5107_v56 }
 0x1f3   : > { %v5209_v3 = vpop.f32.mrf.mxu3 }
 0x1f4   : > { %v1283_v21 = vmax.f32 %v1219_v54, 0.0  ;;  %v1635_v24 = vadd.f32 %v5147_v6, %v1546_v15  ;;  %v1549_v15 = vadd.f32 %v5046_v25, %v5107_v56 }
 0x1f5   : > { %v5211_v57 = vpop.f32.mrf.mxu0 }
 0x1f6   : > { %v5213_v35 = vpop.f32.mrf.mxu2  ;;  %v5215_v18 = vpack.c.bf16 %v1283_v21, %v1281_v0 }
 0x1f7   : > { %v1701_v46 = vpop.f32.mrf.mxu1 }
 0x1f8   : > { %1686 = vmatmul.bf16.gmra.mxu0 %v5215_v18  ;;  %2117 = vmatmul.bf16.gmra.mxu3 %v1940_v5  ;;  %v1702_v23 = vadd.f32 %v1701_v46, %v5230_v61  ;;  %v1551_v5 = vadd.f32 %v5059_v22, %v5107_v56 }
 0x1fa   : > { %1740 = vmatmul.bf16.gmra.mxu1 %v4644_v37  ;;  %v1633_v37 = vadd.f32 %v5131_v53, %v1544_v38  ;;  %v1640_v38 = vadd.f32 %v5174_v16, %v1551_v5 }
 0x1fb   : > { %1829 = vmatmul.bf16.gmra.mxu2 %v5000_v2  ;;  %v5220_v33 = vpop.f32.mrf.mxu3  ;;  %v1888_v2 = vmax.f32 %v1635_v24, 0.0 }
 0x1fc   : > { %v1886_v49 = vmax.f32 %v1633_v37, 0.0 }
 0x1fd   : > { %v5224_v39 = vpop.f32.mrf.mxu0 }
 0x1fe   : > { %v1790_v55 = vpop.f32.mrf.mxu2  ;;  %v1942_v6 = vpack.c.bf16 %v1888_v2, %v1886_v49 }
 0x1ff   : > { %v1703_v62 = vpop.f32.mrf.mxu1  ;;  %v1791_v1 = vadd.f32 %v1790_v55, %v1702_v23 }
 0x200   : > { %v1704_v41 = vadd.f32 %v1703_v62, %v5230_v61  ;;  %v1892_v62 = vmax.f32 %v1640_v38, 0.0 }
 0x201   : > { %v1871_v30 = vmax.f32 %v1791_v1, 0.0 }
 0x203   : > { %v5234_v44 = vpop.f32.mrf.mxu3 }
 0x205   : > { %v5237_v4 = vpop.f32.mrf.mxu0 }
 0x206   : > { %v1792_v8 = vpop.f32.mrf.mxu2 }
 0x207   : > { %v1793_v54 = vadd.f32 %v1792_v8, %v1704_v41  ;;  %v1706_v17 = vpop.f32.mrf.mxu1 }
 0x208   : > { %2122 = vmatmul.bf16.gmra.mxu3 %v1942_v6 }
 0x209   : > { %v1873_v0 = vmax.f32 %v1793_v54, 0.0 }
 0x20a   : > { %1745 = vmatmul.bf16.gmra.mxu1 %v4709_v60  ;;  %v1638_v60 = vadd.f32 %v5159_v58, %v1549_v15 }
 0x20b   : > { %v1935_v53 = vpack.c.bf16 %v1873_v0, %v1871_v30  ;;  %1834 = vmatmul.bf16.gmra.mxu2 %v5036_v19  ;;  %v5241_v21 = vpop.f32.mrf.mxu3  ;;  %v1707_v19 = vadd.f32 %v1706_v17, %v5230_v61  ;;  %v1556_v17 = vadd.f32 %v5091_v9, %v5107_v56  ;;  %v1554_v0 = vadd.f32 %v5078_v40, %v5107_v56 }
 0x20c   : > { %v1890_v2 = vmax.f32 %v1638_v60, 0.0 }
 0x20d   : > { %2191 = vmatmul.bf16.vlgmr.msra.gmra.mxu0 %v1935_v53  ;;  %v5245_v46 = vpop.f32.mrf.mxu0  ;;  %v1645_v53 = vadd.f32 %v5199_v26, %v1556_v17 }
 0x20e   : > { %v1795_v24 = vpop.f32.mrf.mxu2  ;;  %v1944_v41 = vpack.c.bf16 %v1892_v62, %v1890_v2 }
 0x20f   : > { %v1708_v55 = vpop.f32.mrf.mxu1  ;;  %v1796_v23 = vadd.f32 %v1795_v24, %v1707_v19  ;;  %v1896_v38 = vmax.f32 %v1645_v53, 0.0 }
 0x210   : > { %v1709_v22 = vadd.f32 %v1708_v55, %v5230_v61 }
 0x211   : > { %v1875_v16 = vmax.f32 %v1796_v23, 0.0 }
 0x213   : > { %v5252_v37 = vpop.f32.mrf.mxu3 }
 0x215   : > { %v5255_v49 = vpop.f32.mrf.mxu0 }
 0x216   : > { %v1797_v1 = vpop.f32.mrf.mxu2 }
 0x217   : > { %v1798_v25 = vadd.f32 %v1797_v1, %v1709_v22  ;;  %v1711_v8 = vpop.f32.mrf.mxu1 }
 0x218   : > { %2127 = vmatmul.bf16.gmra.mxu3 %v1944_v41  ;;  %v1561_v41 = vadd.f32 %v5129_v63, %v5107_v56 }
 0x219   : > { %v1877_v6 = vmax.f32 %v1798_v25, 0.0 }
 0x21a   : > { %1750 = vmatmul.bf16.gmra.mxu1 %v4748_v51  ;;  %v1643_v51 = vadd.f32 %v5186_v47, %v1554_v0 }
 0x21b   : > { %1839 = vmatmul.bf16.gmra.mxu2 %v5070_v36  ;;  %v5259_v58 = vpop.f32.mrf.mxu3  ;;  %v1937_v54 = vpack.c.bf16 %v1877_v6, %v1875_v16  ;;  %v1712_v36 = vadd.f32 %v1711_v8, %v5230_v61  ;;  %v1559_v8 = vadd.f32 %v5115_v34, %v5107_v56  ;;  %v1650_v16 = vadd.f32 %v5224_v39, %v1561_v41 }
 0x21c   : > { %v1894_v55 = vmax.f32 %v1643_v51, 0.0 }
 0x21d   : > { %2196 = vmatmul.bf16.gmra.mxu0 %v1937_v54  ;;  %v5263_v30 = vpop.f32.mrf.mxu0  ;;  %v1900_v17 = vmax.f32 %v1650_v16, 0.0 }
 0x21e   : > { %v1800_v5 = vpop.f32.mrf.mxu2  ;;  %v1946_v2 = vpack.c.bf16 %v1896_v38, %v1894_v55 }
 0x21f   : > { %v1713_v15 = vpop.f32.mrf.mxu1  ;;  %v1801_v60 = vadd.f32 %v1800_v5, %v1712_v36 }
 0x220   : > { %v1714_v9 = vadd.f32 %v1713_v15, %v5230_v61 }
 0x221   : > { %v1879_v26 = vmax.f32 %v1801_v60, 0.0 }
 0x223   : > { %v5270_v24 = vpop.f32.mrf.mxu3 }
 0x225   : > { %v5273_v62 = vpop.f32.mrf.mxu0 }
 0x226   : > { %v1802_v19 = vpop.f32.mrf.mxu2 }
 0x227   : > { %v1803_v40 = vadd.f32 %v1802_v19, %v1714_v9  ;;  %v1716_v23 = vpop.f32.mrf.mxu1  ;;  %v1566_v9 = vadd.f32 %v5157_v45, %v5107_v56 }
 0x228   : > { %2132 = vmatmul.bf16.gmra.mxu3 %v1946_v2  ;;  %v1564_v2 = vadd.f32 %v5140_v48, %v5107_v56 }
 0x229   : > { %v1881_v22 = vmax.f32 %v1803_v40, 0.0  ;;  %v1655_v40 = vadd.f32 %v5245_v46, %v1566_v9 }
 0x22a   : > { %1755 = vmatmul.bf16.gmra.mxu1 %v4777_v50  ;;  %v1648_v50 = vadd.f32 %v5211_v57, %v1559_v8 }
 0x22b   : > { %1844 = vmatmul.bf16.gmra.mxu2 %v5104_v42  ;;  %v5277_v47 = vpop.f32.mrf.mxu3  ;;  %v1939_v1 = vpack.c.bf16 %v1881_v22, %v1879_v26  ;;  %v1717_v42 = vadd.f32 %v1716_v23, %v5230_v61  ;;  %v1904_v22 = vmax.f32 %v1655_v40, 0.0 }
 0x22c   : > { %v1898_v53 = vmax.f32 %v1648_v50, 0.0 }
 0x22d   : > { %2201 = vmatmul.bf16.gmra.mxu0 %v1939_v1  ;;  %v5281_v25 = vpop.f32.mrf.mxu0 }
 0x22e   : > { %v1805_v6 = vpop.f32.mrf.mxu2  ;;  %v1948_v38 = vpack.c.bf16 %v1900_v17, %v1898_v53  ;;  %v1571_v53 = vadd.f32 %v5184_v31, %v5107_v56 }
 0x22f   : > { %v1718_v54 = vpop.f32.mrf.mxu1  ;;  %v1806_v5 = vadd.f32 %v1805_v6, %v1717_v42 }
 0x230   : > { %v1719_v63 = vadd.f32 %v1718_v54, %v5230_v61 }
 0x231   : > { %v1883_v39 = vmax.f32 %v1806_v5, 0.0 }
 0x233   : > { %v5288_v0 = vpop.f32.mrf.mxu3 }
 0x235   : > { %v5291_v15 = vpop.f32.mrf.mxu0 }
 0x236   : > { %v1807_v51 = vpop.f32.mrf.mxu2 }
 0x237   : > { %v1808_v34 = vadd.f32 %v1807_v51, %v1719_v63  ;;  %v1721_v36 = vpop.f32.mrf.mxu1  ;;  %v1569_v63 = vadd.f32 %v5170_v32, %v5107_v56  ;;  %v1660_v51 = vadd.f32 %v5263_v30, %v1571_v53 }
 0x238   : > { %2137 = vmatmul.bf16.gmra.mxu3 %v1948_v38 }
 0x239   : > { %v1885_v55 = vmax.f32 %v1808_v34, 0.0 }
 0x23a   : > { %1760 = vmatmul.bf16.gmra.mxu1 %v4998_v59  ;;  %v1653_v59 = vadd.f32 %v5237_v4, %v1564_v2 }
 0x23b   : > { %1849 = vmatmul.bf16.gmra.mxu2 %v5135_v10  ;;  %v5295_v57 = vpop.f32.mrf.mxu3  ;;  %v1941_v60 = vpack.c.bf16 %v1885_v55, %v1883_v39  ;;  %v1722_v10 = vadd.f32 %v1721_v36, %v5230_v61  ;;  %v1908_v36 = vmax.f32 %v1660_v51, 0.0 }
 0x23c   : > { %v1902_v41 = vmax.f32 %v1653_v59, 0.0 }
 0x23d   : > { %2206 = vmatmul.bf16.gmra.mxu0 %v1941_v60  ;;  %v5299_v19 = vpop.f32.mrf.mxu0 }
 0x23e   : > { %v1810_v23 = vpop.f32.mrf.mxu2  ;;  %v1950_v54 = vpack.c.bf16 %v1904_v22, %v1902_v41  ;;  %v1576_v22 = vadd.f32 %v5209_v3, %v5107_v56  ;;  %v1574_v41 = vadd.f32 %v5195_v43, %v5107_v56 }
 0x23f   : > { %v1723_v26 = vpop.f32.mrf.mxu1  ;;  %v1811_v8 = vadd.f32 %v1810_v23, %v1722_v10 }
 0x240   : > { %v1724_v45 = vadd.f32 %v1723_v26, %v5230_v61 }
 0x241   : > { %v1887_v46 = vmax.f32 %v1811_v8, 0.0  ;;  %v1665_v8 = vadd.f32 %v5281_v25, %v1576_v22 }
 0x243   : > { %v5306_v1 = vpop.f32.mrf.mxu3 }
 0x245   : > { %v5309_v16 = vpop.f32.mrf.mxu0 }
 0x246   : > { %v1812_v6 = vpop.f32.mrf.mxu2 }
 0x247   : > { %v1813_v48 = vadd.f32 %v1812_v6, %v1724_v45  ;;  %v1726_v50 = vpop.f32.mrf.mxu1 }
 0x248   : > { %2142 = vmatmul.bf16.gmra.mxu3 %v1950_v54  ;;  %v1912_v54 = vmax.f32 %v1665_v8, 0.0  ;;  %v1584_v8 = vadd.f32 %v5241_v21, %v5107_v56 }
 0x249   : > { %v1889_v17 = vmax.f32 %v1813_v48, 0.0 }
 0x24a   : > { %1765 = vmatmul.bf16.gmra.mxu1 %v5034_v20  ;;  %v1658_v20 = vadd.f32 %v5255_v49, %v1569_v63 }
 0x24b   : > { %v1943_v4 = vpack.c.bf16 %v1889_v17, %v1887_v46  ;;  %1854 = vmatmul.bf16.gmra.mxu2 %v5163_v11  ;;  %v5313_v42 = vpop.f32.mrf.mxu3  ;;  %v1727_v11 = vadd.f32 %v1726_v50, %v5230_v61 }
 0x24c   : > { %v1906_v55 = vmax.f32 %v1658_v20, 0.0 }
 0x24d   : > { %2211 = vmatmul.bf16.gmra.mxu0 %v1943_v4  ;;  %v5317_v5 = vpop.f32.mrf.mxu0 }
 0x24e   : > { %v1815_v38 = vpop.f32.mrf.mxu2  ;;  %v1952_v40 = vpack.c.bf16 %v1908_v36, %v1906_v55 }
 0x24f   : > { %v1728_v34 = vpop.f32.mrf.mxu1  ;;  %v1816_v60 = vadd.f32 %v1815_v38, %v1727_v11  ;;  %v1581_v38 = vadd.f32 %v5234_v44, %v5107_v56 }
 0x250   : > { %v1729_v31 = vadd.f32 %v1728_v34, %v5230_v61  ;;  %v1579_v34 = vadd.f32 %v5220_v33, %v5107_v56 }
 0x251   : > { %v1891_v30 = vmax.f32 %v1816_v60, 0.0  ;;  %v1670_v20 = vadd.f32 %v5299_v19, %v1581_v38 }
 0x253   : > { %v5324_v39 = vpop.f32.mrf.mxu3 }
 0x255   : > { %v5327_v9 = vpop.f32.mrf.mxu0 }
 0x256   : > { %v1817_v2 = vpop.f32.mrf.mxu2 }
 0x257   : > { %v1818_v32 = vadd.f32 %v1817_v2, %v1729_v31  ;;  %v1731_v23 = vpop.f32.mrf.mxu1  ;;  %v1916_v31 = vmax.f32 %v1670_v20, 0.0 }
 0x258   : > { %2147 = vmatmul.bf16.gmra.mxu3 %v1952_v40 }
 0x259   : > { %v1893_v26 = vmax.f32 %v1818_v32, 0.0 }
 0x25a   : > { %1770 = vmatmul.bf16.gmra.mxu1 %v5068_v28  ;;  %v1663_v28 = vadd.f32 %v5273_v62, %v1574_v41 }
 0x25b   : > { %v1945_v49 = vpack.c.bf16 %v1893_v26, %v1891_v30  ;;  %1859 = vmatmul.bf16.gmra.mxu2 %v5190_v52  ;;  %v5331_v59 = vpop.f32.mrf.mxu3  ;;  %v1732_v52 = vadd.f32 %v1731_v23, %v5230_v61 }
 0x25c   : > { %v1910_v48 = vmax.f32 %v1663_v28, 0.0 }
 0x25d   : > { %2216 = vmatmul.bf16.gmra.mxu0 %v1945_v49  ;;  %v5335_v10 = vpop.f32.mrf.mxu0 }
 0x25e   : > { %v1820_v45 = vpop.f32.mrf.mxu2  ;;  %v1954_v53 = vpack.c.bf16 %v1912_v54, %v1910_v48  ;;  %v1673_v54 = vadd.f32 %v5309_v16, %v1584_v8  ;;  %v6317_v16 = vld [vmem:[#allocation10_spill] sm:$0xff]  ;;  %v5407_v8 = vld [vmem:[%s4575_s18 + $0x28] sm:$0xff] }
 0x25f   : > { %v1733_v6 = vpop.f32.mrf.mxu1  ;;  %v1821_v50 = vadd.f32 %v1820_v45, %v1732_v52 }
 0x260   : > { %v1734_v46 = vadd.f32 %v1733_v6, %v5230_v61 }
 0x261   : > { %v1895_v25 = vmax.f32 %v1821_v50, 0.0 }
 0x263   : > { %v5343_v3 = vpop.f32.mrf.mxu3 }
 0x265   : > { %v5345_v17 = vpop.f32.mrf.mxu0 }
 0x266   : > { %v1822_v4 = vpop.f32.mrf.mxu2 }
 0x267   : > { %v1823_v43 = vadd.f32 %v1822_v4, %v1734_v46  ;;  %v1736_v63 = vpop.f32.mrf.mxu1  ;;  %v1918_v4 = vmax.f32 %v1673_v54, 0.0 }
 0x268   : > { %2152 = vmatmul.bf16.gmra.mxu3 %v1954_v53 }
 0x269   : > { %v1897_v51 = vmax.f32 %v1823_v43, 0.0 }
 0x26a   : > { %1775 = vmatmul.bf16.gmra.mxu1 %v5102_v13  ;;  %v1668_v13 = vadd.f32 %v5291_v15, %v1579_v34  ;;  %v1586_v15 = vadd.f32 %v5252_v37, %v5107_v56 }
 0x26b   : > { %v1947_v62 = vpack.c.bf16 %v1897_v51, %v1895_v25  ;;  %1864 = vmatmul.bf16.gmra.mxu2 %v5215_v18  ;;  %v5356_v55 = vpop.f32.mrf.mxu3  ;;  %v1737_v18 = vadd.f32 %v1736_v63, %v5230_v61  ;;  %v5378_v63 = vld [vmem:[%s4529_s27 + $0x10] sm:$0xff]  ;;  %v2104_v51 = vadd.f32 %v5313_v42, %v6317_v16  ;;  %v1589_v42 = vadd.f32 %v5259_v58, %v5107_v56 }
 0x26c   : > { %v1914_v2 = vmax.f32 %v1668_v13, 0.0  ;;  %v1675_v45 = vadd.f32 %v5317_v5, %v1586_v15  ;;  %v5383_v34 = vperm.slane %v5378_v63, 0  ;;  %v1591_v13 = vadd.f32 %v5270_v24, %v5107_v56 }
 0x26d   : > { %2221 = vmatmul.bf16.gmra.mxu0 %v1947_v62  ;;  %v5354_v36 = vpop.f32.mrf.mxu0  ;;  %v1678_v24 = vadd.f32 %v5327_v9, %v1589_v42  ;;  %v6320_v42 = vld [vmem:[#allocation13_spill] sm:$0xff] }
 0x26e   : > { %v1825_v11 = vpop.f32.mrf.mxu2  ;;  %v1956_v23 = vpack.c.bf16 %v1916_v31, %v1914_v2  ;;  %v1920_v52 = vmax.f32 %v1675_v45, 0.0  ;;  %v5388_v31 = vld [vmem:[%s4575_s18 + $0x10] sm:$0xff] }
 0x26f   : > { %v1738_v60 = vpop.f32.mrf.mxu1  ;;  %v1826_v40 = vadd.f32 %v1825_v11, %v1737_v18  ;;  %v1922_v15 = vmax.f32 %v1678_v24, 0.0 }
 0x270   : > { %v1739_v44 = vadd.f32 %v1738_v60, %v5230_v61  ;;  %v1958_v21 = vpack.c.bf16 %v1920_v52, %v1918_v4 }
 0x271   : > { %v1899_v26 = vmax.f32 %v1826_v40, 0.0  ;;  %v1680_v40 = vadd.f32 %v5335_v10, %v1591_v13 }
 0x273   : > { %v5363_v49 = vpop.f32.mrf.mxu3 }
 0x275   : > { %v5361_v19 = vpop.f32.mrf.mxu0 }
 0x276   : > { %v1827_v32 = vpop.f32.mrf.mxu2 }
 0x277   : > { %v1828_v33 = vadd.f32 %v1827_v32, %v1739_v44  ;;  %v1741_v30 = vpop.f32.mrf.mxu1 }
 0x278   : > { %2157 = vmatmul.bf16.gmra.mxu3 %v1956_v23  ;;  %v1742_v50 = vadd.f32 %v1741_v30, %v5230_v61 }
 0x279   : > { %v1901_v22 = vmax.f32 %v1828_v33, 0.0  ;;  %v6318_v33 = vld [vmem:[#allocation11_spill] sm:$0xff] }
 0x27a   : > { %v2106_v30 = vadd.f32 %v5324_v39, %v6318_v33 }
 0x27b   : > { %v1949_v41 = vpack.c.bf16 %v1901_v22, %v1899_v26  ;;  %v5374_v46 = vpop.f32.mrf.mxu3  ;;  %v1924_v22 = vmax.f32 %v1680_v40, 0.0  ;;  %v2111_v40 = vadd.f32 %v5343_v3, %v6320_v42  ;;  %v2273_v3 = vrot.slane %v5378_v63, 1 }
 0x27d   : > { %2226 = vmatmul.bf16.gmra.mxu0 %v1949_v41  ;;  %v5371_v48 = vpop.f32.mrf.mxu0 }
 0x27e   : > { %v1830_v6 = vpop.f32.mrf.mxu2 }
 0x27f   : > { %v1743_v28 = vpop.f32.mrf.mxu1  ;;  %v1831_v37 = vadd.f32 %v1830_v6, %v1742_v50 }
 0x280   : > { %v1744_v53 = vadd.f32 %v1743_v28, %v5230_v61  ;;  %v1960_v28 = vpack.c.bf16 %v1924_v22, %v1922_v15 }
 0x281   : > { %v1903_v62 = vmax.f32 %v1831_v37, 0.0  ;;  %v6319_v37 = vld [vmem:[#allocation12_spill] sm:$0xff] }
 0x283   : > { %v5390_v18 = vpop.f32.mrf.mxu3 }
 0x286   : > { %v1832_v43 = vpop.f32.mrf.mxu2 }
 0x287   : > { %v1833_v5 = vadd.f32 %v1832_v43, %v1744_v53  ;;  %v1746_v25 = vpop.f32.mrf.mxu1  ;;  %v2109_v53 = vadd.f32 %v5331_v59, %v6319_v37 }
 0x288   : > { %2162 = vmatmul.bf16.gmra.mxu3 %v1958_v21  ;;  %v1747_v58 = vadd.f32 %v1746_v25, %v5230_v61 }
 0x289   : > { %v1905_v38 = vmax.f32 %v1833_v5, 0.0 }
 0x28a   : > { %v2192_v20 = vpop.f32.mrf.mxu0 }
 0x28b   : > { %v1951_v11 = vpack.c.bf16 %v1905_v38, %v1903_v62  ;;  %v2193_v60 = vadd.f32 %v2192_v20, %v2104_v51  ;;  %v5411_v54 = vpop.f32.mrf.mxu3  ;;  %v1596_v51 = vadd.f32 %v5288_v0, %v5107_v56  ;;  %v5422_v62 = vld [vmem:[%s4575_s18 + $0x40] sm:$0xff]  ;;  %v1594_v20 = vadd.f32 %v5277_v47, %v5107_v56 }
 0x28d   : > { %v2296_v2 = vadd.f32 %v5383_v34, %v2193_v60  ;;  %2231 = vmatmul.bf16.gmra.mxu0 %v1951_v11  ;;  %v1685_v59 = vadd.f32 %v5354_v36, %v1596_v51  ;;  %v1683_v0 = vadd.f32 %v5345_v17, %v1594_v20 }
 0x28e   : > { %v1835_v44 = vpop.f32.mrf.mxu2 }
 0x28f   : > { %v1748_v32 = vpop.f32.mrf.mxu1  ;;  %v5397_v23 = vadd.f32 %v2296_v2, %v5388_v31  ;;  %v1836_v45 = vadd.f32 %v1835_v44, %v1747_v58  ;;  %v1928_v47 = vmax.f32 %v1685_v59, 0.0  ;;  %v1926_v33 = vmax.f32 %v1683_v0, 0.0 }
 0x290   : > { %v1749_v9 = vadd.f32 %v1748_v32, %v5230_v61 }
 0x291   : > { %2360 = vadd.xlane.f32.xlu0 %v5397_v23  ;;  %v2463_v26 = vmul.f32 %v5397_v23, %v5397_v23  ;;  %v1907_v43 = vmax.f32 %v1836_v45, 0.0  ;;  %v1962_v58 = vpack.c.bf16 %v1928_v47, %v1926_v33 }
 0x292   : > { %v2194_v41 = vpop.f32.mrf.mxu0 }
 0x293   : > { %v2195_v10 = vadd.f32 %v2194_v41, %v2106_v30  ;;  %2495 = vadd.xlane.f32.xlu2 %v2463_v26  ;;  %v5436_v44 = vpop.f32.mrf.mxu3  ;;  %v5441_v30 = vld [vmem:[%s4575_s18 + $0x58] sm:$0xff] }
 0x295   : > { %v2297_v6 = vadd.f32 %v5383_v34, %v2195_v10 }
 0x296   : > { %v1837_v39 = vpop.f32.mrf.mxu2 }
 0x297   : > { %v1838_v52 = vadd.f32 %v1837_v39, %v1749_v9  ;;  %v1751_v50 = vpop.f32.mrf.mxu1  ;;  %v5414_v4 = vadd.f32 %v2297_v6, %v5407_v8  ;;  %v6321_v6 = vld [vmem:[#allocation14_spill] sm:$0xff] }
 0x298   : > { %2167 = vmatmul.bf16.gmra.mxu3 %v1960_v28  ;;  %v1752_v32 = vadd.f32 %v1751_v50, %v5230_v61  ;;  %v2114_v39 = vadd.f32 %v5356_v55, %v6321_v6  ;;  %v1599_v55 = vadd.f32 %v5295_v57, %v5107_v56 }
 0x299   : > { %v1909_v21 = vmax.f32 %v1838_v52, 0.0  ;;  %2362 = vadd.xlane.f32.xlu0 %v5414_v4  ;;  %v2464_v2 = vmul.f32 %v5414_v4, %v5414_v4 }
 0x29a   : > { %v2197_v5 = vpop.f32.mrf.mxu0  ;;  %v1688_v59 = vadd.f32 %v5361_v19, %v1599_v55 }
 0x29b   : > { %v1953_v25 = vpack.c.bf16 %v1909_v21, %v1907_v43  ;;  %v2198_v16 = vadd.f32 %v2197_v5, %v2109_v53  ;;  %v5455_v53 = vpop.f32.mrf.mxu3  ;;  %v1601_v5 = vadd.f32 %v5306_v1, %v5107_v56 }
 0x29d   : > { %v2298_v38 = vadd.f32 %v5383_v34, %v2198_v16  ;;  %2236 = vmatmul.bf16.gmra.mxu0 %v1953_v25  ;;  %v1690_v16 = vadd.f32 %v5371_v48, %v1601_v5  ;;  %v1930_v48 = vmax.f32 %v1688_v59, 0.0 }
 0x29e   : > { %v1840_v11 = vpop.f32.mrf.mxu2 }
 0x29f   : > { %v1753_v60 = vpop.f32.mrf.mxu1  ;;  %v5429_v13 = vadd.f32 %v2298_v38, %v5422_v62  ;;  %v1841_v26 = vadd.f32 %v1840_v11, %v1752_v32  ;;  %v6322_v11 = vld [vmem:[#allocation15_spill] sm:$0xff] }
 0x2a0   : > { %v1754_v22 = vadd.f32 %v1753_v60, %v5230_v61  ;;  %v2116_v60 = vadd.f32 %v5363_v49, %v6322_v11 }
 0x2a1   : > { %2364 = vadd.xlane.f32.xlu1 %v5429_v13  ;;  %2497 = vadd.xlane.f32.xlu0 %v2464_v2  ;;  %v2465_v9 = vmul.f32 %v5429_v13, %v5429_v13  ;;  %v1911_v28 = vmax.f32 %v1841_v26, 0.0  ;;  %v1932_v2 = vmax.f32 %v1690_v16, 0.0  ;;  %v6323_v26 = vld [vmem:[#allocation16_spill] sm:$0xff] }
 0x2a2   : > { %v2199_v36 = vpop.f32.mrf.mxu0 }
 0x2a3   : > { %v2200_v24 = vadd.f32 %v2199_v36, %v2111_v40  ;;  %v5473_v42 = vpop.f32.mrf.mxu3  ;;  %v1964_v36 = vpack.c.bf16 %v1932_v2, %v1930_v48 }
 0x2a5   : > { %v2299_v17 = vadd.f32 %v5383_v34, %v2200_v24  ;;  %v2281_v34 = vperm.slane %v2273_v3, 0 }
 0x2a6   : > { %v1842_v41 = vpop.f32.mrf.mxu2 }
 0x2a7   : > { %v5447_v10 = vadd.f32 %v2299_v17, %v5441_v30  ;;  %v1843_v15 = vadd.f32 %v1842_v41, %v1754_v22  ;;  %v1756_v45 = vpop.f32.mrf.mxu1  ;;  %v2119_v22 = vadd.f32 %v5374_v46, %v6323_v26  ;;  %v6324_v46 = vld [vmem:[#allocation17_spill] sm:$0xff] }
 0x2a8   : > { %2172 = vmatmul.bf16.gmra.mxu3 %v1962_v58  ;;  %v1757_v56 = vadd.f32 %v1756_v45, %v5230_v61 }
 0x2a9   : > { %v1913_v52 = vmax.f32 %v1843_v15, 0.0  ;;  %2499 = vadd.xlane.f32.xlu1 %v2465_v9  ;;  %v2466_v50 = vmul.f32 %v5447_v10, %v5447_v10 }
 0x2aa   : > { %v2202_v37 = vpop.f32.mrf.mxu0 }
 0x2ab   : > { %v1955_v43 = vpack.c.bf16 %v1913_v52, %v1911_v28  ;;  %v2203_v21 = vadd.f32 %v2202_v37, %v2114_v39  ;;  %2501 = vadd.xlane.f32.xlu2 %v2466_v50  ;;  %v5484_v39 = vpop.f32.mrf.mxu3  ;;  %v2121_v50 = vadd.f32 %v5390_v18, %v6324_v46  ;;  %v6327_v46 = vld [vmem:[#allocation20_spill] sm:$0xff] }
 0x2ad   : > { %v2300_v25 = vadd.f32 %v2281_v34, %v2203_v21  ;;  %2241 = vmatmul.bf16.gmra.mxu0 %v1955_v43 }
 0x2ae   : > { %v1845_v51 = vpop.f32.mrf.mxu2 }
 0x2af   : > { %v5463_v38 = vadd.f32 %v2300_v25, %v5388_v31  ;;  %v1758_v20 = vpop.f32.mrf.mxu1  ;;  %v1846_v19 = vadd.f32 %v1845_v51, %v1757_v56  ;;  %v2274_v51 = vrot.slane %v5378_v63, 2 }
 0x2b0   : > { %v1759_v40 = vadd.f32 %v1758_v20, %v5230_v61 }
 0x2b1   : > { %2366 = vadd.xlane.f32.xlu1 %v5447_v10  ;;  %v2467_v1 = vmul.f32 %v5463_v38, %v5463_v38  ;;  %v1915_v17 = vmax.f32 %v1846_v19, 0.0 }
 0x2b2   : > { %v2204_v0 = vpop.f32.mrf.mxu0 }
 0x2b3   : > { %v2205_v57 = vadd.f32 %v2204_v0, %v2116_v60  ;;  %2503 = vadd.xlane.f32.xlu0 %v2467_v1  ;;  %2368 = vadd.xlane.f32.xlu2 %v5463_v38  ;;  %v6325_v60 = vld [vmem:[#allocation18_spill] sm:$0xff]  ;;  %v5502_v2 = vpop.f32.mrf.mxu3 }
 0x2b4   : > { %v2124_v1 = vadd.f32 %v5411_v54, %v6325_v60 }
 0x2b5   : > { %v2301_v49 = vadd.f32 %v2281_v34, %v2205_v57  ;;  %v2282_v57 = vperm.slane %v2274_v51, 0 }
 0x2b6   : > { %v1847_v47 = vpop.f32.mrf.mxu2 }
 0x2b7   : > { %v5477_v32 = vadd.f32 %v2301_v49, %v5407_v8  ;;  %v1848_v24 = vadd.f32 %v1847_v47, %v1759_v40  ;;  %v1761_v33 = vpop.f32.mrf.mxu1 }
 0x2b8   : > { %2177 = vmatmul.bf16.gmra.mxu3 %v1964_v36  ;;  %v1762_v21 = vadd.f32 %v1761_v33, %v5230_v61 }
 0x2b9   : > { %v1917_v3 = vmax.f32 %v1848_v24, 0.0  ;;  %v2468_v41 = vmul.f32 %v5477_v32, %v5477_v32  ;;  %v6326_v24 = vld [vmem:[#allocation19_spill] sm:$0xff] }
 0x2ba   : > { %v2207_v58 = vpop.f32.mrf.mxu0  ;;  %v2126_v33 = vadd.f32 %v5436_v44, %v6326_v24 }
 0x2bb   : > { %v1957_v15 = vpack.c.bf16 %v1917_v3, %v1915_v17  ;;  %v2208_v45 = vadd.f32 %v2207_v58, %v2119_v22  ;;  %2505 = vadd.xlane.f32.xlu1 %v2468_v41  ;;  %2370 = vadd.xlane.f32.xlu2 %v5477_v32  ;;  %v5515_v17 = vpop.f32.mrf.mxu3 }
 0x2bd   : > { %v2302_v9 = vadd.f32 %v2281_v34, %v2208_v45  ;;  %2246 = vmatmul.bf16.gmra.mxu0 %v1957_v15 }
 0x2be   : > { %v1850_v6 = vpop.f32.mrf.mxu2 }
 0x2bf   : > { %v1763_v28 = vpop.f32.mrf.mxu1  ;;  %v5487_v52 = vadd.f32 %v2302_v9, %v5422_v62  ;;  %v1851_v25 = vadd.f32 %v1850_v6, %v1762_v21 }
 0x2c0   : > { %v1764_v55 = vadd.f32 %v1763_v28, %v5230_v61 }
 0x2c1   : > { %2372 = vadd.xlane.f32.xlu0 %v5487_v52  ;;  %v2469_v37 = vmul.f32 %v5487_v52, %v5487_v52  ;;  %v1919_v0 = vmax.f32 %v1851_v25, 0.0 }
 0x2c2   : > { %v2209_v43 = vpop.f32.mrf.mxu0 }
 0x2c3   : > { %v2210_v5 = vadd.f32 %v2209_v43, %v2121_v50  ;;  %2507 = vadd.xlane.f32.xlu2 %v2469_v37  ;;  %v2129_v50 = vadd.f32 %v5455_v53, %v6327_v46  ;;  %v6328_v53 = vld [vmem:[#allocation21_spill] sm:$0xff] }
 0x2c4   : > { %v2131_v60 = vadd.f32 %v5473_v42, %v6328_v53 }
 0x2c5   : > { %v2303_v16 = vadd.f32 %v2281_v34, %v2210_v5 }
 0x2c6   : > { %v1852_v20 = vpop.f32.mrf.mxu2 }
 0x2c7   : > { %v1853_v59 = vadd.f32 %v1852_v20, %v1764_v55  ;;  %v1766_v11 = vpop.f32.mrf.mxu1  ;;  %v5498_v18 = vadd.f32 %v2303_v16, %v5441_v30  ;;  %v5527_v16 = vpop.f32.mrf.mxu3 }
 0x2c8   : > { %v1767_v3 = vadd.f32 %v1766_v11, %v5230_v61 }
 0x2c9   : > { %v1921_v56 = vmax.f32 %v1853_v59, 0.0  ;;  %2374 = vadd.xlane.f32.xlu1 %v5498_v18  ;;  %v2470_v34 = vmul.f32 %v5498_v18, %v5498_v18 }
 0x2ca   : > { %v2212_v48 = vpop.f32.mrf.mxu0 }
 0x2cb   : > { %v1959_v19 = vpack.c.bf16 %v1921_v56, %v1919_v0  ;;  %v2213_v40 = vadd.f32 %v2212_v48, %v2124_v1  ;;  %2509 = vadd.xlane.f32.xlu0 %v2470_v34  ;;  %v2275_v48 = vrot.slane %v5378_v63, 3 }
 0x2cd   : > { %v2304_v49 = vadd.f32 %v2282_v57, %v2213_v40  ;;  %2251 = vmatmul.bf16.gmra.mxu0 %v1959_v19 }
 0x2ce   : > { %v1855_v47 = vpop.f32.mrf.mxu2 }
 0x2cf   : > { %v1768_v36 = vpop.f32.mrf.mxu1  ;;  %v5508_v54 = vadd.f32 %v2304_v49, %v5388_v31  ;;  %v1856_v58 = vadd.f32 %v1855_v47, %v1767_v3  ;;  %v2283_v3 = vperm.slane %v2275_v48, 0  ;;  %v6331_v48 = vld [vmem:[#allocation24_spill] sm:$0xff] }
 0x2d0   : > { %v1769_v15 = vadd.f32 %v1768_v36, %v5230_v61  ;;  %v5540_v36 = vpop.f32.mrf.mxu3 }
 0x2d1   : > { %2376 = vadd.xlane.f32.xlu2 %v5508_v54  ;;  %v2471_v26 = vmul.f32 %v5508_v54, %v5508_v54  ;;  %v1923_v37 = vmax.f32 %v1856_v58, 0.0 }
 0x2d2   : > { %v2214_v22 = vpop.f32.mrf.mxu0 }
 0x2d3   : > { %v2215_v41 = vadd.f32 %v2214_v22, %v2126_v33  ;;  %2511 = vadd.xlane.f32.xlu1 %v2471_v26  ;;  %v6329_v33 = vld [vmem:[#allocation22_spill] sm:$0xff] }
 0x2d4   : > { %v2134_v26 = vadd.f32 %v5484_v39, %v6329_v33 }
 0x2d5   : > { %v2305_v45 = vadd.f32 %v2282_v57, %v2215_v41 }
 0x2d6   : > { %v1857_v9 = vpop.f32.mrf.mxu2 }
 0x2d7   : > { %v1858_v6 = vadd.f32 %v1857_v9, %v1769_v15  ;;  %v1771_v28 = vpop.f32.mrf.mxu1  ;;  %v5520_v44 = vadd.f32 %v2305_v45, %v5407_v8 }
 0x2d8   : > { %v1772_v56 = vadd.f32 %v1771_v28, %v5230_v61 }
 0x2d9   : > { %v1925_v43 = vmax.f32 %v1858_v6, 0.0  ;;  %2378 = vadd.xlane.f32.xlu0 %v5520_v44  ;;  %v2472_v21 = vmul.f32 %v5520_v44, %v5520_v44 }
 0x2da   : > { %v2217_v5 = vpop.f32.mrf.mxu0 }
 0x2db   : > { %v1961_v25 = vpack.c.bf16 %v1925_v43, %v1923_v37  ;;  %v2218_v55 = vadd.f32 %v2217_v5, %v2129_v50  ;;  %2513 = vadd.xlane.f32.xlu2 %v2472_v21  ;;  %v6330_v37 = vld [vmem:[#allocation23_spill] sm:$0xff]  ;;  %v5555_v21 = vpop.f32.mrf.mxu3 }
 0x2dc   : > { %v2136_v43 = vadd.f32 %v5502_v2, %v6330_v37 }
 0x2dd   : > { %v2306_v51 = vadd.f32 %v2282_v57, %v2218_v55  ;;  %2256 = vmatmul.bf16.gmra.mxu0 %v1961_v25 }
 0x2de   : > { %v1860_v20 = vpop.f32.mrf.mxu2 }
 0x2df   : > { %v1773_v59 = vpop.f32.mrf.mxu1  ;;  %v5530_v11 = vadd.f32 %v2306_v51, %v5422_v62  ;;  %v1861_v19 = vadd.f32 %v1860_v20, %v1772_v56 }
 0x2e0   : > { %v1774_v40 = vadd.f32 %v1773_v59, %v5230_v61 }
 0x2e1   : > { %2380 = vadd.xlane.f32.xlu1 %v5530_v11  ;;  %v2473_v1 = vmul.f32 %v5530_v11, %v5530_v11  ;;  %v1927_v41 = vmax.f32 %v1861_v19, 0.0  ;;  %v2139_v19 = vadd.f32 %v5515_v17, %v6331_v48  ;;  %v6332_v17 = vld [vmem:[#allocation25_spill] sm:$0xff] }
 0x2e2   : > { %v2219_v0 = vpop.f32.mrf.mxu0 }
 0x2e3   : > { %v2220_v34 = vadd.f32 %v2219_v0, %v2131_v60  ;;  %2515 = vadd.xlane.f32.xlu0 %v2473_v1 }
 0x2e5   : > { %v2307_v49 = vadd.f32 %v2282_v57, %v2220_v34  ;;  %v4095_v57 = vmov 128.0  }
 0x2e6   : > { %v1862_v47 = vpop.f32.mrf.mxu2  ;;  %3926 = vrcp.f32 %v4095_v57  ;;  %v2141_v57 = vadd.f32 %v5527_v16, %v6332_v17 }
 0x2e7   : > { %v1863_v42 = vadd.f32 %v1862_v47, %v1774_v40  ;;  %v5543_v24 = vadd.f32 %v2307_v49, %v5441_v30  ;;  %v1776_v22 = vpop.f32.mrf.mxu1 }
 0x2e8   : > { %v1777_v20 = vadd.f32 %v1776_v22, %v5230_v61 }
 0x2e9   : > { %v1929_v58 = vmax.f32 %v1863_v42, 0.0  ;;  %2382 = vadd.xlane.f32.xlu2 %v5543_v24  ;;  %v2474_v15 = vmul.f32 %v5543_v24, %v5543_v24 }
 0x2ea   : > { %v2222_v45 = vpop.f32.mrf.mxu0 }
 0x2eb   : > { %v1963_v9 = vpack.c.bf16 %v1929_v58, %v1927_v41  ;;  %v2223_v6 = vadd.f32 %v2222_v45, %v2134_v26  ;;  %2517 = vadd.xlane.f32.xlu1 %v2474_v15 }
 0x2ec   : > { %v3927_v50 = vpop.eup %3926 }
 0x2ed   : > { %v2308_v28 = vadd.f32 %v2283_v3, %v2223_v6  ;;  %2261 = vmatmul.bf16.gmra.mxu0 %v1963_v9  ;;  %v2425_v51 = vmul.f32 128.0, %v3927_v50  ;;  %vm2429_vm8 = vweird.f32 %v3927_v50 }
 0x2ee   : > { %v1865_v46 = vpop.f32.mrf.mxu2 }
 0x2ef   : > { %v5551_v39 = vadd.f32 %v2308_v28, %v5388_v31  ;;  %v1778_v25 = vpop.f32.mrf.mxu1  ;;  %v1866_v53 = vadd.f32 %v1865_v46, %v1777_v20  ;;  %v2426_v2 = vsub.f32 1.0, %v2425_v51  ;;  %v6333_v20 = vld [vmem:[#allocation26_spill] sm:$0xff] }
 0x2f0   : > { %v1779_v60 = vadd.f32 %v1778_v25, %v5230_v61  ;;  %v2148_v61 = vpop.f32.mrf.mxu3  ;;  %v2276_v25 = vrot.slane %v5378_v63, 4 }
 0x2f1   : > { %2384 = vadd.xlane.f32.xlu0 %v5551_v39  ;;  %v2475_v5 = vmul.f32 %v5551_v39, %v5551_v39  ;;  %v1931_v40 = vmax.f32 %v1866_v53, 0.0  ;;  %v2427_v33 = vmul.f32 %v3927_v50, %v2426_v2 }
 0x2f2   : > { %v2224_v55 = vpop.f32.mrf.mxu0 }
 0x2f3   : > { %v2225_v59 = vadd.f32 %v2224_v55, %v2136_v43  ;;  %2519 = vadd.xlane.f32.xlu2 %v2475_v5  ;;  %v2428_v58 = vadd.f32 %v3927_v50, %v2427_v33 }
 0x2f5   : > { %v2309_v1 = vadd.f32 %v2283_v3, %v2225_v59  ;;  %v5578_v6 = vsel %vm2429_vm8, %v3927_v50, %v2428_v58  ;;  %v2144_v59 = vadd.f32 %v5540_v36, %v6333_v20 }
 0x2f6   : > { %v1867_v0 = vpop.f32.mrf.mxu2 }
 0x2f7   : > { %v1868_v56 = vadd.f32 %v1867_v0, %v1779_v60  ;;  %v5563_v34 = vadd.f32 %v2309_v1, %v5407_v8 }
 0x2f8   : > { %v5580_v37 = vpop.f32.mrf.mxu3 }
 0x2f9   : > { %v1933_v49 = vmax.f32 %v1868_v56, 0.0  ;;  %2386 = vadd.xlane.f32.xlu1 %v5563_v34  ;;  %v2476_v47 = vmul.f32 %v5563_v34, %v5563_v34 }
 0x2fa   : > { %v2227_v42 = vpop.f32.mrf.mxu0 }
 0x2fb   : > { %v1965_v26 = vpack.c.bf16 %v1933_v49, %v1931_v40  ;;  %v2228_v22 = vadd.f32 %v2227_v42, %v2139_v19  ;;  %2521 = vadd.xlane.f32.xlu0 %v2476_v47  ;;  %v6334_v49 = vld [vmem:[#allocation27_spill] sm:$0xff] }
 0x2fc   : > { %v2146_v47 = vadd.f32 %v5555_v21, %v6334_v49 }
 0x2fd   : > { %v2310_v41 = vadd.f32 %v2283_v3, %v2228_v22  ;;  %2266 = vmatmul.bf16.gmra.mxu0 %v1965_v26 }
 0x2ff   : > { %v5571_v15 = vadd.f32 %v2310_v41, %v5422_v62 }
 0x300   : > { %v5600_v40 = vpop.f32.mrf.mxu3 }
 0x301   : > { %2388 = vadd.xlane.f32.xlu2 %v5571_v15  ;;  %v2477_v45 = vmul.f32 %v5571_v15, %v5571_v15 }
 0x302   : > { %v2229_v9 = vpop.f32.mrf.mxu0 }
 0x303   : > { %v2230_v28 = vadd.f32 %v2229_v9, %v2141_v57  ;;  %2523 = vadd.xlane.f32.xlu1 %v2477_v45 }
 0x304   : > { %v2361_v46 = vpop.xlane.xlu0 %2360 }
 0x305   : > { %v2311_v43 = vadd.f32 %v2283_v3, %v2230_v28  ;;  %v5583_v5 = vmul.f32 %v5578_v6, %v2361_v46  ;;  %v5595_v3 = vperm.slane %v2276_v25, 0  ;;  %v6335_v25 = vld [vmem:[#allocation28_spill] sm:$0xff] }
 0x306   : > { %v2496_v16 = vpop.xlane.xlu2 %2495 }
 0x307   : > { %v2591_v55 = vmul.f32 %v5583_v5, %v5583_v5  ;;  %v2559_v51 = vmul.f32 %v2496_v16, %v5578_v6  ;;  %v5590_v50 = vadd.f32 %v2311_v43, %v5441_v30  ;;  %v2149_v16 = vadd.f32 %v2148_v61, %v6335_v25 }
 0x309   : > { %v2623_v53 = vsub.f32 %v2559_v51, %v2591_v55  ;;  %2390 = vadd.xlane.f32.xlu0 %v5590_v50  ;;  %v2478_v60 = vmul.f32 %v5590_v50, %v5590_v50  ;;  %v5621_v55 = vpop.f32.mrf.mxu3 }
 0x30a   : > { %v2232_v1 = vpop.f32.mrf.mxu0 }
 0x30b   : > { %v2655_v0 = vmax.f32 %v2623_v53, 0.0  ;;  %v2233_v2 = vadd.f32 %v2232_v1, %v2144_v59  ;;  %2525 = vadd.xlane.f32.xlu2 %v2478_v60 }
 0x30c   : > { %v2363_v56 = vpop.xlane.xlu0 %2362 }
 0x30d   : > { %v2719_v48 = vadd.f32 1e-05, %v2655_v0  ;;  %v2312_v19 = vadd.f32 %v5595_v3, %v2233_v2  ;;  %v5608_v42 = vmul.f32 %v5578_v6, %v2363_v56 }
 0x30f   : > { %3928 = vrsqrt.f32 %v2719_v48  ;;  %v5603_v36 = vadd.f32 %v2312_v19, %v5388_v31  ;;  %v2592_v57 = vmul.f32 %v5608_v42, %v5608_v42  ;;  %vm2757_vm10 = vweird.f32 %v2719_v48 }
 0x311   : > { %2392 = vadd.xlane.f32.xlu1 %v5603_v36  ;;  %v2479_v26 = vmul.f32 %v5603_v36, %v5603_v36 }
 0x312   : > { %v2234_v33 = vpop.f32.mrf.mxu0 }
 0x313   : > { %v2235_v22 = vadd.f32 %v2234_v33, %v2146_v47  ;;  %2527 = vadd.xlane.f32.xlu0 %v2479_v26  ;;  %v2687_v26 = vsub.f32 %v5397_v23, %v5583_v5 }
 0x314   : > { %v2365_v41 = vpop.xlane.xlu1 %2364  ;;  %v2498_v58 = vpop.xlane.xlu0 %2497 }
 0x315   : > { %v3929_v17 = vpop.eup %3928  ;;  %v2313_v45 = vadd.f32 %v5595_v3, %v2235_v22  ;;  %v2560_v21 = vmul.f32 %v2498_v58, %v5578_v6  ;;  %v5624_v51 = vmul.f32 %v5578_v6, %v2365_v41  ;;  %v5642_v22 = vld [vmem:[%s6267_s7] ss:$0 sm:$0xff] }
 0x316   : > { %v2752_v9 = vmul.f32 %v3929_v17, %v2719_v48  ;;  %vm2758_vm9 = vweird.f32 %v3929_v17  ;;  %v5652_v48 = vld [vmem:[%s6268_s8] ss:$0 sm:$0xff] }
 0x317   : > { %v2624_v28 = vsub.f32 %v2560_v21, %v2592_v57  ;;  %v5618_v46 = vadd.f32 %v2313_v45, %v5407_v8  ;;  %v2593_v56 = vmul.f32 %v5624_v51, %v5624_v51  ;;  %vm2759_vm11 = vmor %vm2757_vm10, %vm2758_vm9  ;;  %v6336_v45 = vld [vmem:[#allocation29_spill] sm:$0xff] }
 0x318   : > { %v2753_v43 = vmul.f32 %v3929_v17, %v2752_v9  ;;  %v2151_v21 = vadd.f32 %v5580_v37, %v6336_v45 }
 0x319   : > { %v2656_v20 = vmax.f32 %v2624_v28, 0.0  ;;  %2394 = vadd.xlane.f32.xlu2 %v5618_v46  ;;  %v2480_v59 = vmul.f32 %v5618_v46, %v5618_v46 }
 0x31a   : > { %v2754_v53 = vmul.f32 0.5, %v2753_v43  ;;  %v2237_v60 = vpop.f32.mrf.mxu0 }
 0x31b   : > { %v5629_v1 = vadd.f32 1e-05, %v2656_v20  ;;  %v2238_v0 = vadd.f32 %v2237_v60, %v2149_v16  ;;  %2529 = vadd.xlane.f32.xlu1 %v2480_v59 }
 0x31c   : > { %v2755_v2 = vsub.f32 1.5, %v2754_v53  ;;  %v2500_v61 = vpop.xlane.xlu1 %2499 }
 0x31d   : > { %3930 = vrsqrt.f32 %v5629_v1  ;;  %v2314_v19 = vadd.f32 %v5595_v3, %v2238_v0  ;;  %v2561_v49 = vmul.f32 %v2500_v61, %v5578_v6  ;;  %v2277_v0 = vrot.slane %v5378_v63, 5 }
 0x31e   : > { %v2756_v47 = vmul.f32 %v3929_v17, %v2755_v2  ;;  %v2502_v33 = vpop.xlane.xlu2 %2501  ;;  %vm2767_vm13 = vweird.f32 %v5629_v1 }
 0x31f   : > { %v2625_v41 = vsub.f32 %v2561_v49, %v2593_v56  ;;  %v5645_v58 = vadd.f32 %v2314_v19, %v5422_v62 }
 0x320   : > { %v2760_v57 = vsel %vm2759_vm11, %v3929_v17, %v2756_v47  ;;  %v5659_v17 = vpop.f32.mrf.mxu3 }
 0x321   : > { %v3071_v23 = vmul.f32 %v2760_v57, %v2687_v26  ;;  %v2657_v5 = vmax.f32 %v2625_v41, 0.0  ;;  %2396 = vadd.xlane.f32.xlu0 %v5645_v58  ;;  %v2481_v9 = vmul.f32 %v5645_v58, %v5645_v58  ;;  %v6337_v26 = vld [vmem:[#allocation30_spill] sm:$0xff]  ;;  %v2562_v57 = vmul.f32 %v2502_v33, %v5578_v6 }
 0x322   : > { %v2239_v28 = vpop.f32.mrf.mxu0 }
 0x323   : > { %v3931_v43 = vpop.eup %3930  ;;  %v3107_v37 = vmul.f32 %v5642_v22, %v3071_v23  ;;  %v5662_v25 = vadd.f32 1e-05, %v2657_v5  ;;  %v2240_v16 = vadd.f32 %v2239_v28, %v2151_v21  ;;  %2531 = vadd.xlane.f32.xlu2 %v2481_v9  ;;  %v5690_v5 = vperm.slane %v2277_v0, 0 }
 0x324   : > { %v2762_v20 = vmul.f32 %v3931_v43, %v5629_v1  ;;  %v2367_v59 = vpop.xlane.xlu1 %2366  ;;  %vm2768_vm12 = vweird.f32 %v3931_v43  ;;  %v2688_v0 = vsub.f32 %v5414_v4, %v5608_v42 }
 0x325   : > { %v3143_v53 = vadd.f32 %v5652_v48, %v3107_v37  ;;  %3932 = vrsqrt.f32 %v5662_v25  ;;  %v2315_v60 = vadd.f32 %v5595_v3, %v2240_v16  ;;  %v5670_v61 = vmul.f32 %v5578_v6, %v2367_v59  ;;  %vm2769_vm14 = vmor %vm2767_vm13, %vm2768_vm12 }
 0x326   : > { %v2763_v2 = vmul.f32 %v3931_v43, %v2762_v20  ;;  %v2504_v56 = vpop.xlane.xlu0 %2503  ;;  %v2369_v19 = vpop.xlane.xlu2 %2368  ;;  %v2154_v3 = vadd.f32 %v5600_v40, %v6337_v26  ;;  %vm2777_vm0 = vweird.f32 %v5662_v25 }
 0x327   : > { %3175 = vst [vmem:[%s5672_s25] sm:$0xff] %v3143_v53  ;;  %v5676_v49 = vmul.f32 %v5578_v6, %v2369_v19  ;;  %v5679_v47 = vadd.f32 %v2315_v60, %v5441_v30  ;;  %v2594_v45 = vmul.f32 %v5670_v61, %v5670_v61  ;;  %v2563_v21 = vmul.f32 %v2504_v56, %v5578_v6 }
 0x328   : > { %v2764_v41 = vmul.f32 0.5, %v2763_v2  ;;  %v2160_v2 = vpop.f32.mrf.mxu3 }
 0x329   : > { %v2595_v23 = vmul.f32 %v5676_v49, %v5676_v49  ;;  %2398 = vadd.xlane.f32.xlu1 %v5679_v47  ;;  %v2482_v9 = vmul.f32 %v5679_v47, %v5679_v47  ;;  %v2626_v40 = vsub.f32 %v2562_v57, %v2594_v45 }
 0x32a   : > { %v2765_v28 = vsub.f32 1.5, %v2764_v41  ;;  %v2242_v37 = vpop.f32.mrf.mxu0 }
 0x32b   : > { %v3933_v33 = vpop.eup %3932  ;;  %v2627_v16 = vsub.f32 %v2563_v21, %v2595_v23  ;;  %v2243_v20 = vadd.f32 %v2242_v37, %v2154_v3  ;;  %2533 = vadd.xlane.f32.xlu0 %v2482_v9  ;;  %v2658_v60 = vmax.f32 %v2626_v40, 0.0  ;;  %v6338_v9 = vld [vmem:[#allocation31_spill] sm:$0xff] }
 0x32c   : > { %v2766_v59 = vmul.f32 %v3931_v43, %v2765_v28  ;;  %v2772_v53 = vmul.f32 %v3933_v33, %v5662_v25  ;;  %v2156_v28 = vadd.f32 %v5621_v55, %v6338_v9  ;;  %vm2778_vm15 = vweird.f32 %v3933_v33 }
 0x32d   : > { %v2659_v56 = vmax.f32 %v2627_v16, 0.0  ;;  %v2316_v19 = vadd.f32 %v5690_v5, %v2243_v20  ;;  %v5699_v57 = vadd.f32 1e-05, %v2658_v60  ;;  %vm2779_vm1 = vmor %vm2777_vm0, %vm2778_vm15 }
 0x32e   : > { %v2770_v26 = vsel %vm2769_vm14, %v3931_v43, %v2766_v59  ;;  %v2773_v41 = vmul.f32 %v3933_v33, %v2772_v53  ;;  %v2506_v3 = vpop.xlane.xlu1 %2505  ;;  %v2371_v45 = vpop.xlane.xlu2 %2370 }
 0x32f   : > { %v3072_v21 = vmul.f32 %v2770_v26, %v2688_v0  ;;  %v5701_v23 = vadd.f32 1e-05, %v2659_v56  ;;  %v5704_v1 = vmul.f32 %v5578_v6, %v2371_v45  ;;  %3934 = vrsqrt.f32 %v5699_v57 }
 0x330   : > { %v2774_v4 = vmul.f32 0.5, %v2773_v41  ;;  %v5710_v42 = vadd.f32 %v2316_v19, %v5388_v31  ;;  %v2564_v40 = vmul.f32 %v2506_v3, %v5578_v6  ;;  %v2689_v56 = vsub.f32 %v5429_v13, %v5624_v51 }
 0x331   : > { %v3108_v43 = vmul.f32 %v5642_v22, %v3072_v21  ;;  %3936 = vrsqrt.f32 %v5701_v23  ;;  %v2596_v37 = vmul.f32 %v5704_v1, %v5704_v1  ;;  %vm2787_vm4 = vweird.f32 %v5699_v57 }
 0x332   : > { %v2775_v16 = vsub.f32 1.5, %v2774_v4  ;;  %2400 = vadd.xlane.f32.xlu2 %v5710_v42  ;;  %v2244_v55 = vpop.f32.mrf.mxu0  ;;  %v2483_v20 = vmul.f32 %v5710_v42, %v5710_v42  ;;  %vm2797_vm6 = vweird.f32 %v5701_v23 }
 0x333   : > { %v3144_v31 = vadd.f32 %v5652_v48, %v3108_v43  ;;  %v2628_v59 = vsub.f32 %v2564_v40, %v2596_v37  ;;  %v2245_v53 = vadd.f32 %v2244_v55, %v2156_v28  ;;  %v5732_v43 = vpop.f32.mrf.mxu3  ;;  %v6339_v40 = vld [vmem:[#allocation32_spill] sm:$0xff] }
 0x334   : > { %v2776_v60 = vmul.f32 %v3933_v33, %v2775_v16  ;;  %2535 = vadd.xlane.f32.xlu1 %v2483_v20  ;;  %v2373_v0 = vpop.xlane.xlu0 %2372  ;;  %v2159_v37 = vadd.f32 %v5659_v17, %v6339_v40 }
 0x335   : > { %3176 = vst [vmem:[%s5672_s25 + $0x8] sm:$0xff] %v3144_v31  ;;  %v2660_v19 = vmax.f32 %v2628_v59, 0.0  ;;  %v5726_v26 = vmul.f32 %v5578_v6, %v2373_v0  ;;  %v3935_v41 = vpop.eup %3934  ;;  %v2317_v45 = vadd.f32 %v5690_v5, %v2245_v53 }
 0x336   : > { %v2780_v3 = vsel %vm2779_vm1, %v3933_v33, %v2776_v60  ;;  %v2782_v28 = vmul.f32 %v3935_v41, %v5699_v57  ;;  %v2508_v4 = vpop.xlane.xlu2 %2507  ;;  %vm2788_vm2 = vweird.f32 %v3935_v41 }
 0x337   : > { %v3937_v21 = vpop.eup %3936  ;;  %v3073_v9 = vmul.f32 %v2780_v3, %v2689_v56  ;;  %v5730_v25 = vadd.f32 1e-05, %v2660_v19  ;;  %v2597_v51 = vmul.f32 %v5726_v26, %v5726_v26  ;;  %v2565_v20 = vmul.f32 %v2508_v4, %v5578_v6  ;;  %v6340_v56 = vld [vmem:[#allocation33_spill] sm:$0xff]  ;;  %vm2789_vm5 = vmor %vm2787_vm4, %vm2788_vm2 }
 0x338   : > { %v2792_v13 = vmul.f32 %v3937_v21, %v5701_v23  ;;  %v2783_v16 = vmul.f32 %v3935_v41, %v2782_v28  ;;  %v5743_v31 = vadd.f32 %v2317_v45, %v5407_v8  ;;  %v2161_v19 = vadd.f32 %v2160_v2, %v6340_v56 }
 0x339   : > { %v3109_v33 = vmul.f32 %v5642_v22, %v3073_v9  ;;  %3938 = vrsqrt.f32 %v5730_v25  ;;  %v2629_v3 = vsub.f32 %v2565_v20, %v2597_v51  ;;  %vm2798_vm3 = vweird.f32 %v3937_v21 }
 0x33a   : > { %v2793_v55 = vmul.f32 %v3937_v21, %v2792_v13  ;;  %v2247_v59 = vpop.f32.mrf.mxu0  ;;  %v2784_v60 = vmul.f32 0.5, %v2783_v16  ;;  %2402 = vadd.xlane.f32.xlu0 %v5743_v31  ;;  %v2484_v9 = vmul.f32 %v5743_v31, %v5743_v31  ;;  %v2690_v13 = vsub.f32 %v5447_v10, %v5670_v61  ;;  %vm2799_vm7 = vmor %vm2797_vm6, %vm2798_vm3 }
 0x33b   : > { %v3145_v53 = vadd.f32 %v5652_v48, %v3109_v33  ;;  %v2248_v0 = vadd.f32 %v2247_v59, %v2159_v37  ;;  %v2661_v51 = vmax.f32 %v2629_v3, 0.0  ;;  %vm2807_vm9 = vweird.f32 %v5730_v25 }
 0x33c   : > { %v2794_v17 = vmul.f32 0.5, %v2793_v55  ;;  %v2375_v28 = vpop.xlane.xlu1 %2374  ;;  %v2785_v4 = vsub.f32 1.5, %v2784_v60  ;;  %2537 = vadd.xlane.f32.xlu2 %v2484_v9 }
 0x33d   : > { %3177 = vst [vmem:[%s5672_s25 + $0x10] sm:$0xff] %v3145_v53  ;;  %v2318_v8 = vadd.f32 %v5690_v5, %v2248_v0  ;;  %v5753_v45 = vmul.f32 %v5578_v6, %v2375_v28  ;;  %v5763_v61 = vadd.f32 1e-05, %v2661_v51  ;;  %v2691_v53 = vsub.f32 %v5463_v38, %v5676_v49  ;;  %v5771_v0 = vpop.f32.mrf.mxu3 }
 0x33e   : > { %v2795_v2 = vsub.f32 1.5, %v2794_v17  ;;  %v2510_v40 = vpop.xlane.xlu0 %2509  ;;  %v2786_v33 = vmul.f32 %v3935_v41, %v2785_v4 }
 0x33f   : > { %v3939_v37 = vpop.eup %3938  ;;  %v2598_v16 = vmul.f32 %v5753_v45, %v5753_v45  ;;  %v2566_v55 = vmul.f32 %v2510_v40, %v5578_v6  ;;  %v5769_v60 = vadd.f32 %v2318_v8, %v5422_v62  ;;  %3940 = vrsqrt.f32 %v5763_v61 }
 0x340   : > { %v2796_v20 = vmul.f32 %v3937_v21, %v2795_v2  ;;  %v2802_v10 = vmul.f32 %v3939_v37, %v5730_v25  ;;  %v2790_v59 = vsel %vm2789_vm5, %v3935_v41, %v2786_v33  ;;  %v2278_v8 = vrot.slane %v5378_v63, 6 }
 0x341   : > { %v2630_v57 = vsub.f32 %v2566_v55, %v2598_v16  ;;  %v3074_v56 = vmul.f32 %v2790_v59, %v2690_v13  ;;  %2404 = vadd.xlane.f32.xlu1 %v5769_v60  ;;  %v2485_v62 = vmul.f32 %v5769_v60, %v5769_v60  ;;  %vm2808_vm8 = vweird.f32 %v3939_v37  ;;  %v6341_v59 = vld [vmem:[#allocation34_spill] sm:$0xff] }
 0x342   : > { %v2800_v17 = vsel %vm2799_vm7, %v3937_v21, %v2796_v20  ;;  %v2803_v3 = vmul.f32 %v3939_v37, %v2802_v10  ;;  %v2249_v23 = vpop.f32.mrf.mxu0  ;;  %vm2809_vm10 = vmor %vm2807_vm9, %vm2808_vm8  ;;  %vm2817_vm12 = vweird.f32 %v5763_v61 }
 0x343   : > { %v3075_v9 = vmul.f32 %v2800_v17, %v2691_v53  ;;  %v2662_v28 = vmax.f32 %v2630_v57, 0.0  ;;  %v2250_v41 = vadd.f32 %v2249_v23, %v2161_v19  ;;  %v3110_v38 = vmul.f32 %v5642_v22, %v3074_v56  ;;  %2539 = vadd.xlane.f32.xlu0 %v2485_v62 }
 0x344   : > { %v2804_v49 = vmul.f32 0.5, %v2803_v3  ;;  %v2377_v4 = vpop.xlane.xlu2 %2376  ;;  %v2164_v53 = vadd.f32 %v5732_v43, %v6341_v59  ;;  %v2692_v57 = vsub.f32 %v5477_v32, %v5704_v1  ;;  %v5804_v17 = vperm.slane %v2278_v8, 0  ;;  %v5827_v59 = vld [vmem:[%s4575_s18 + $0x10] sm:$0xff] }
 0x345   : > { %v3111_v21 = vmul.f32 %v5642_v22, %v3075_v9  ;;  %v5780_v13 = vadd.f32 1e-05, %v2662_v28  ;;  %v2319_v2 = vadd.f32 %v5690_v5, %v2250_v41  ;;  %v5784_v51 = vmul.f32 %v5578_v6, %v2377_v4  ;;  %v3941_v55 = vpop.eup %3940  ;;  %v2168_v41 = vpop.f32.mrf.mxu3 }
 0x346   : > { %v3146_v19 = vadd.f32 %v5652_v48, %v3110_v38  ;;  %v2805_v40 = vsub.f32 1.5, %v2804_v49  ;;  %v2512_v33 = vpop.xlane.xlu1 %2511  ;;  %v2812_v56 = vmul.f32 %v3941_v55, %v5763_v61  ;;  %vm2818_vm11 = vweird.f32 %v3941_v55 }
 0x347   : > { %v3147_v16 = vadd.f32 %v5652_v48, %v3111_v21  ;;  %3942 = vrsqrt.f32 %v5780_v13  ;;  %v2599_v63 = vmul.f32 %v5784_v51, %v5784_v51  ;;  %v2567_v20 = vmul.f32 %v2512_v33, %v5578_v6  ;;  %vm2819_vm13 = vmor %vm2817_vm12, %vm2818_vm11 }
 0x348   : > { %3178 = vst [vmem:[%s5672_s25 + $0x18] sm:$0xff] %v3146_v19  ;;  %v2806_v5 = vmul.f32 %v3939_v37, %v2805_v40  ;;  %v5795_v10 = vadd.f32 %v2319_v2, %v5441_v30  ;;  %v2813_v43 = vmul.f32 %v3941_v55, %v2812_v56  ;;  %vm2827_vm15 = vweird.f32 %v5780_v13 }
 0x349   : > { %3179 = vst [vmem:[%s5672_s25 + $0x20] sm:$0xff] %v3147_v16  ;;  %v2631_v25 = vsub.f32 %v2567_v20, %v2599_v63 }
 0x34a   : > { %v2810_v3 = vsel %vm2809_vm10, %v3939_v37, %v2806_v5  ;;  %2406 = vadd.xlane.f32.xlu2 %v5795_v10  ;;  %v2252_v23 = vpop.f32.mrf.mxu0  ;;  %v2486_v30 = vmul.f32 %v5795_v10, %v5795_v10  ;;  %v2814_v62 = vmul.f32 0.5, %v2813_v43  ;;  %v2166_v5 = vadd.f32 %v5771_v0, %v5133_v27 }
 0x34b   : > { %v3076_v9 = vmul.f32 %v2810_v3, %v2692_v57  ;;  %v2253_v28 = vadd.f32 %v2252_v23, %v2164_v53  ;;  %v2663_v38 = vmax.f32 %v2631_v25, 0.0  ;;  %v2693_v57 = vsub.f32 %v5487_v52, %v5726_v26 }
 0x34c   : > { %2541 = vadd.xlane.f32.xlu1 %v2486_v30  ;;  %v2379_v32 = vpop.xlane.xlu0 %2378  ;;  %v2815_v40 = vsub.f32 1.5, %v2814_v62 }
 0x34d   : > { %v3943_v1 = vpop.eup %3942  ;;  %v3112_v49 = vmul.f32 %v5642_v22, %v3076_v9  ;;  %v2320_v37 = vadd.f32 %v5804_v17, %v2253_v28  ;;  %v5812_v4 = vmul.f32 %v5578_v6, %v2379_v32  ;;  %v5815_v21 = vadd.f32 1e-05, %v2663_v38  ;;  %v2170_v38 = vpop.f32.mrf.mxu3 }
 0x34e   : > { %v2822_v8 = vmul.f32 %v3943_v1, %v5780_v13  ;;  %v2514_v2 = vpop.xlane.xlu2 %2513  ;;  %v2816_v20 = vmul.f32 %v3941_v55, %v2815_v40  ;;  %vm2828_vm14 = vweird.f32 %v3943_v1 }
 0x34f   : > { %v3148_v19 = vadd.f32 %v5652_v48, %v3112_v49  ;;  %v2600_v33 = vmul.f32 %v5812_v4, %v5812_v4  ;;  %3944 = vrsqrt.f32 %v5815_v21  ;;  %v2568_v63 = vmul.f32 %v2514_v2, %v5578_v6  ;;  %vm2829_vm0 = vmor %vm2827_vm15, %vm2828_vm14 }
 0x350   : > { %v2823_v16 = vmul.f32 %v3943_v1, %v2822_v8  ;;  %v5830_v53 = vadd.f32 %v5827_v59, %v2320_v37  ;;  %v2820_v23 = vsel %vm2819_vm13, %v3941_v55, %v2816_v20  ;;  %v2694_v37 = vsub.f32 %v5498_v18, %v5753_v45  ;;  %v5855_v20 = vld [vmem:[%s4575_s18 + $0x28] sm:$0xff] }
 0x351   : > { %3180 = vst [vmem:[%s5672_s25 + $0x28] sm:$0xff] %v3148_v19  ;;  %v2632_v3 = vsub.f32 %v2568_v63, %v2600_v33  ;;  %v3077_v61 = vmul.f32 %v2820_v23, %v2693_v57  ;;  %v6342_v19 = vld [vmem:[#allocation35_spill] sm:$0xff]  ;;  %vm2837_vm2 = vweird.f32 %v5815_v21 }
 0x352   : > { %v2824_v56 = vmul.f32 0.5, %v2823_v16  ;;  %v2254_v25 = vpop.f32.mrf.mxu0  ;;  %2408 = vadd.xlane.f32.xlu0 %v5830_v53  ;;  %v2487_v0 = vmul.f32 %v5830_v53, %v5830_v53  ;;  %v2169_v40 = vadd.f32 %v2168_v41, %v6342_v19  ;;  %v5882_v19 = vld [vmem:[%s4575_s18 + $0x40] sm:$0xff] }
 0x353   : > { %v2255_v27 = vadd.f32 %v2254_v25, %v2166_v5  ;;  %v2664_v9 = vmax.f32 %v2632_v3, 0.0  ;;  %v3113_v55 = vmul.f32 %v5642_v22, %v3077_v61 }
 0x354   : > { %v2825_v30 = vsub.f32 1.5, %v2824_v56  ;;  %v2381_v43 = vpop.xlane.xlu1 %2380  ;;  %2543 = vadd.xlane.f32.xlu2 %v2487_v0 }
 0x355   : > { %v2321_v28 = vadd.f32 %v5804_v17, %v2255_v27  ;;  %v5839_v52 = vmul.f32 %v5578_v6, %v2381_v43  ;;  %v3945_v26 = vpop.eup %3944  ;;  %v5843_v49 = vadd.f32 1e-05, %v2664_v9  ;;  %v3149_v33 = vadd.f32 %v5652_v48, %v3113_v55 }
 0x356   : > { %v2826_v32 = vmul.f32 %v3943_v1, %v2825_v30  ;;  %v2516_v62 = vpop.xlane.xlu0 %2515  ;;  %v2832_v8 = vmul.f32 %v3945_v26, %v5815_v21  ;;  %vm2838_vm1 = vweird.f32 %v3945_v26  ;;  %v2171_v21 = vadd.f32 %v2170_v38, %v5161_v29  ;;  %v3995_v29 = vld [vmem:[%s4529_s27 + $0x10] sm:$0xff]  ;;  %s3208_s27 = scalar_lea.sflag [#allocation3], %s423_s17 }
 0x357   : > { %v2601_v2 = vmul.f32 %v5839_v52, %v5839_v52  ;;  %3946 = vrsqrt.f32 %v5843_v49  ;;  %v2569_v5 = vmul.f32 %v2516_v62, %v5578_v6  ;;  %v5858_v18 = vadd.f32 %v5855_v20, %v2321_v28  ;;  %3181 = vst [vmem:[%s5672_s25 + $0x30] sm:$0xff] %v3149_v33  ;;  %v2173_v62 = vpop.f32.mrf.mxu3  ;;  %vm2839_vm3 = vmor %vm2837_vm2, %vm2838_vm1 }
 0x358   : > { %v2830_v16 = vsel %vm2829_vm0, %v3943_v1, %v2826_v32  ;;  %v2833_v63 = vmul.f32 %v3945_v26, %v2832_v8  ;;  %vm2847_vm5 = vweird.f32 %v5843_v49 }
 0x359   : > { %v3078_v13 = vmul.f32 %v2830_v16, %v2694_v37  ;;  %v2633_v56 = vsub.f32 %v2569_v5, %v2601_v2  ;;  %2410 = vadd.xlane.f32.xlu1 %v5858_v18  ;;  %v2488_v3 = vmul.f32 %v5858_v18, %v5858_v18  ;;  %v2695_v37 = vsub.f32 %v5508_v54, %v5784_v51 }
 0x35a   : > { %v2257_v45 = vpop.f32.mrf.mxu0  ;;  %v2834_v41 = vmul.f32 0.5, %v2833_v63 }
 0x35b   : > { %v3114_v57 = vmul.f32 %v5642_v22, %v3078_v13  ;;  %v2258_v1 = vadd.f32 %v2257_v45, %v2169_v40  ;;  %v2665_v0 = vmax.f32 %v2633_v56, 0.0  ;;  %2545 = vadd.xlane.f32.xlu0 %v2488_v3 }
 0x35c   : > { %v2383_v25 = vpop.xlane.xlu2 %2382  ;;  %v2835_v27 = vsub.f32 1.5, %v2834_v41 }
 0x35d   : > { %v3150_v23 = vadd.f32 %v5652_v48, %v3114_v57  ;;  %v2322_v61 = vadd.f32 %v5804_v17, %v2258_v1  ;;  %v3947_v30 = vpop.eup %3946  ;;  %v5868_v9 = vmul.f32 %v5578_v6, %v2383_v25  ;;  %v5873_v32 = vadd.f32 1e-05, %v2665_v0 }
 0x35e   : > { %v2518_v43 = vpop.xlane.xlu1 %2517  ;;  %v2836_v28 = vmul.f32 %v3945_v26, %v2835_v27  ;;  %v2842_v55 = vmul.f32 %v3947_v30, %v5843_v49  ;;  %vm2848_vm4 = vweird.f32 %v3947_v30 }
 0x35f   : > { %3182 = vst [vmem:[%s5672_s25 + $0x38] sm:$0xff] %v3150_v23  ;;  %v2602_v8 = vmul.f32 %v5868_v9, %v5868_v9  ;;  %v2570_v2 = vmul.f32 %v2518_v43, %v5578_v6  ;;  %v5885_v40 = vadd.f32 %v5882_v19, %v2322_v61  ;;  %3948 = vrsqrt.f32 %v5873_v32  ;;  %vm2849_vm6 = vmor %vm2847_vm5, %vm2848_vm4 }
 0x360   : > { %v2840_v33 = vsel %vm2839_vm3, %v3945_v26, %v2836_v28  ;;  %v2843_v16 = vmul.f32 %v3947_v30, %v2842_v55  ;;  %v2279_v26 = vrot.slane %v3995_v29, 7  ;;  %v2696_v55 = vsub.f32 %v5520_v44, %v5812_v4 }
 0x361   : > { %v3079_v54 = vmul.f32 %v2840_v33, %v2695_v37  ;;  %v2634_v51 = vsub.f32 %v2570_v2, %v2602_v8  ;;  %2412 = vadd.xlane.f32.xlu2 %v5885_v40  ;;  %v2489_v63 = vmul.f32 %v5885_v40, %v5885_v40  ;;  %vm2857_vm8 = vweird.f32 %v5873_v32 }
 0x362   : > { %v2259_v13 = vpop.f32.mrf.mxu0  ;;  %v2844_v5 = vmul.f32 0.5, %v2843_v16  ;;  %v5917_v33 = vperm.slane %v2279_v26, 0  ;;  %v2175_v16 = vpop.f32.mrf.mxu3 }
 0x363   : > { %v2260_v45 = vadd.f32 %v2259_v13, %v2171_v21  ;;  %v3115_v57 = vmul.f32 %v5642_v22, %v3079_v54  ;;  %v2666_v41 = vmax.f32 %v2634_v51, 0.0  ;;  %2547 = vadd.xlane.f32.xlu1 %v2489_v63  ;;  %v5912_v21 = vld [vmem:[%s4575_s18 + $0x58] sm:$0xff]  ;;  %s4013_s18 = sshra.s32 %s3228_s19, 4  ;;  %s4014_s18 = int_to_ptr.hbm [resolvable:$true] %s4013_s18 }
 0x364   : > { %v2385_v56 = vpop.xlane.xlu0 %2384  ;;  %v2845_v38 = vsub.f32 1.5, %v2844_v5  ;;  %s4015_s26 = scalar_lea.hbm %s4014_s18, 256  ;;  %p4020_p5 = scmp.lt.s32.totalorder %s4014_s18, %s6269_s9 }
 0x365   : > { %v2323_v1 = vadd.f32 %v5804_v17, %v2260_v45  ;;  %v5896_v3 = vmul.f32 %v5578_v6, %v2385_v56  ;;  %v3151_v25 = vadd.f32 %v5652_v48, %v3115_v57  ;;  %v5899_v23 = vadd.f32 1e-05, %v2666_v41  ;;  %v3949_v0 = vpop.eup %3948  ;;  %p4016_p1 = scmp.ne.s32.totalorder %s4014_s18, %s4015_s26  ;;  %p4021_p6 = scmp.lt.s32.totalorder %s4019_s21, %s4015_s26 }
 0x366   : > { %v2520_v27 = vpop.xlane.xlu2 %2519  ;;  %v2846_v61 = vmul.f32 %v3947_v30, %v2845_v38  ;;  %v2174_v17 = vadd.f32 %v2173_v62, %v5179_v12  ;;  %v2852_v37 = vmul.f32 %v3949_v0, %v5873_v32  ;;  %vm2858_vm7 = vweird.f32 %v3949_v0 }
 0x367   : > { %v2603_v43 = vmul.f32 %v5896_v3, %v5896_v3  ;;  %v2571_v28 = vmul.f32 %v2520_v27, %v5578_v6  ;;  %3183 = vst [vmem:[%s5672_s25 + $0x40] sm:$0xff] %v3151_v25  ;;  %3950 = vrsqrt.f32 %v5899_v23  ;;  %v5915_v49 = vadd.f32 %v5912_v21, %v2323_v1  ;;  %vm2859_vm9 = vmor %vm2857_vm8, %vm2858_vm7  ;;  %p4017_p2 = pnand %p4016_p1, %p4199_p3  ;;  %p4022_p7 = por %p4021_p6, %p4020_p5 }
 0x368   : > { %v2850_v8 = vsel %vm2849_vm6, %v3947_v30, %v2846_v61  ;;  %v2853_v62 = vmul.f32 %v3949_v0, %v2852_v37  ;;  %v2176_v61 = vadd.f32 %v2175_v16, %v5188_v14  ;;  %vm2867_vm11 = vweird.f32 %v5899_v23 }
 0x369   : > { %v2635_v2 = vsub.f32 %v2571_v28, %v2603_v43  ;;  %v3080_v12 = vmul.f32 %v2850_v8, %v2696_v55  ;;  %2414 = vadd.xlane.f32.xlu0 %v5915_v49  ;;  %v2490_v4 = vmul.f32 %v5915_v49, %v5915_v49  ;;  %v2697_v43 = vsub.f32 %v5530_v11, %v5839_v52  ;;  %p4018_p4 = pneg %p4017_p2 }
 0x36a   : > { %v2262_v54 = vpop.f32.mrf.mxu0  ;;  %v2854_v13 = vmul.f32 0.5, %v2853_v62  ;;  %v2178_v14 = vpop.f32.mrf.mxu3 }
 0x36b   : > { %v2667_v51 = vmax.f32 %v2635_v2, 0.0  ;;  %v2263_v44 = vadd.f32 %v2262_v54, %v2174_v17  ;;  %v3116_v30 = vmul.f32 %v5642_v22, %v3080_v12  ;;  %2549 = vadd.xlane.f32.xlu2 %v2490_v4  ;;  %p4023_p9 = pnand %p4022_p7, %p4018_p4 }
 0x36c   : > { %v2387_v63 = vpop.xlane.xlu1 %2386  ;;  %v2855_v29 = vsub.f32 1.5, %v2854_v13 }
 0x36d   : > { %v5923_v5 = vadd.f32 1e-05, %v2667_v51  ;;  %v2324_v45 = vadd.f32 %v5917_v33, %v2263_v44  ;;  %v5927_v57 = vmul.f32 %v5578_v6, %v2387_v63  ;;  %v3951_v41 = vpop.eup %3950  ;;  %v3152_v56 = vadd.f32 %v5652_v48, %v3116_v30 }
 0x36e   : > { %v2522_v26 = vpop.xlane.xlu0 %2521  ;;  %v2862_v38 = vmul.f32 %v3951_v41, %v5899_v23  ;;  %v2856_v1 = vmul.f32 %v3949_v0, %v2855_v29  ;;  %vm2868_vm10 = vweird.f32 %v3951_v41 }
 0x36f   : > { %3952 = vrsqrt.f32 %v5923_v5  ;;  %3184 = vst [vmem:[%s5672_s25 + $0x48] sm:$0xff] %v3152_v56  ;;  %v2604_v25 = vmul.f32 %v5927_v57, %v5927_v57  ;;  %v2572_v27 = vmul.f32 %v2522_v26, %v5578_v6  ;;  %v5941_v17 = vadd.f32 %v5827_v59, %v2324_v45  ;;  %vm2869_vm12 = vmor %vm2867_vm11, %vm2868_vm10 }
 0x370   : > { %v2863_v28 = vmul.f32 %v3951_v41, %v2862_v38  ;;  %v2860_v55 = vsel %vm2859_vm9, %v3949_v0, %v2856_v1  ;;  %v2698_v56 = vsub.f32 %v5543_v24, %v5868_v9  ;;  %v2179_v38 = vadd.f32 %v2178_v14, %v5204_v7 }
 0x371   : > { %v2636_v37 = vsub.f32 %v2572_v27, %v2604_v25  ;;  %v3081_v2 = vmul.f32 %v2860_v55, %v2697_v43  ;;  %2416 = vadd.xlane.f32.xlu1 %v5941_v17  ;;  %v2491_v62 = vmul.f32 %v5941_v17, %v5941_v17  ;;  %vm2877_vm14 = vweird.f32 %v5923_v5 }
 0x372   : > { %v2264_v8 = vpop.f32.mrf.mxu0  ;;  %v2864_v32 = vmul.f32 0.5, %v2863_v28  ;;  %v2699_v14 = vsub.f32 %v5551_v39, %v5896_v3 }
 0x373   : > { %v2265_v12 = vadd.f32 %v2264_v8, %v2176_v61  ;;  %v2668_v16 = vmax.f32 %v2636_v37, 0.0  ;;  %v3117_v54 = vmul.f32 %v5642_v22, %v3081_v2  ;;  %2551 = vadd.xlane.f32.xlu0 %v2491_v62  ;;  %v2180_v8 = vpop.f32.mrf.mxu3 }
 0x374   : > { %v2389_v11 = vpop.xlane.xlu2 %2388  ;;  %v2865_v59 = vsub.f32 1.5, %v2864_v32 }
 0x375   : > { %v3953_v52 = vpop.eup %3952  ;;  %v2325_v0 = vadd.f32 %v5917_v33, %v2265_v12  ;;  %v5949_v51 = vmul.f32 %v5578_v6, %v2389_v11  ;;  %v5952_v4 = vadd.f32 1e-05, %v2668_v16  ;;  %v3153_v13 = vadd.f32 %v5652_v48, %v3117_v54 }
 0x376   : > { %v2872_v44 = vmul.f32 %v3953_v52, %v5923_v5  ;;  %v2524_v30 = vpop.xlane.xlu1 %2523  ;;  %v2866_v63 = vmul.f32 %v3951_v41, %v2865_v59  ;;  %vm2878_vm13 = vweird.f32 %v3953_v52  ;;  %v2181_v5 = vadd.f32 %v2180_v8, %v5213_v35 }
 0x377   : > { %v2605_v45 = vmul.f32 %v5949_v51, %v5949_v51  ;;  %3954 = vrsqrt.f32 %v5952_v4  ;;  %v2573_v26 = vmul.f32 %v2524_v30, %v5578_v6  ;;  %3185 = vst [vmem:[%s5672_s25 + $0x50] sm:$0xff] %v3153_v13  ;;  %v5966_v25 = vadd.f32 %v5855_v20, %v2325_v0  ;;  %vm2879_vm15 = vmor %vm2877_vm14, %vm2878_vm13 }
 0x378   : > { %v2873_v29 = vmul.f32 %v3953_v52, %v2872_v44  ;;  %v2870_v1 = vsel %vm2869_vm12, %v3951_v41, %v2866_v63  ;;  %vm2887_vm1 = vweird.f32 %v5952_v4 }
 0x379   : > { %v3082_v23 = vmul.f32 %v2870_v1, %v2698_v56  ;;  %v2637_v61 = vsub.f32 %v2573_v26, %v2605_v45  ;;  %2418 = vadd.xlane.f32.xlu2 %v5966_v25 }
 0x37a   : > { %v2874_v27 = vmul.f32 0.5, %v2873_v29  ;;  %v2267_v43 = vpop.f32.mrf.mxu0 }
 0x37b   : > { %v2268_v24 = vadd.f32 %v2267_v43, %v2179_v38  ;;  %v3118_v9 = vmul.f32 %v5642_v22, %v3082_v23  ;;  %v2669_v55 = vmax.f32 %v2637_v61, 0.0 }
 0x37c   : > { %v2875_v28 = vsub.f32 1.5, %v2874_v27  ;;  %v2391_v37 = vpop.xlane.xlu0 %2390 }
 0x37d   : > { %v2326_v7 = vadd.f32 %v5917_v33, %v2268_v24  ;;  %v5972_v41 = vmul.f32 %v5578_v6, %v2391_v37  ;;  %v3955_v20 = vpop.eup %3954  ;;  %v3154_v2 = vadd.f32 %v5652_v48, %v3118_v9  ;;  %v5976_v12 = vadd.f32 1e-05, %v2669_v55 }
 0x37e   : > { %v2876_v32 = vmul.f32 %v3953_v52, %v2875_v28  ;;  %v2526_v62 = vpop.xlane.xlu2 %2525  ;;  %v2882_v16 = vmul.f32 %v3955_v20, %v5952_v4  ;;  %vm2888_vm0 = vweird.f32 %v3955_v20 }
 0x37f   : > { %v2606_v11 = vmul.f32 %v5972_v41, %v5972_v41  ;;  %3186 = vst [vmem:[%s5672_s25 + $0x58] sm:$0xff] %v3154_v2  ;;  %3956 = vrsqrt.f32 %v5976_v12  ;;  %v2574_v59 = vmul.f32 %v2526_v62, %v5578_v6  ;;  %v5988_v30 = vadd.f32 %v5882_v19, %v2326_v7  ;;  %vm2889_vm2 = vmor %vm2887_vm1, %vm2888_vm0 }
 0x380   : > { %v2880_v54 = vsel %vm2879_vm15, %v3953_v52, %v2876_v32  ;;  %v2883_v44 = vmul.f32 %v3955_v20, %v2882_v16  ;;  %vm2897_vm4 = vweird.f32 %v5976_v12 }
 0x381   : > { %v3083_v0 = vmul.f32 %v2880_v54, %v2699_v14  ;;  %v2638_v39 = vsub.f32 %v2574_v59, %v2606_v11  ;;  %2420 = vadd.xlane.f32.xlu0 %v5988_v30  ;;  %v2493_v45 = vmul.f32 %v5988_v30, %v5988_v30  ;;  %v2492_v11 = vmul.f32 %v5966_v25, %v5966_v25 }
 0x382   : > { %v2269_v3 = vpop.f32.mrf.mxu0  ;;  %v2884_v63 = vmul.f32 0.5, %v2883_v44 }
 0x383   : > { %v3119_v13 = vmul.f32 %v5642_v22, %v3083_v0  ;;  %v2270_v52 = vadd.f32 %v2269_v3, %v2181_v5  ;;  %v2670_v56 = vmax.f32 %v2638_v39, 0.0  ;;  %2555 = vadd.xlane.f32.xlu2 %v2493_v45  ;;  %v2701_v0 = vsub.f32 %v5571_v15, %v5949_v51 }
 0x384   : > { %v2885_v29 = vsub.f32 1.5, %v2884_v63  ;;  %v2393_v26 = vpop.xlane.xlu1 %2392 }
 0x385   : > { %v3155_v35 = vadd.f32 %v5652_v48, %v3119_v13  ;;  %v2327_v19 = vadd.f32 %v5917_v33, %v2270_v52  ;;  %v3957_v38 = vpop.eup %3956  ;;  %v5996_v1 = vadd.f32 1e-05, %v2670_v56  ;;  %v5999_v23 = vmul.f32 %v5578_v6, %v2393_v26 }
 0x386   : > { %v2886_v27 = vmul.f32 %v3955_v20, %v2885_v29  ;;  %v2892_v61 = vmul.f32 %v3957_v38, %v5976_v12  ;;  %v2528_v43 = vpop.xlane.xlu0 %2527  ;;  %v2700_v33 = vsub.f32 %v5563_v34, %v5927_v57  ;;  %vm2898_vm3 = vweird.f32 %v3957_v38 }
 0x387   : > { %3187 = vst [vmem:[%s5672_s25 + $0x60] sm:$0xff] %v3155_v35  ;;  %v6005_v24 = vadd.f32 %v5912_v21, %v2327_v19  ;;  %3958 = vrsqrt.f32 %v5996_v1  ;;  %v2607_v9 = vmul.f32 %v5999_v23, %v5999_v23  ;;  %v2575_v37 = vmul.f32 %v2528_v43, %v5578_v6  ;;  %vm2899_vm5 = vmor %vm2897_vm4, %vm2898_vm3 }
 0x388   : > { %v2890_v28 = vsel %vm2889_vm2, %v3955_v20, %v2886_v27  ;;  %v2893_v55 = vmul.f32 %v3957_v38, %v2892_v61  ;;  %vm2907_vm7 = vweird.f32 %v5996_v1 }
 0x389   : > { %2422 = vadd.xlane.f32.xlu1 %v6005_v24  ;;  %v2494_v4 = vmul.f32 %v6005_v24, %v6005_v24  ;;  %v3084_v21 = vmul.f32 %v2890_v28, %v2700_v33  ;;  %v2639_v8 = vsub.f32 %v2575_v37, %v2607_v9  ;;  %v2702_v33 = vsub.f32 %v5590_v50, %v5972_v41 }
 0x38a   : > { %v2894_v7 = vmul.f32 0.5, %v2893_v55 }
 0x38b   : > { %2557 = vadd.xlane.f32.xlu0 %v2494_v4  ;;  %v3120_v34 = vmul.f32 %v5642_v22, %v3084_v21  ;;  %v2671_v32 = vmax.f32 %v2639_v8, 0.0 }
 0x38c   : > { %v2395_v57 = vpop.xlane.xlu2 %2394  ;;  %v2895_v2 = vsub.f32 1.5, %v2894_v7 }
 0x38d   : > { %v6018_v20 = vmul.f32 %v5578_v6, %v2395_v57  ;;  %v3959_v62 = vpop.eup %3958  ;;  %v3156_v14 = vadd.f32 %v5652_v48, %v3120_v34  ;;  %v2735_v5 = vadd.f32 1e-05, %v2671_v32 }
 0x38e   : > { %v2530_v16 = vpop.xlane.xlu1 %2529  ;;  %v2896_v54 = vmul.f32 %v3957_v38, %v2895_v2  ;;  %v2902_v59 = vmul.f32 %v3959_v62, %v5996_v1  ;;  %vm2908_vm6 = vweird.f32 %v3959_v62 }
 0x38f   : > { %3188 = vst [vmem:[%s5672_s25 + $0x68] sm:$0xff] %v3156_v14  ;;  %v2608_v44 = vmul.f32 %v6018_v20, %v6018_v20  ;;  %v2576_v39 = vmul.f32 %v2530_v16, %v5578_v6  ;;  %3960 = vrsqrt.f32 %v2735_v5  ;;  %vm2909_vm8 = vmor %vm2907_vm7, %vm2908_vm6  ;;  %vm2917_vm10 = vweird.f32 %v2735_v5 }
 0x390   : > { %v2900_v3 = vsel %vm2899_vm5, %v3957_v38, %v2896_v54  ;;  %v2903_v13 = vmul.f32 %v3959_v62, %v2902_v59 }
 0x391   : > { %2553 = vadd.xlane.f32.xlu1 %v2492_v11  ;;  %v3085_v63 = vmul.f32 %v2900_v3, %v2701_v0  ;;  %v2640_v52 = vsub.f32 %v2576_v39, %v2608_v44  ;;  %v2703_v11 = vsub.f32 %v5603_v36, %v5999_v23 }
 0x392   : > { %v2904_v12 = vmul.f32 0.5, %v2903_v13 }
 0x393   : > { %v3121_v45 = vmul.f32 %v5642_v22, %v3085_v63  ;;  %v2672_v56 = vmax.f32 %v2640_v52, 0.0 }
 0x394   : > { %v2397_v35 = vpop.xlane.xlu0 %2396  ;;  %v2905_v29 = vsub.f32 1.5, %v2904_v12 }
 0x395   : > { %v6033_v15 = vmul.f32 %v5578_v6, %v2397_v35  ;;  %v3157_v51 = vadd.f32 %v5652_v48, %v3121_v45  ;;  %v2736_v19 = vadd.f32 1e-05, %v2672_v56  ;;  %v3961_v38 = vpop.eup %3960  ;;  %v6066_v45 = vld [vmem:[%s6268_s8] ss:$0 sm:$0xff] }
 0x396   : > { %v2532_v26 = vpop.xlane.xlu2 %2531  ;;  %v2906_v27 = vmul.f32 %v3959_v62, %v2905_v29  ;;  %v2912_v9 = vmul.f32 %v3961_v38, %v2735_v5  ;;  %vm2918_vm9 = vweird.f32 %v3961_v38  ;;  %v6057_v5 = vld [vmem:[%s6267_s7] ss:$0 sm:$0xff] }
 0x397   : > { %v2609_v61 = vmul.f32 %v6033_v15, %v6033_v15  ;;  %v2577_v43 = vmul.f32 %v2532_v26, %v5578_v6  ;;  %3189 = vst [vmem:[%s5672_s25 + $0x70] sm:$0xff] %v3157_v51  ;;  %3962 = vrsqrt.f32 %v2736_v19  ;;  %vm2919_vm11 = vmor %vm2917_vm10, %vm2918_vm9  ;;  %vm2927_vm13 = vweird.f32 %v2736_v19 }
 0x398   : > { %v2910_v28 = vsel %vm2909_vm8, %v3959_v62, %v2906_v27  ;;  %v2913_v4 = vmul.f32 %v3961_v38, %v2912_v9  ;;  %v2704_v51 = vsub.f32 %v5618_v46, %v6018_v20 }
 0x399   : > { %v2641_v55 = vsub.f32 %v2577_v43, %v2609_v61  ;;  %v3086_v37 = vmul.f32 %v2910_v28, %v2702_v33 }
 0x39a   : > { %v2914_v7 = vmul.f32 0.5, %v2913_v4  ;;  %v2705_v4 = vsub.f32 %v5645_v58, %v6033_v15 }
 0x39b   : > { %v2673_v21 = vmax.f32 %v2641_v55, 0.0  ;;  %v3122_v1 = vmul.f32 %v5642_v22, %v3086_v37 }
 0x39c   : > { %v2399_v8 = vpop.xlane.xlu1 %2398  ;;  %v2915_v41 = vsub.f32 1.5, %v2914_v7 }
 0x39d   : > { %v2737_v34 = vadd.f32 1e-05, %v2673_v21  ;;  %v6045_v57 = vmul.f32 %v5578_v6, %v2399_v8  ;;  %v3963_v2 = vpop.eup %3962  ;;  %v3158_v50 = vadd.f32 %v5652_v48, %v3122_v1 }
 0x39e   : > { %v2534_v32 = vpop.xlane.xlu0 %2533  ;;  %v2922_v62 = vmul.f32 %v3963_v2, %v2736_v19  ;;  %v2916_v14 = vmul.f32 %v3961_v38, %v2915_v41  ;;  %vm2928_vm12 = vweird.f32 %v3963_v2 }
 0x39f   : > { %3964 = vrsqrt.f32 %v2737_v34  ;;  %3190 = vst [vmem:[%s5672_s25 + $0x78] sm:$0xff] %v3158_v50  ;;  %v2610_v22 = vmul.f32 %v6045_v57, %v6045_v57  ;;  %v2578_v16 = vmul.f32 %v2534_v32, %v5578_v6  ;;  %vm2929_vm14 = vmor %vm2927_vm13, %vm2928_vm12  ;;  %vm2937_vm0 = vweird.f32 %v2737_v34 }
 0x3a0   : > { %v2923_v54 = vmul.f32 %v3963_v2, %v2922_v62  ;;  %v2920_v59 = vsel %vm2919_vm11, %v3961_v38, %v2916_v14 }
 0x3a1   : > { %v2642_v48 = vsub.f32 %v2578_v16, %v2610_v22  ;;  %v3087_v0 = vmul.f32 %v2920_v59, %v2703_v11 }
 0x3a2   : > { %v2924_v44 = vmul.f32 0.5, %v2923_v54 }
 0x3a3   : > { %v2674_v39 = vmax.f32 %v2642_v48, 0.0  ;;  %v3123_v13 = vmul.f32 %v6057_v5, %v3087_v0 }
 0x3a4   : > { %v2925_v63 = vsub.f32 1.5, %v2924_v44  ;;  %v2706_v44 = vsub.f32 %v5679_v47, %v6045_v57 }
 0x3a5   : > { %v3965_v3 = vpop.eup %3964  ;;  %v2401_v52 = vpop.xlane.xlu2 %2400  ;;  %v2738_v23 = vadd.f32 1e-05, %v2674_v39  ;;  %v3159_v56 = vadd.f32 %v6066_v45, %v3123_v13 }
 0x3a6   : > { %v2932_v36 = vmul.f32 %v3965_v3, %v2737_v34  ;;  %v6061_v12 = vmul.f32 %v5578_v6, %v2401_v52  ;;  %v2926_v35 = vmul.f32 %v3963_v2, %v2925_v63  ;;  %vm2938_vm15 = vweird.f32 %v3965_v3 }
 0x3a7   : > { %v2536_v29 = vpop.xlane.xlu1 %2535  ;;  %3966 = vrsqrt.f32 %v2738_v23  ;;  %3191 = vst [vmem:[%s5672_s25 + $0x80] sm:$0xff] %v3159_v56  ;;  %vm2939_vm1 = vmor %vm2937_vm0, %vm2938_vm15  ;;  %vm2947_vm3 = vweird.f32 %v2738_v23 }
 0x3a8   : > { %v2933_v26 = vmul.f32 %v3965_v3, %v2932_v36  ;;  %v2611_v38 = vmul.f32 %v6061_v12, %v6061_v12  ;;  %v2930_v27 = vsel %vm2929_vm14, %v3963_v2, %v2926_v35  ;;  %v2579_v61 = vmul.f32 %v2536_v29, %v5578_v6 }
 0x3a9   : > { %v3088_v43 = vmul.f32 %v2930_v27, %v2704_v51 }
 0x3aa   : > { %v2934_v33 = vmul.f32 0.5, %v2933_v26  ;;  %v2643_v9 = vsub.f32 %v2579_v61, %v2611_v38 }
 0x3ab   : > { %v3124_v19 = vmul.f32 %v6057_v5, %v3088_v43 }
 0x3ac   : > { %v2935_v28 = vsub.f32 1.5, %v2934_v33  ;;  %v2675_v55 = vmax.f32 %v2643_v9, 0.0 }
 0x3ad   : > { %v3967_v46 = vpop.eup %3966  ;;  %v3160_v20 = vadd.f32 %v6066_v45, %v3124_v19  ;;  %v2403_v7 = vpop.xlane.xlu0 %2402 }
 0x3ae   : > { %v2936_v37 = vmul.f32 %v3965_v3, %v2935_v28  ;;  %v2942_v21 = vmul.f32 %v3967_v46, %v2738_v23  ;;  %v2739_v1 = vadd.f32 1e-05, %v2675_v55  ;;  %v6081_v2 = vmul.f32 %v5578_v6, %v2403_v7 }
 0x3af   : > { %3192 = vst [vmem:[%s5672_s25 + $0x88] sm:$0xff] %v3160_v20  ;;  %v2538_v32 = vpop.xlane.xlu2 %2537  ;;  %vm2948_vm2 = vweird.f32 %v3967_v46  ;;  %v2707_v28 = vsub.f32 %v5710_v42, %v6061_v12 }
 0x3b0   : > { %v2940_v8 = vsel %vm2939_vm1, %v3965_v3, %v2936_v37  ;;  %v2943_v41 = vmul.f32 %v3967_v46, %v2942_v21  ;;  %3968 = vrsqrt.f32 %v2739_v1  ;;  %v2612_v34 = vmul.f32 %v6081_v2, %v6081_v2  ;;  %vm2949_vm4 = vmor %vm2947_vm3, %vm2948_vm2 }
 0x3b1   : > { %v3089_v50 = vmul.f32 %v2940_v8, %v2705_v4  ;;  %v2580_v62 = vmul.f32 %v2538_v32, %v5578_v6  ;;  %vm2957_vm6 = vweird.f32 %v2739_v1 }
 0x3b2   : > { %v2944_v15 = vmul.f32 0.5, %v2943_v41 }
 0x3b3   : > { %v3125_v58 = vmul.f32 %v6057_v5, %v3089_v50  ;;  %v2644_v14 = vsub.f32 %v2580_v62, %v2612_v34 }
 0x3b4   : > { %v2945_v16 = vsub.f32 1.5, %v2944_v15  ;;  %v2405_v54 = vpop.xlane.xlu1 %2404 }
 0x3b5   : > { %v3161_v22 = vadd.f32 %v6066_v45, %v3125_v58  ;;  %v2676_v11 = vmax.f32 %v2644_v14, 0.0  ;;  %v6090_v0 = vmul.f32 %v5578_v6, %v2405_v54 }
 0x3b6   : > { %v3969_v59 = vpop.eup %3968  ;;  %v2946_v48 = vmul.f32 %v3967_v46, %v2945_v16  ;;  %v2540_v52 = vpop.xlane.xlu0 %2539 }
 0x3b7   : > { %3193 = vst [vmem:[%s5672_s25 + $0x90] sm:$0xff] %v3161_v22  ;;  %v2952_v39 = vmul.f32 %v3969_v59, %v2739_v1  ;;  %v2740_v3 = vadd.f32 1e-05, %v2676_v11  ;;  %v2613_v63 = vmul.f32 %v6090_v0, %v6090_v0  ;;  %v2581_v23 = vmul.f32 %v2540_v52, %v5578_v6 }
 0x3b8   : > { %v2950_v13 = vsel %vm2949_vm4, %v3967_v46, %v2946_v48  ;;  %vm2958_vm5 = vweird.f32 %v3969_v59  ;;  %v2708_v22 = vsub.f32 %v5743_v31, %v6081_v2 }
 0x3b9   : > { %v3090_v36 = vmul.f32 %v2950_v13, %v2706_v44  ;;  %v2953_v56 = vmul.f32 %v3969_v59, %v2952_v39  ;;  %3970 = vrsqrt.f32 %v2740_v3  ;;  %v2645_v51 = vsub.f32 %v2581_v23, %v2613_v63  ;;  %vm2959_vm7 = vmor %vm2957_vm6, %vm2958_vm5 }
 0x3ba   : > { %vm2967_vm9 = vweird.f32 %v2740_v3 }
 0x3bb   : > { %v3126_v35 = vmul.f32 %v6057_v5, %v3090_v36  ;;  %v2954_v29 = vmul.f32 0.5, %v2953_v56  ;;  %v2677_v27 = vmax.f32 %v2645_v51, 0.0 }
 0x3bd   : > { %v2407_v26 = vpop.xlane.xlu2 %2406  ;;  %v3162_v47 = vadd.f32 %v6066_v45, %v3126_v35  ;;  %v2955_v57 = vsub.f32 1.5, %v2954_v29  ;;  %v2741_v46 = vadd.f32 1e-05, %v2677_v27 }
 0x3be   : > { %v6100_v38 = vmul.f32 %v5578_v6, %v2407_v26 }
 0x3bf   : > { %v2542_v61 = vpop.xlane.xlu1 %2541  ;;  %v3971_v43 = vpop.eup %3970  ;;  %3194 = vst [vmem:[%s5672_s25 + $0x98] sm:$0xff] %v3162_v47  ;;  %v2956_v33 = vmul.f32 %v3969_v59, %v2955_v57  ;;  %3972 = vrsqrt.f32 %v2741_v46  ;;  %vm2977_vm12 = vweird.f32 %v2741_v46  ;;  %v2709_v47 = vsub.f32 %v5769_v60, %v6090_v0 }
 0x3c0   : > { %v2614_v9 = vmul.f32 %v6100_v38, %v6100_v38  ;;  %v2582_v19 = vmul.f32 %v2542_v61, %v5578_v6  ;;  %v2962_v55 = vmul.f32 %v3971_v43, %v2740_v3  ;;  %vm2968_vm8 = vweird.f32 %v3971_v43 }
 0x3c1   : > { %v2960_v20 = vsel %vm2959_vm7, %v3969_v59, %v2956_v33  ;;  %vm2969_vm10 = vmor %vm2967_vm9, %vm2968_vm8  ;;  %v2710_v60 = vsub.f32 %v5795_v10, %v6100_v38 }
 0x3c2   : > { %v2646_v37 = vsub.f32 %v2582_v19, %v2614_v9  ;;  %v3091_v4 = vmul.f32 %v2960_v20, %v2707_v28  ;;  %v2963_v21 = vmul.f32 %v3971_v43, %v2962_v55 }
 0x3c4   : > { %v2678_v7 = vmax.f32 %v2646_v37, 0.0  ;;  %v3127_v1 = vmul.f32 %v6057_v5, %v3091_v4  ;;  %v2964_v8 = vmul.f32 0.5, %v2963_v21 }
 0x3c5   : > { %v2409_v41 = vpop.xlane.xlu0 %2408  ;;  %v3973_v62 = vpop.eup %3972 }
 0x3c6   : > { %v2742_v50 = vadd.f32 1e-05, %v2678_v7  ;;  %v3163_v32 = vadd.f32 %v6066_v45, %v3127_v1  ;;  %v2965_v34 = vsub.f32 1.5, %v2964_v8  ;;  %v6111_v42 = vmul.f32 %v5578_v6, %v2409_v41 }
 0x3c7   : > { %v2544_v12 = vpop.xlane.xlu2 %2543  ;;  %v2972_v16 = vmul.f32 %v3973_v62, %v2741_v46  ;;  %vm2978_vm11 = vweird.f32 %v3973_v62 }
 0x3c8   : > { %3974 = vrsqrt.f32 %v2742_v50  ;;  %3195 = vst [vmem:[%s5672_s25 + $0xa0] sm:$0xff] %v3163_v32  ;;  %v2966_v58 = vmul.f32 %v3971_v43, %v2965_v34  ;;  %v2615_v15 = vmul.f32 %v6111_v42, %v6111_v42  ;;  %v2583_v14 = vmul.f32 %v2544_v12, %v5578_v6  ;;  %vm2979_vm13 = vmor %vm2977_vm12, %vm2978_vm11 }
 0x3c9   : > { %v2973_v48 = vmul.f32 %v3973_v62, %v2972_v16  ;;  %vm2987_vm15 = vweird.f32 %v2742_v50 }
 0x3ca   : > { %v2970_v11 = vsel %vm2969_vm10, %v3971_v43, %v2966_v58  ;;  %v2647_v54 = vsub.f32 %v2583_v14, %v2615_v15 }
 0x3cb   : > { %v3092_v59 = vmul.f32 %v2970_v11, %v2708_v22  ;;  %v2974_v3 = vmul.f32 0.5, %v2973_v48 }
 0x3cc   : > { %v2679_v44 = vmax.f32 %v2647_v54, 0.0  ;;  %v2411_v63 = vpop.xlane.xlu1 %2410  ;;  %v2711_v54 = vsub.f32 %v5830_v53, %v6111_v42 }
 0x3cd   : > { %v3128_v13 = vmul.f32 %v6057_v5, %v3092_v59  ;;  %v6121_v56 = vmul.f32 %v5578_v6, %v2411_v63  ;;  %v2975_v2 = vsub.f32 1.5, %v2974_v3 }
 0x3ce   : > { %v3975_v39 = vpop.eup %3974  ;;  %v2743_v36 = vadd.f32 1e-05, %v2679_v44  ;;  %v2546_v29 = vpop.xlane.xlu0 %2545 }
 0x3cf   : > { %v2982_v52 = vmul.f32 %v3975_v39, %v2742_v50  ;;  %v3164_v31 = vadd.f32 %v6066_v45, %v3128_v13  ;;  %v2616_v35 = vmul.f32 %v6121_v56, %v6121_v56  ;;  %v2976_v51 = vmul.f32 %v3973_v62, %v2975_v2 }
 0x3d0   : > { %3976 = vrsqrt.f32 %v2743_v36  ;;  %v2584_v26 = vmul.f32 %v2546_v29, %v5578_v6  ;;  %vm2988_vm14 = vweird.f32 %v3975_v39  ;;  %vm2997_vm2 = vweird.f32 %v2743_v36 }
 0x3d1   : > { %v2983_v23 = vmul.f32 %v3975_v39, %v2982_v52  ;;  %3196 = vst [vmem:[%s5672_s25 + $0xa8] sm:$0xff] %v3164_v31  ;;  %v2980_v27 = vsel %vm2979_vm13, %v3973_v62, %v2976_v51  ;;  %vm2989_vm0 = vmor %vm2987_vm15, %vm2988_vm14 }
 0x3d2   : > { %v2648_v61 = vsub.f32 %v2584_v26, %v2616_v35  ;;  %v3093_v43 = vmul.f32 %v2980_v27, %v2709_v47 }
 0x3d3   : > { %v2984_v57 = vmul.f32 0.5, %v2983_v23 }
 0x3d4   : > { %v2413_v9 = vpop.xlane.xlu2 %2412  ;;  %v2680_v19 = vmax.f32 %v2648_v61, 0.0  ;;  %v3129_v46 = vmul.f32 %v6057_v5, %v3093_v43  ;;  %v2712_v61 = vsub.f32 %v5858_v18, %v6121_v56 }
 0x3d5   : > { %v2985_v33 = vsub.f32 1.5, %v2984_v57  ;;  %v6131_v28 = vmul.f32 %v5578_v6, %v2413_v9 }
 0x3d6   : > { %v3977_v55 = vpop.eup %3976  ;;  %v2548_v37 = vpop.xlane.xlu1 %2547  ;;  %v2744_v4 = vadd.f32 1e-05, %v2680_v19  ;;  %v3165_v7 = vadd.f32 %v6066_v45, %v3129_v46 }
 0x3d7   : > { %v2986_v20 = vmul.f32 %v3975_v39, %v2985_v33  ;;  %v2992_v0 = vmul.f32 %v3977_v55, %v2743_v36  ;;  %v2617_v21 = vmul.f32 %v6131_v28, %v6131_v28  ;;  %v2585_v8 = vmul.f32 %v2548_v37, %v5578_v6 }
 0x3d8   : > { %3978 = vrsqrt.f32 %v2744_v4  ;;  %3197 = vst [vmem:[%s5672_s25 + $0xb0] sm:$0xff] %v3165_v7  ;;  %vm2998_vm1 = vweird.f32 %v3977_v55  ;;  %vm3007_vm5 = vweird.f32 %v2744_v4  ;;  %v2713_v56 = vsub.f32 %v5885_v40, %v6131_v28 }
 0x3d9   : > { %v2990_v1 = vsel %vm2989_vm0, %v3975_v39, %v2986_v20  ;;  %v2993_v32 = vmul.f32 %v3977_v55, %v2992_v0  ;;  %v2649_v50 = vsub.f32 %v2585_v8, %v2617_v21  ;;  %vm2999_vm3 = vmor %vm2997_vm2, %vm2998_vm1 }
 0x3da   : > { %v3094_v41 = vmul.f32 %v2990_v1, %v2710_v60 }
 0x3db   : > { %v2994_v10 = vmul.f32 0.5, %v2993_v32  ;;  %v2681_v38 = vmax.f32 %v2649_v50, 0.0 }
 0x3dc   : > { %v3130_v34 = vmul.f32 %v6057_v5, %v3094_v41  ;;  %v2415_v58 = vpop.xlane.xlu0 %2414 }
 0x3dd   : > { %v2995_v62 = vsub.f32 1.5, %v2994_v10  ;;  %v2745_v15 = vadd.f32 1e-05, %v2681_v38  ;;  %v6144_v14 = vmul.f32 %v5578_v6, %v2415_v58 }
 0x3de   : > { %v3166_v12 = vadd.f32 %v6066_v45, %v3130_v34  ;;  %v3979_v22 = vpop.eup %3978  ;;  %v2550_v11 = vpop.xlane.xlu2 %2549 }
 0x3df   : > { %v2996_v16 = vmul.f32 %v3977_v55, %v2995_v62  ;;  %v3002_v59 = vmul.f32 %v3979_v22, %v2744_v4  ;;  %3980 = vrsqrt.f32 %v2745_v15  ;;  %v2618_v44 = vmul.f32 %v6144_v14, %v6144_v14 }
 0x3e0   : > { %3198 = vst [vmem:[%s5672_s25 + $0xb8] sm:$0xff] %v3166_v12  ;;  %v2586_v39 = vmul.f32 %v2550_v11, %v5578_v6  ;;  %vm3008_vm4 = vweird.f32 %v3979_v22  ;;  %vm3017_vm8 = vweird.f32 %v2745_v15 }
 0x3e1   : > { %v3000_v48 = vsel %vm2999_vm3, %v3977_v55, %v2996_v16  ;;  %v3003_v3 = vmul.f32 %v3979_v22, %v3002_v59  ;;  %vm3009_vm6 = vmor %vm3007_vm5, %vm3008_vm4  ;;  %v2714_v16 = vsub.f32 %v5915_v49, %v6144_v14 }
 0x3e2   : > { %v3095_v13 = vmul.f32 %v3000_v48, %v2711_v54  ;;  %v2650_v63 = vsub.f32 %v2586_v39, %v2618_v44 }
 0x3e3   : > { %v3004_v36 = vmul.f32 0.5, %v3003_v3 }
 0x3e4   : > { %v3131_v52 = vmul.f32 %v6057_v5, %v3095_v13  ;;  %v2682_v31 = vmax.f32 %v2650_v63, 0.0  ;;  %v2417_v2 = vpop.xlane.xlu1 %2416 }
 0x3e5   : > { %v3981_v23 = vpop.eup %3980  ;;  %v3005_v42 = vsub.f32 1.5, %v3004_v36  ;;  %v6155_v35 = vmul.f32 %v5578_v6, %v2417_v2 }
 0x3e6   : > { %v3167_v53 = vadd.f32 %v6066_v45, %v3131_v52  ;;  %v3012_v29 = vmul.f32 %v3981_v23, %v2745_v15  ;;  %v2746_v51 = vadd.f32 1e-05, %v2682_v31  ;;  %v2552_v26 = vpop.xlane.xlu0 %2551  ;;  %vm3018_vm7 = vweird.f32 %v3981_v23 }
 0x3e7   : > { %v3006_v47 = vmul.f32 %v3979_v22, %v3005_v42  ;;  %v2619_v57 = vmul.f32 %v6155_v35, %v6155_v35  ;;  %v2587_v27 = vmul.f32 %v2552_v26, %v5578_v6  ;;  %vm3019_vm9 = vmor %vm3017_vm8, %vm3018_vm7 }
 0x3e8   : > { %3199 = vst [vmem:[%s5672_s25 + $0xc0] sm:$0xff] %v3167_v53  ;;  %v3013_v43 = vmul.f32 %v3981_v23, %v3012_v29  ;;  %3982 = vrsqrt.f32 %v2746_v51  ;;  %vm3027_vm11 = vweird.f32 %v2746_v51  ;;  %v2715_v53 = vsub.f32 %v5941_v17, %v6155_v35 }
 0x3e9   : > { %v3010_v33 = vsel %vm3009_vm6, %v3979_v22, %v3006_v47  ;;  %v2651_v9 = vsub.f32 %v2587_v27, %v2619_v57 }
 0x3ea   : > { %v3096_v19 = vmul.f32 %v3010_v33, %v2712_v61  ;;  %v3014_v55 = vmul.f32 0.5, %v3013_v43 }
 0x3eb   : > { %v2683_v46 = vmax.f32 %v2651_v9, 0.0 }
 0x3ec   : > { %v3132_v20 = vmul.f32 %v6057_v5, %v3096_v19  ;;  %v3015_v37 = vsub.f32 1.5, %v3014_v55  ;;  %v2419_v18 = vpop.xlane.xlu2 %2418 }
 0x3ed   : > { %v2747_v60 = vadd.f32 1e-05, %v2683_v46  ;;  %v6190_v42 = vmul.f32 %v5578_v6, %v2419_v18 }
 0x3ee   : > { %v3983_v0 = vpop.eup %3982  ;;  %v3168_v4 = vadd.f32 %v6066_v45, %v3132_v20  ;;  %v3016_v21 = vmul.f32 %v3981_v23, %v3015_v37 }
 0x3ef   : > { %v3022_v7 = vmul.f32 %v3983_v0, %v2746_v51  ;;  %3984 = vrsqrt.f32 %v2747_v60  ;;  %vm3028_vm10 = vweird.f32 %v3983_v0  ;;  %vm3037_vm14 = vweird.f32 %v2747_v60 }
 0x3f0   : > { %3200 = vst [vmem:[%s5672_s25 + $0xc8] sm:$0xff] %v3168_v4  ;;  %v3020_v1 = vsel %vm3019_vm9, %v3981_v23, %v3016_v21  ;;  %vm3029_vm12 = vmor %vm3027_vm11, %vm3028_vm10  ;;  %v2620_v61 = vmul.f32 %v6190_v42, %v6190_v42 }
 0x3f1   : > { %v3097_v8 = vmul.f32 %v3020_v1, %v2713_v56  ;;  %v3023_v41 = vmul.f32 %v3983_v0, %v3022_v7 }
 0x3f3   : > { %v3133_v32 = vmul.f32 %v6057_v5, %v3097_v8  ;;  %v3024_v50 = vmul.f32 0.5, %v3023_v41 }
 0x3f4   : > { %v2421_v34 = vpop.xlane.xlu0 %2420 }
 0x3f5   : > { %v3985_v10 = vpop.eup %3984  ;;  %v3169_v38 = vadd.f32 %v6066_v45, %v3133_v32  ;;  %v3025_v12 = vsub.f32 1.5, %v3024_v50  ;;  %v6171_v62 = vmul.f32 %v5578_v6, %v2421_v34 }
 0x3f6   : > { %v3032_v40 = vmul.f32 %v3985_v10, %v2747_v60  ;;  %v2556_v28 = vpop.xlane.xlu2 %2555  ;;  %vm3038_vm13 = vweird.f32 %v3985_v10 }
 0x3f7   : > { %3201 = vst [vmem:[%s5672_s25 + $0xd0] sm:$0xff] %v3169_v38  ;;  %v3026_v58 = vmul.f32 %v3983_v0, %v3025_v12  ;;  %v2621_v15 = vmul.f32 %v6171_v62, %v6171_v62  ;;  %v2589_v22 = vmul.f32 %v2556_v28, %v5578_v6  ;;  %vm3039_vm15 = vmor %vm3037_vm14, %vm3038_vm13  ;;  %v2717_v18 = vsub.f32 %v5988_v30, %v6171_v62 }
 0x3f8   : > { %v3033_v11 = vmul.f32 %v3985_v10, %v3032_v40 }
 0x3f9   : > { %v3030_v54 = vsel %vm3029_vm12, %v3983_v0, %v3026_v58  ;;  %v2653_v59 = vsub.f32 %v2589_v22, %v2621_v15 }
 0x3fa   : > { %v3098_v48 = vmul.f32 %v3030_v54, %v2714_v16  ;;  %v3034_v44 = vmul.f32 0.5, %v3033_v11 }
 0x3fb   : > { %v2685_v13 = vmax.f32 %v2653_v59, 0.0 }
 0x3fc   : > { %v2423_v39 = vpop.xlane.xlu1 %2422  ;;  %v3134_v63 = vmul.f32 %v6057_v5, %v3098_v48  ;;  %v3035_v52 = vsub.f32 1.5, %v3034_v44 }
 0x3fd   : > { %v6180_v3 = vmul.f32 %v5578_v6, %v2423_v39  ;;  %v2749_v31 = vadd.f32 1e-05, %v2685_v13 }
 0x3fe   : > { %v2558_v36 = vpop.xlane.xlu0 %2557  ;;  %v3170_v2 = vadd.f32 %v6066_v45, %v3134_v63  ;;  %v3036_v23 = vmul.f32 %v3985_v10, %v3035_v52 }
 0x3ff   : > { %v2622_v49 = vmul.f32 %v6180_v3, %v6180_v3  ;;  %v2590_v14 = vmul.f32 %v2558_v36, %v5578_v6  ;;  %3986 = vrsqrt.f32 %v2749_v31  ;;  %vm3057_vm1 = vweird.f32 %v2749_v31 }
 0x400   : > { %3202 = vst [vmem:[%s5672_s25 + $0xd8] sm:$0xff] %v3170_v2  ;;  %v3040_v51 = vsel %vm3039_vm15, %v3985_v10, %v3036_v23  ;;  %v2718_v30 = vsub.f32 %v6005_v24, %v6180_v3  ;;  %v2716_v24 = vsub.f32 %v5966_v25, %v6190_v42 }
 0x401   : > { %v2654_v29 = vsub.f32 %v2590_v14, %v2622_v49  ;;  %v3099_v26 = vmul.f32 %v3040_v51, %v2715_v53 }
 0x403   : > { %v2686_v47 = vmax.f32 %v2654_v29, 0.0  ;;  %v3135_v27 = vmul.f32 %v6057_v5, %v3099_v26 }
 0x404   : > { %v2554_v57 = vpop.xlane.xlu1 %2553 }
 0x405   : > { %v2750_v43 = vadd.f32 1e-05, %v2686_v47  ;;  %v2588_v17 = vmul.f32 %v2554_v57, %v5578_v6  ;;  %v3987_v35 = vpop.eup %3986  ;;  %v3171_v33 = vadd.f32 %v6066_v45, %v3135_v27 }
 0x406   : > { %v3052_v19 = vmul.f32 %v3987_v35, %v2749_v31  ;;  %vm3058_vm0 = vweird.f32 %v3987_v35 }
 0x407   : > { %3988 = vrsqrt.f32 %v2750_v43  ;;  %v2652_v9 = vsub.f32 %v2588_v17, %v2620_v61  ;;  %3203 = vst [vmem:[%s5672_s25 + $0xe0] sm:$0xff] %v3171_v33  ;;  %vm3059_vm2 = vmor %vm3057_vm1, %vm3058_vm0  ;;  %vm3067_vm4 = vweird.f32 %v2750_v43 }
 0x408   : > { %v3053_v46 = vmul.f32 %v3987_v35, %v3052_v19 }
 0x409   : > { %v2684_v55 = vmax.f32 %v2652_v9, 0.0 }
 0x40a   : > { %v3054_v37 = vmul.f32 0.5, %v3053_v46 }
 0x40b   : > { %v2748_v20 = vadd.f32 1e-05, %v2684_v55 }
 0x40c   : > { %v3055_v0 = vsub.f32 1.5, %v3054_v37 }
 0x40d   : > { %v3989_v60 = vpop.eup %3988  ;;  %3990 = vrsqrt.f32 %v2748_v20  ;;  %vm3047_vm7 = vweird.f32 %v2748_v20 }
 0x40e   : > { %v3062_v4 = vmul.f32 %v3989_v60, %v2750_v43  ;;  %v3056_v21 = vmul.f32 %v3987_v35, %v3055_v0  ;;  %vm3068_vm3 = vweird.f32 %v3989_v60 }
 0x40f   : > { %vm3069_vm5 = vmor %vm3067_vm4, %vm3068_vm3 }
 0x410   : > { %v3063_v6 = vmul.f32 %v3989_v60, %v3062_v4  ;;  %v3060_v56 = vsel %vm3059_vm2, %v3987_v35, %v3056_v21 }
 0x411   : > { %v3101_v8 = vmul.f32 %v3060_v56, %v2717_v18 }
 0x412   : > { %v3064_v7 = vmul.f32 0.5, %v3063_v6 }
 0x413   : > { %v3991_v1 = vpop.eup %3990  ;;  %v3137_v50 = vmul.f32 %v6057_v5, %v3101_v8 }
 0x414   : > { %v3065_v41 = vsub.f32 1.5, %v3064_v7  ;;  %v3042_v32 = vmul.f32 %v3991_v1, %v2748_v20  ;;  %vm3048_vm6 = vweird.f32 %v3991_v1 }
 0x415   : > { %v3173_v38 = vadd.f32 %v6066_v45, %v3137_v50  ;;  %vm3049_vm8 = vmor %vm3047_vm7, %vm3048_vm6 }
 0x416   : > { %v3066_v34 = vmul.f32 %v3989_v60, %v3065_v41  ;;  %v3043_v10 = vmul.f32 %v3991_v1, %v3042_v32 }
 0x417   : > { %3205 = vst [vmem:[%s5672_s25 + $0xf0] sm:$0xff] %v3173_v38 }
 0x418   : > { %v3070_v12 = vsel %vm3069_vm5, %v3989_v60, %v3066_v34  ;;  %v3044_v62 = vmul.f32 0.5, %v3043_v10 }
 0x419   : > { %v3102_v40 = vmul.f32 %v3070_v12, %v2718_v30 }
 0x41a   : > { %v3045_v28 = vsub.f32 1.5, %v3044_v62 }
 0x41b   : > { %v3138_v58 = vmul.f32 %v6057_v5, %v3102_v40 }
 0x41c   : > { %v3046_v15 = vmul.f32 %v3991_v1, %v3045_v28 }
 0x41d   : > { %v3174_v22 = vadd.f32 %v6066_v45, %v3138_v58 }
 0x41e   : > { %v3050_v16 = vsel %vm3049_vm8, %v3991_v1, %v3046_v15 }
 0x41f   : > { %3206 = vst [vmem:[%s5672_s25 + $0xf8] sm:$0xff] %v3174_v22  ;;  %v3100_v11 = vmul.f32 %v3050_v16, %v2716_v24 }
 0x421   : > { %v3136_v54 = vmul.f32 %v6057_v5, %v3100_v11 }
 0x423   : > { %v3172_v59 = vadd.f32 %v6066_v45, %v3136_v54 }
 0x425   : > { %3204 = vst [vmem:[%s5672_s25 + $0xe8] sm:$0xff] %v3172_v59 }
 0x426   : > { %4026 = shalt.err (!%p4023_p9)
}
 0x427   : > { %s4096_s17 = smov 128   ;;  %s4097_s25 = smov 8  }
 0x428   : > { %3850 = dma.vmem_to_hbm [thread:$0]  (%p4199_p3), %s3226_s20, 4096, %s3228_s19, %s3208_s27, %s4096_s17, %s4096_s17, %s4097_s25  }
 0x429 PF: > { %p3856_p10 = scmp.ge.s32.totalorder %s4093_s16, 2  ;;  %s3242_s13 = sand.u32 1, %s4065_s30  }
 0x42a   : > { %s3243_s28 = scalar_lea.sflag [#allocation3], %s3242_s13 }
 0x42b   : > { %p3853_p11 = pnand %p3856_p10, %p4208_p8 }
 0x42d   : > { %p3854_p12 = pneg %p3853_p11 }
 0x42f   : > { %4060 = dma.done.wait (%p3854_p12), %s3243_s28, 4096  }
 0x430   : > { %4062 = vsyncadd (%p3854_p12), %s3243_s28, 4294963200  ;;  %s22_s16 = sadd.s32 1, %s4093_s16   ;;  %s6343_s15 = sld [smem:[#allocation9_spill]] }
 0x431   : > { %p19_p13 = scmp.ge.s32.totalorder %s22_s16, 10   ;;  %s6344_s12 = sld [smem:[#allocation5_spill]] }
 0x432   : > { %s6345_s13 = sld [smem:[#allocation6_spill]]  ;;  %s6348_s30 = smov %s4069_s10 }
 0x433   : > { %s6346_s14 = sld [smem:[#allocation7_spill]]  ;;  %s6349_s10 = smov %s4073_s11 }
 0x434   : > { %s6347_s22 = sld [smem:[#allocation8_spill]] }
 0x436   : > { %s6350_s11 = smov %s6343_s15  ;;  %21 = sbr.rel (!%p19_p13) target bundleno = 5 (0x5), region = 97 }
 0x43a   : > { %s6351_s15 = smov %s6347_s22 }
 0x43b   :  { %3249 = vsyncpa [#allocation3], 1 }
 0x43c   :  { %3251 = vsyncpa [#allocation3 + $0x1], 1 }

</bundles_post_ra>
